<compile_context>
chip_gen: v7x
topology: tpu7x:2x2x1
jax: 0.10.0
libtpu: 0.0.40
codegen_flags: <defaults>
</compile_context>

<pallas_src>
import jax
import jax.numpy as jnp
from jax import lax
from jax.experimental import pallas as pl
from jax.experimental.pallas import tpu as pltpu


# --------------------------- fused Pallas kernel -----------------------------

def _fused_bottleneck_kernel(x_ref, w1_ref, b1_ref, w2c_ref, b2_ref,
                             w3_ref, b3_ref, o_ref):
    """conv1x1 -> ReLU -> conv3x3(centre tap) -> ReLU -> conv1x1 -> ReLU -> +x.

    x_ref  : [TM, Cin]      f32 row tile (rows = N*H*W at 1x1 spatial)
    w1_ref : [Cin, Cmid]    bf16
    b1_ref : [1, Cmid]      f32
    w2c_ref: [Cmid, Cmid]   bf16 (centre tap of the 3x3 conv weight)
    b2_ref : [1, Cmid]      f32
    w3_ref : [Cmid, Cout]   bf16
    b3_ref : [1, Cout]      f32
    o_ref  : [TM, Cout]     f32
    """
    x_f32 = x_ref[...]                                  # (TM, Cin) f32
    x_bf16 = x_f32.astype(jnp.bfloat16)                 # matmul input only

    # conv1: 1x1 == channel matmul, f32 accumulation on the MXU.
    h1 = jnp.dot(x_bf16, w1_ref[...], preferred_element_type=jnp.float32)
    h1 = jnp.maximum(h1 + b1_ref[...], 0.0).astype(jnp.bfloat16)

    # conv2: 3x3, stride 1, pad 1 at 1x1 spatial.  The zero-padded 3x3 window
    # is zero everywhere except its centre (kh = kw = 1), so the whole conv
    # reduces to a single matmul against the centre-tap weight block.
    h2 = jnp.dot(h1, w2c_ref[...], preferred_element_type=jnp.float32)
    h2 = jnp.maximum(h2 + b2_ref[...], 0.0).astype(jnp.bfloat16)

    # conv3: 1x1, stride 2 (identity at 1x1 spatial) + ReLU, fused residual
    # add against the exact f32 input.
    y = jnp.dot(h2, w3_ref[...], preferred_element_type=jnp.float32)
    y = jnp.maximum(y + b3_ref[...], 0.0) + x_f32
    o_ref[...] = y.astype(o_ref.dtype)


# --------------------------- wrapper ------------------------------------------

def bottleneck_without_downsample(x_nchw, params, *, tile_m=512):
    """Pallas forward of BottleNeck_without_downsample (activation = ReLU).

    x_nchw: [N, Cin, H, W] (H == W == 1 and Cout == Cin required by `out += x`).
    params: kernel-layout params from init_params()[0].
    """
    n, cin, h, w = x_nchw.shape
    cmid = params["w1"].shape[1]
    cout = params["w3"].shape[1]

    # `out += x` in the PyTorch module is only shape-valid when the stride-2
    # output matches x exactly: spatial 1x1 and out_dim == in_dim.
    assert (h, w) == (1, 1) and cout == cin, (
        "BottleNeck_without_downsample: `out += x` requires the stride-2 "
        "output to match the input shape (spatial 1x1, out_dim == in_dim).")

    m = n * h * w
    # At 1x1 spatial, NCHW -> [rows, C] is a pure reshape (no transpose pass).
    # x stays f32: cast to bf16 happens inside the kernel (matmul input only),
    # so the residual add uses the exact f32 values and no extra XLA cast pass
    # re-reads / re-writes the input in HBM.
    x2d = x_nchw.reshape(m, cin)

    # Row tile: large tiles amortize the ~0.35us per-step overhead and stream
    # long M through the MXU.  Per-step VMEM at tm=512, C=256 is ~2.5 MiB —
    # comfortably inside v5e/v6e's 16 MiB and v7x's 32 MiB default scoped VMEM.
    tm = min(tile_m, m)
    if tm < m:
        tm = max(8, (tm // 8) * 8)          # (8,128) tiling rule on row blocks
    grid = (pl.cdiv(m, tm),)

    # Advisory cost estimate (centre-tap conv2, f32 input / output streams).
    flops = 2 * m * (cin * cmid + cmid * cmid + cmid * cout)
    bytes_accessed = (m * cin * 4 + m * cout * 4
                      + (cin * cmid + cmid * cmid + cmid * cout) * 2
                      + (2 * cmid + cout) * 4)

    out2d = pl.pallas_call(
        _fused_bottleneck_kernel,
        out_shape=jax.ShapeDtypeStruct((m, cout), x_nchw.dtype),
        grid=grid,
        in_specs=[
            pl.BlockSpec((tm, cin), lambda i: (i, 0)),       # x row tile (f32)
            pl.BlockSpec((cin, cmid), lambda i: (0, 0)),     # w1 (resident)
            pl.BlockSpec((1, cmid), lambda i: (0, 0)),       # b1
            pl.BlockSpec((cmid, cmid), lambda i: (0, 0)),    # w2 centre tap
            pl.BlockSpec((1, cmid), lambda i: (0, 0)),       # b2
            pl.BlockSpec((cmid, cout), lambda i: (0, 0)),    # w3
            pl.BlockSpec((1, cout), lambda i: (0, 0)),       # b3
        ],
        out_specs=pl.BlockSpec((tm, cout), lambda i: (i, 0)),
        compiler_params=pltpu.CompilerParams(
            dimension_semantics=("parallel",)),              # v7x: 2 TCs
        cost_estimate=pl.CostEstimate(flops=flops, transcendentals=0,
                                      bytes_accessed=bytes_accessed),
    )(x2d, params["w1"], params["b1"], params["w2c"], params["b2"],
      params["w3"], params["b3"])

    return out2d.reshape(n, cout, h, w)


# --------------------------- params & reference ------------------------------

def init_params(key, in_dim, mid_dim, out_dim, w_scale=0.05):
    """Deterministic synthetic params; returns (kernel-layout, pytorch-layout)."""
    ks = jax.random.split(key, 6)
    pt = {
        "w1": jax.random.normal(ks[0], (mid_dim, in_dim, 1, 1), jnp.float32) * w_scale,
        "b1": jax.random.normal(ks[1], (mid_dim,), jnp.float32) * w_scale,
        "w2": jax.random.normal(ks[2], (mid_dim, mid_dim, 3, 3), jnp.float32) * w_scale,
        "b2": jax.random.normal(ks[3], (mid_dim,), jnp.float32) * w_scale,
        "w3": jax.random.normal(ks[4], (out_dim, mid_dim, 1, 1), jnp.float32) * w_scale,
        "b3": jax.random.normal(ks[5], (out_dim,), jnp.float32) * w_scale,
    }
    kernel_params = {
        # bf16 weights at the call boundary; biases stay f32 (added to the
        # f32 accumulator).
        "w1": jnp.transpose(pt["w1"][:, :, 0, 0], (1, 0)).astype(jnp.bfloat16),
        "b1": pt["b1"].reshape(1, mid_dim),
        # Only the centre tap (kh = kw = 1) of the 3x3 weight can touch
        # nonzero data at 1x1 spatial with zero padding; [Cout, Cin] -> [Cin, Cout].
        "w2c": jnp.transpose(pt["w2"][:, :, 1, 1], (1, 0)).astype(jnp.bfloat16),
        "b2": pt["b2"].reshape(1, mid_dim),
        "w3": jnp.transpose(pt["w3"][:, :, 0, 0], (1, 0)).astype(jnp.bfloat16),
        "b3": pt["b3"].reshape(1, out_dim),
    }
    return kernel_params, pt


def reference_forward(x, pt):
    """Pure-JAX NCHW reference mirroring the PyTorch module (f32)."""
    def conv(x, w, b, stride, pad):
        y = lax.conv_general_dilated(
            x, w, window_strides=(stride, stride),
            padding=[(pad, pad), (pad, pad)],
            dimension_numbers=("NCHW", "OIHW", "NCHW"),
            precision=lax.Precision.HIGHEST)
        return y + b.reshape(1, -1, 1, 1)

    h1 = jnp.maximum(conv(x, pt["w1"], pt["b1"], 1, 0), 0.0)
    h2 = jnp.maximum(conv(h1, pt["w2"], pt["b2"], 1, 1), 0.0)
    h3 = jnp.maximum(conv(h2, pt["w3"], pt["b3"], 2, 0), 0.0)
    return h3 + x


# --------------------------- demo ---------------------------------------------

if __name__ == "__main__":
    key = jax.random.PRNGKey(0)
    kx, kp = jax.random.split(key)

    # Shapes the original PyTorch forward can actually run at: spatial 1x1 and
    # out_dim == in_dim (required by `out += x` after the stride-2 conv).
    # Channel dims are multiples of 128 so every matmul output is lane-dense;
    # M = 1024 with tile_m = 512 gives an even grid of 2 (both v7x TCs busy).
    N, IN_DIM, MID_DIM, OUT_DIM, H, W = 1024, 256, 128, 256, 1, 1

    x = jax.random.normal(kx, (N, IN_DIM, H, W), jnp.float32)
    kparams, pt_params = init_params(kp, IN_DIM, MID_DIM, OUT_DIM)

    out = jax.block_until_ready(bottleneck_without_downsample(x, kparams))
    ref = reference_forward(x, pt_params)

    assert out.shape == ref.shape == (N, OUT_DIM, H, W)
    max_err = float(jnp.max(jnp.abs(out - ref)))
    # bf16 matmul inputs with f32 accumulation -> loosened tolerance
    # (the residual path itself is exact f32 now).
    assert jnp.allclose(out, ref, rtol=5e-2, atol=5e-2), (
        "max abs err = %g" % max_err)

    print("KERNEL_OK")
</pallas_src>

<mosaic_0001>
module attributes {stable_mosaic.version = 11 : i64} {
  func.func @_fused_bottleneck_kernel(%arg0: i32, %arg1: memref<512x256xf32, #tpu.memory_space<vmem>>, %arg2: memref<256x128xbf16, #tpu.memory_space<vmem>>, %arg3: memref<1x128xf32, #tpu.memory_space<vmem>>, %arg4: memref<128x128xbf16, #tpu.memory_space<vmem>>, %arg5: memref<1x128xf32, #tpu.memory_space<vmem>>, %arg6: memref<128x256xbf16, #tpu.memory_space<vmem>>, %arg7: memref<1x256xf32, #tpu.memory_space<vmem>>, %arg8: memref<512x256xf32, #tpu.memory_space<vmem>>) attributes {dimension_semantics = [#tpu.dimension_semantics<parallel>], iteration_bounds = array<i64: 2>, scalar_prefetch = 0 : i64, scratch_operands = 0 : i64, tpu.core_type = #tpu.core_type<tc>, window_params = [{transform_indices = @transform_0, window_bounds = array<i64: 512, 256>}, {pipeline_mode = #tpu.pipeline_mode<synchronous>, transform_indices = @transform_1, window_bounds = array<i64: 256, 128>}, {pipeline_mode = #tpu.pipeline_mode<synchronous>, transform_indices = @transform_2, window_bounds = array<i64: 1, 128>}, {pipeline_mode = #tpu.pipeline_mode<synchronous>, transform_indices = @transform_3, window_bounds = array<i64: 128, 128>}, {pipeline_mode = #tpu.pipeline_mode<synchronous>, transform_indices = @transform_4, window_bounds = array<i64: 1, 128>}, {pipeline_mode = #tpu.pipeline_mode<synchronous>, transform_indices = @transform_5, window_bounds = array<i64: 128, 256>}, {pipeline_mode = #tpu.pipeline_mode<synchronous>, transform_indices = @transform_6, window_bounds = array<i64: 1, 256>}, {transform_indices = @transform_7, window_bounds = array<i64: 512, 256>}]} {
    %c0 = arith.constant 0 : index
    %c0_0 = arith.constant 0 : index
    %0 = vector.load %arg1[%c0, %c0_0] : memref<512x256xf32, #tpu.memory_space<vmem>>, vector<512x256xf32>
    %1 = arith.truncf %0 : vector<512x256xf32> to vector<512x256xbf16>
    %c0_1 = arith.constant 0 : index
    %c0_2 = arith.constant 0 : index
    %2 = vector.load %arg2[%c0_1, %c0_2] : memref<256x128xbf16, #tpu.memory_space<vmem>>, vector<256x128xbf16>
    %cst = arith.constant dense<0.000000e+00> : vector<512x128xf32>
    %3 = tpu.matmul %1, %2, %cst {dimension_numbers = #tpu.dot_dimension_numbers<[1], [0], [0], [1], [0, 0, 1, 1], [], []>} : vector<512x256xbf16>, vector<256x128xbf16>, vector<512x128xf32> -> vector<512x128xf32>
    %c0_3 = arith.constant 0 : index
    %c0_4 = arith.constant 0 : index
    %4 = vector.load %arg3[%c0_3, %c0_4] : memref<1x128xf32, #tpu.memory_space<vmem>>, vector<1x128xf32>
    %5 = vector.broadcast %4 : vector<1x128xf32> to vector<512x128xf32>
    %6 = arith.addf %3, %5 : vector<512x128xf32>
    %cst_5 = arith.constant 0.000000e+00 : f32
    %7 = vector.broadcast %cst_5 : f32 to vector<512x128xf32>
    %8 = arith.maximumf %6, %7 : vector<512x128xf32>
    %9 = arith.truncf %8 : vector<512x128xf32> to vector<512x128xbf16>
    %c0_6 = arith.constant 0 : index
    %c0_7 = arith.constant 0 : index
    %10 = vector.load %arg4[%c0_6, %c0_7] : memref<128x128xbf16, #tpu.memory_space<vmem>>, vector<128x128xbf16>
    %cst_8 = arith.constant dense<0.000000e+00> : vector<512x128xf32>
    %11 = tpu.matmul %9, %10, %cst_8 {dimension_numbers = #tpu.dot_dimension_numbers<[1], [0], [0], [1], [0, 0, 1, 1], [], []>} : vector<512x128xbf16>, vector<128x128xbf16>, vector<512x128xf32> -> vector<512x128xf32>
    %c0_9 = arith.constant 0 : index
    %c0_10 = arith.constant 0 : index
    %12 = vector.load %arg5[%c0_9, %c0_10] : memref<1x128xf32, #tpu.memory_space<vmem>>, vector<1x128xf32>
    %13 = vector.broadcast %12 : vector<1x128xf32> to vector<512x128xf32>
    %14 = arith.addf %11, %13 : vector<512x128xf32>
    %cst_11 = arith.constant 0.000000e+00 : f32
    %15 = vector.broadcast %cst_11 : f32 to vector<512x128xf32>
    %16 = arith.maximumf %14, %15 : vector<512x128xf32>
    %17 = arith.truncf %16 : vector<512x128xf32> to vector<512x128xbf16>
    %c0_12 = arith.constant 0 : index
    %c0_13 = arith.constant 0 : index
    %18 = vector.load %arg6[%c0_12, %c0_13] : memref<128x256xbf16, #tpu.memory_space<vmem>>, vector<128x256xbf16>
    %cst_14 = arith.constant dense<0.000000e+00> : vector<512x256xf32>
    %19 = tpu.matmul %17, %18, %cst_14 {dimension_numbers = #tpu.dot_dimension_numbers<[1], [0], [0], [1], [0, 0, 1, 1], [], []>} : vector<512x128xbf16>, vector<128x256xbf16>, vector<512x256xf32> -> vector<512x256xf32>
    %c0_15 = arith.constant 0 : index
    %c0_16 = arith.constant 0 : index
    %20 = vector.load %arg7[%c0_15, %c0_16] : memref<1x256xf32, #tpu.memory_space<vmem>>, vector<1x256xf32>
    %21 = vector.broadcast %20 : vector<1x256xf32> to vector<512x256xf32>
    %22 = arith.addf %19, %21 : vector<512x256xf32>
    %cst_17 = arith.constant 0.000000e+00 : f32
    %23 = vector.broadcast %cst_17 : f32 to vector<512x256xf32>
    %24 = arith.maximumf %22, %23 : vector<512x256xf32>
    %25 = arith.addf %24, %0 : vector<512x256xf32>
    %c0_18 = arith.constant 0 : index
    %c0_19 = arith.constant 0 : index
    %26 = vector.load %arg8[%c0_18, %c0_19] : memref<512x256xf32, #tpu.memory_space<vmem>>, vector<512x256xf32>
    tpu.vector_store %arg8[%c0_18, %c0_19], %25 {strides = array<i32>} : memref<512x256xf32, #tpu.memory_space<vmem>>, vector<512x256xf32>,
    return
  }
  func.func @transform_0(%arg0: i32) -> (i32, i32) {
    %c0_i32 = arith.constant 0 : i32
    %c0_i32_0 = arith.constant 0 : i32
    return %arg0, %c0_i32 : i32, i32
  }
  func.func @transform_1(%arg0: i32) -> (i32, i32) {
    %c0_i32 = arith.constant 0 : i32
    %c0_i32_0 = arith.constant 0 : i32
    %c0_i32_1 = arith.constant 0 : i32
    return %c0_i32, %c0_i32_0 : i32, i32
  }
  func.func @transform_2(%arg0: i32) -> (i32, i32) {
    %c0_i32 = arith.constant 0 : i32
    %c0_i32_0 = arith.constant 0 : i32
    %c0_i32_1 = arith.constant 0 : i32
    return %c0_i32, %c0_i32_0 : i32, i32
  }
  func.func @transform_3(%arg0: i32) -> (i32, i32) {
    %c0_i32 = arith.constant 0 : i32
    %c0_i32_0 = arith.constant 0 : i32
    %c0_i32_1 = arith.constant 0 : i32
    return %c0_i32, %c0_i32_0 : i32, i32
  }
  func.func @transform_4(%arg0: i32) -> (i32, i32) {
    %c0_i32 = arith.constant 0 : i32
    %c0_i32_0 = arith.constant 0 : i32
    %c0_i32_1 = arith.constant 0 : i32
    return %c0_i32, %c0_i32_0 : i32, i32
  }
  func.func @transform_5(%arg0: i32) -> (i32, i32) {
    %c0_i32 = arith.constant 0 : i32
    %c0_i32_0 = arith.constant 0 : i32
    %c0_i32_1 = arith.constant 0 : i32
    return %c0_i32, %c0_i32_0 : i32, i32
  }
  func.func @transform_6(%arg0: i32) -> (i32, i32) {
    %c0_i32 = arith.constant 0 : i32
    %c0_i32_0 = arith.constant 0 : i32
    %c0_i32_1 = arith.constant 0 : i32
    return %c0_i32, %c0_i32_0 : i32, i32
  }
  func.func @transform_7(%arg0: i32) -> (i32, i32) {
    %c0_i32 = arith.constant 0 : i32
    %c0_i32_0 = arith.constant 0 : i32
    return %arg0, %c0_i32 : i32, i32
  }
}

</mosaic_0001>

<bundles_post_ra>
// kernel: tpu_custom_call.1
= control target key start
LH: loop header
LB: loop body
LE: loop exit
PB: predicated region body
PF: predicated region fallthrough
CT: control target
= control target key end

     0   :  { %12 = vsyncpa [#allocation3], 0  ;;  %s4170_s0 = inlined_call_operand.hbm [shape: f32[1024,256], index: 0, kind: input, shape index: {}]   ;;  %s4171_s1 = inlined_call_operand.hbm [shape: bf16[256,128], index: 1, kind: input, shape index: {}]   ;;  %s4172_s2 = inlined_call_operand.vmem [shape: f32[1,128], index: 2, kind: input, shape index: {}]   ;;  %s4173_s3 = inlined_call_operand.hbm [shape: bf16[128,128], index: 3, kind: input, shape index: {}]   ;;  %s4174_s4 = inlined_call_operand.vmem [shape: f32[1,128], index: 4, kind: input, shape index: {}]   ;;  %s4175_s5 = inlined_call_operand.hbm [shape: bf16[128,256], index: 5, kind: input, shape index: {}]   ;;  %s4176_s6 = inlined_call_operand.vmem [shape: f32[1,256], index: 6, kind: input, shape index: {}]   ;;  %s4177_s7 = inlined_call_operand.hbm [shape: f32[1024,256], index: 7, kind: output, shape index: {}]  }
   0x1   :  { %14 = vsyncpa [#allocation3 + $0x1], 0 }
   0x2   :  { %15 = vsyncpa [#allocation6], 0 }
   0x3   :  { %16 = vsyncpa [#allocation9], 0 }
   0x4   :  { %17 = vsyncpa [#allocation4], 0 }
   0x5   :  { %19 = vsyncpa [#allocation4 + $0x1], 0  ;;  %s3185_s24 = smov 0   ;;  %s3187_s25 = smov 0  }
   0x6   :  { %s3189_s26 = smov 0   ;;  %s3191_s27 = smov 0  }
   0x7 LB: > { %s3206_s28 = sadd.s32 4294967295, %s3129_s27   ;;  %s2475_s29 = sadd.s32 4294967294, %s3129_s27   ;;  %s3129_s27 = sphi %s3191_s27, %s4203_s27   ;;  %s3125_s26 = sphi %s3189_s26, %s4202_s26   ;;  %s3121_s25 = sphi %s3187_s25, %s4201_s25   ;;  %s3117_s24 = sphi %s3185_s24, %s4200_s24  }
   0x8   : > { %p45_p0 = scmp.ne.s32.totalorder %s3121_s25, %s3117_s24  ;;  %p4178_p1 = scmp.eq.s32.totalorder %s3206_s28, 0 }
   0x9   : > { %p201_p3 = scmp.eq.s32.totalorder %s2475_s29, 1  ;;  %p2476_p5 = scmp.ge.s32.totalorder %s3129_s27, 1 }
   0xa   : > { %p3215_p4 = por %p4178_p1, %p45_p0  ;;  %p208_p7 = scmp.lt.s32.totalorder %s3129_s27, 3 }
   0xb   : > { %p3220_p6 = por %p201_p3, %p45_p0  ;;  %s3131_s10 = smov [#allocation5]  }
   0xc   : > { %s4182_s30 = scalar_select %p3215_p4, 1, 0 }
   0xd   : > { %s4183_s8 = scalar_select %p3220_p6, 1, 0 }
   0xe   : > { %p3225_p8 = pnand %p2476_p5, %p208_p7  ;;  %s220_s11 = sshll.u32 %s3131_s10, 4  ;;  %s3229_s11 = int_to_ptr.vmem [resolvable:$true] %s220_s11 }
   0xf   : > { %4184 = sst [smem:[#allocation15_spill]] %s4183_s8  ;;  %s3132_s13 = smov [#allocation7]  }
  0x10   : > { %s4185_s9 = scalar_select %p3225_p8, 1, 0 }
  0x11   : > { %p2695_p9 = pneg %p3225_p8  ;;  %s236_s14 = sshll.u32 %s3132_s13, 4  ;;  %s3240_s14 = int_to_ptr.vmem [resolvable:$true] %s236_s14 }
  0x12   : > { %s3133_s15 = smov [#allocation8]   ;;  %s2941_s19 = scalar_lea.hbm %s4171_s1, 2048 }
  0x13   : > { %p3236_p11 = pnand %p2695_p9, %p4178_p1  ;;  %s3242_s16 = sshll.u32 %s3133_s15, 4  ;;  %s253_s16 = int_to_ptr.vmem [resolvable:$true] %s3242_s16 }
  0x14   : > { %p2942_p12 = scmp.ne.s32.totalorder %s4171_s1, %s2941_s19  ;;  %p2948_p5 = scmp.lt.u32.totalorder %s2941_s19, %s4171_s1 }
  0x15   : > { %p3252_p13 = pneg %p3236_p11 }
  0x17   : > { %p2944_p0 = pnand %p3252_p13, %p2942_p12 }
  0x19   : > { %p2945_p3 = pneg %p2944_p0 }
  0x1b   : > { %p2950_p7 = pnand %p2948_p5, %p2945_p3 }
  0x1d   : > { %2953 = shalt.err (!%p2950_p7)
}
  0x1e   : > { %s2954_s10 = scalar_lea.vmem %s3229_s11, 2048  ;;  %p2962_p2 = scmp.lt.s32.totalorder %s3229_s11, %s3229_s11 }
  0x1f   : > { %p2955_p9 = scmp.ne.s32.totalorder %s3229_s11, %s2954_s10  ;;  %p2963_p6 = scmp.lt.s32.totalorder %s2954_s10, %s2954_s10 }
  0x21   : > { %p2957_p10 = pnand %p2955_p9, %p3252_p13  ;;  %p2964_p12 = por %p2963_p6, %p2962_p2 }
  0x23   : > { %p2958_p1 = pneg %p2957_p10 }
  0x25   : > { %p2965_p0 = pnand %p2964_p12, %p2958_p1 }
  0x27   : > { %2968 = shalt.err (!%p2965_p0)
}
  0x28   : > { %s3134_s13 = smov 64   ;;  %s3135_s15 = smov 4  }
  0x29   : > { %2698 = dma.hbm_to_vmem [thread:$0]  (!%p3236_p11), %s4171_s1, 2048, %s3229_s11, [#allocation6], %s3134_s13, %s3134_s13, %s3135_s15  }
  0x2a   : > { %s2969_s21 = scalar_lea.hbm %s4173_s3, 1024 }
  0x2b   : > { %p2970_p2 = scmp.ne.s32.totalorder %s4173_s3, %s2969_s21  ;;  %p2976_p10 = scmp.lt.u32.totalorder %s2969_s21, %s4173_s3 }
  0x2d   : > { %p2972_p1 = pnand %p2970_p2, %p3252_p13 }
  0x2f   : > { %p2973_p6 = pneg %p2972_p1 }
  0x31   : > { %p2978_p3 = pnand %p2976_p10, %p2973_p6 }
  0x33   : > { %2981 = shalt.err (!%p2978_p3)
}
  0x34   : > { %s2982_s11 = scalar_lea.vmem %s3240_s14, 1024  ;;  %p2990_p12 = scmp.lt.s32.totalorder %s3240_s14, %s3240_s14 }
  0x35   : > { %p2983_p5 = scmp.ne.s32.totalorder %s3240_s14, %s2982_s11  ;;  %p2991_p0 = scmp.lt.s32.totalorder %s2982_s11, %s2982_s11 }
  0x37   : > { %p2985_p7 = pnand %p2983_p5, %p3252_p13  ;;  %p2992_p2 = por %p2991_p0, %p2990_p12 }
  0x39   : > { %p2986_p9 = pneg %p2985_p7 }
  0x3b   : > { %p2993_p1 = pnand %p2992_p2, %p2986_p9 }
  0x3d   : > { %2996 = shalt.err (!%p2993_p1)
}
  0x3e   : > { %2701 = dma.hbm_to_vmem [thread:$0]  (!%p3236_p11), %s4173_s3, 1024, %s3240_s14, [#allocation6], %s3134_s13, %s3134_s13, %s3135_s15  }
  0x3f   : > { %s2997_s20 = scalar_lea.hbm %s4175_s5, 2048 }
  0x40   : > { %p2998_p6 = scmp.ne.s32.totalorder %s4175_s5, %s2997_s20  ;;  %p3004_p5 = scmp.lt.u32.totalorder %s2997_s20, %s4175_s5 }
  0x42   : > { %p3000_p10 = pnand %p2998_p6, %p3252_p13 }
  0x44   : > { %p3001_p3 = pneg %p3000_p10 }
  0x46   : > { %p3006_p7 = pnand %p3004_p5, %p3001_p3 }
  0x48   : > { %3009 = shalt.err (!%p3006_p7)
}
  0x49   : > { %s3010_s11 = scalar_lea.vmem %s253_s16, 2048  ;;  %p3018_p2 = scmp.lt.s32.totalorder %s253_s16, %s253_s16 }
  0x4a   : > { %p3011_p9 = scmp.ne.s32.totalorder %s253_s16, %s3010_s11  ;;  %p3019_p1 = scmp.lt.s32.totalorder %s3010_s11, %s3010_s11 }
  0x4c   : > { %p3013_p12 = pnand %p3011_p9, %p3252_p13  ;;  %p3020_p4 = por %p3019_p1, %p3018_p2 }
  0x4e   : > { %p3014_p0 = pneg %p3013_p12 }
  0x50   : > { %p3021_p8 = pnand %p3020_p4, %p3014_p0 }
  0x52   : > { %3024 = shalt.err (!%p3021_p8)
}
  0x53   : > { %s3136_s14 = smov 128   ;;  %s3137_s22 = smov 8  }
  0x54   : > { %2704 = dma.hbm_to_vmem [thread:$0]  (!%p3236_p11), %s4175_s5, 2048, %s253_s16, [#allocation9], %s3136_s14, %s3136_s14, %s3137_s22  }
  0x55   : > { %s3316_s8 = sadd.s32 1, %s3129_s27   ;;  %s32_s18 = sadd.s32 1, %s3125_s26 }
  0x56   : > { %s29_s17 = ssub.s32 %s3129_s27, %s3316_s8  ;;  %p39_p8 = scmp.ne.s32.totalorder %s3125_s26, %s3121_s25 }
  0x57   : > { %p30_p4 = scmp.eq.s32.totalorder %s29_s17, 0  ;;  %p40_p13 = scmp.eq.s32.totalorder %s3129_s27, 0 }
  0x58   : > { %p2716_p6 = scmp.lt.s32.totalorder %s3129_s27, 2  ;;  %p4188_p3 = scmp.eq.s32.totalorder %s3206_s28, 1 }
  0x59   : > { %s3326_s19 = scalar_select %p30_p4, %s3125_s26, %s32_s18  }
  0x5a   : > { %p41_p10 = por %p40_p13, %p39_p8  ;;  %p3330_p5 = por %p4188_p3, %p39_p8 }
  0x5b   : > { %s269_s12 = sand.u32 1, %s3125_s26   ;;  %s2540_s21 = sshll.u32 %s3129_s27, 14 }
  0x5c   : > { %s2481_s16 = sshll.u32 %s269_s12, 10  ;;  %s3339_s10 = scalar_lea.hbm %s4170_s0, %s2540_s21 }
  0x5d   : > { %s273_s11 = scalar_lea.vmem [#allocation2], %s2481_s16  ;;  %p3341_p11 = pnand %p2716_p6, %p41_p10 }
  0x5e   : > { %s281_s14 = sshll.u32 %s273_s11, 4  ;;  %s3347_s13 = scalar_lea.sflag [#allocation3], %s269_s12  ;;  %s3345_s14 = int_to_ptr.vmem [resolvable:$true] %s281_s14 }
  0x5f   : > { %s3025_s15 = scalar_lea.hbm %s3339_s10, 16384  ;;  %p3027_p9 = pneg %p3341_p11 }
  0x60   : > { %p3026_p7 = scmp.ne.s32.totalorder %s3339_s10, %s3025_s15  ;;  %s3030_s21 = scalar_lea.hbm %s4170_s0, 32768 }
  0x61   : > { %p3031_p2 = scmp.lt.u32.totalorder %s3339_s10, %s4170_s0  ;;  %p3032_p1 = scmp.lt.u32.totalorder %s3030_s21, %s3025_s15 }
  0x62   : > { %p3028_p12 = pnand %p3027_p9, %p3026_p7  ;;  %p3034_p8 = scmp.lt.u32.totalorder %s3025_s15, %s3339_s10 }
  0x63   : > { %p3033_p4 = por %p3032_p1, %p3031_p2 }
  0x64   : > { %p3029_p0 = pneg %p3028_p12 }
  0x65   : > { %p3035_p13 = por %p3034_p8, %p3033_p4 }
  0x67   : > { %p3036_p6 = pnand %p3035_p13, %p3029_p0 }
  0x69   : > { %3039 = shalt.err (!%p3036_p6)
}
  0x6a   : > { %s3040_s12 = scalar_lea.vmem %s3345_s14, 16384  ;;  %s3138_s29 = smov [#allocation2]  }
  0x6b   : > { %p3041_p10 = scmp.ne.s32.totalorder %s3345_s14, %s3040_s12  ;;  %s3045_s11 = sshll.u32 %s3138_s29, 4  ;;  %s3046_s11 = int_to_ptr.vmem [resolvable:$false] %s3045_s11 }
  0x6c   : > { %s3047_s17 = scalar_lea.vmem %s3046_s11, 32768  ;;  %p3048_p12 = scmp.lt.s32.totalorder %s3345_s14, %s3046_s11 }
  0x6d   : > { %p3043_p3 = pnand %p3041_p10, %p3027_p9  ;;  %p3049_p2 = scmp.lt.s32.totalorder %s3047_s17, %s3040_s12 }
  0x6f   : > { %p3044_p7 = pneg %p3043_p3  ;;  %p3050_p1 = por %p3049_p2, %p3048_p12 }
  0x71   : > { %p3051_p4 = pnand %p3050_p1, %p3044_p7 }
  0x73   : > { %3054 = shalt.err (!%p3051_p4)
}
  0x74   : > { %s3139_s15 = smov 256   ;;  %s3140_s18 = smov 16  }
  0x75   : > { %2708 = dma.hbm_to_vmem [thread:$0]  (!%p3341_p11), %s3339_s10, 16384, %s3345_s14, %s3347_s13, %s3139_s15, %s3139_s15, %s3140_s18  }
  0x76   : > { %p4191_p9 = scmp.ne.s32.totalorder %s4185_s9, 0 }
  0x77   : > { %s3378_s21 = sand.u32 (!%p4191_p9), 1, %s3121_s25   ;;  %p4192_p0 = scmp.ne.s32.totalorder (!%p4191_p9), %s4182_s30, 0 }
  0x78   : > { %293 = sbr.rel (%p4191_p9) target bundleno = 1161 (0x489), region = 48  ;;  %s2486_s16 = sshll.u32 (!%p4191_p9), %s3378_s21, 10 }
  0x79   : > { %s296_s23 = scalar_lea.sflag (!%p4191_p9), [#allocation3], %s3378_s21  ;;  %s3384_s12 = scalar_lea.vmem (!%p4191_p9), [#allocation2], %s2486_s16 }
  0x7f   : > { %3100 = dma.done.wait (%p4192_p0), %s296_s23, 16384  }
  0x80   : > { %3102 = vsyncadd (%p4192_p0), %s296_s23, 4294950912  ;;  %p4193_p11 = scmp.eq.s32.totalorder %s3206_s28, 0 }
  0x82   : > { %3104 = dma.done.wait (%p4193_p11), [#allocation6], 3072   ;;  %p4194_p8 = pmov %p4193_p11 }
  0x84   : > { %3106 = vsyncadd (%p4194_p8), [#allocation6], 4294964224  ;;  %p4195_p13 = pmov %p4194_p8 }
  0x85   : > { %p4196_p6 = pmov %p4194_p8 }
  0x86   : > { %3108 = dma.done.wait (%p4195_p13), [#allocation9], 2048  }
  0x87   : > { %3110 = vsyncadd (%p4196_p6), [#allocation9], 4294965248  ;;  %v3141_v0 = vmov 0   ;;  %v2765_v1 = vld [vmem:[#allocation5] sm:$0xff]   ;;  %v2766_v2 = vld [vmem:[#allocation5 + $0x8] sm:$0xff]   ;;  %s3732_s29 = scalar_lea.vmem [#allocation10], %s2486_s16 }
  0x88   : > { %672 = vmatprep.subr.bf16.mxu0 %v3141_v0  ;;  %v2767_v3 = vld [vmem:[#allocation5 + $0x10] sm:$0xff]   ;;  %v2768_v4 = vld [vmem:[#allocation5 + $0x18] sm:$0xff]   ;;  %v2769_v5 = vld [vmem:[#allocation5 + $0x20] sm:$0xff]   ;;  %s2542_s11 = sshll.u32 %s3206_s28, 14  ;;  %s2373_s17 = sshll.u32 %s3732_s29, 4  ;;  %s4122_s17 = int_to_ptr.vmem [resolvable:$true] %s2373_s17 }
  0x89   : > { %673 = vmatpush1.bf16.msra.mxu0 %v2765_v1  ;;  %v346_v6 = vld [vmem:[%s3384_s12 + $0x8] sm:$0xff]  ;;  %v348_v7 = vld [vmem:[%s3384_s12 + $0x18] sm:$0xff]  ;;  %v2781_v10 = vld [vmem:[#allocation7] sm:$0xff]   ;;  %s4120_s16 = scalar_lea.hbm %s4177_s7, %s2542_s11  ;;  %s2359_s28 = scalar_lea.sflag [#allocation4], %s3378_s21 }
  0x8a   : > { %674 = vmatprep.subr.bf16.mxu0 %v3141_v0  ;;  %v474_v8 = vpack.c.bf16 %v348_v7, %v346_v6  ;;  %v2770_v9 = vld [vmem:[#allocation5 + $0x28] sm:$0xff]   ;;  %2663 = vmatprep.subr.bf16.mxu1 %v2781_v10  ;;  %v2771_v11 = vld [vmem:[#allocation5 + $0x30] sm:$0xff]   ;;  %v2772_v13 = vld [vmem:[#allocation5 + $0x38] sm:$0xff]   ;;  %s3055_s23 = scalar_lea.vmem %s4122_s17, 16384  ;;  %s3142_s30 = smov [#allocation10]  }
  0x8b   : > { %2671 = vmatpush3.bf16.msra.mxu1 %v2781_v10  ;;  %v2782_v12 = vld [vmem:[#allocation7 + $0x8] sm:$0xff]   ;;  %v2773_v14 = vld [vmem:[#allocation5 + $0x40] sm:$0xff]   ;;  %v2783_v15 = vld [vmem:[#allocation7 + $0x10] sm:$0xff]   ;;  %p3056_p10 = scmp.ne.s32.totalorder %s4122_s17, %s3055_s23  ;;  %s3059_s9 = sshll.u32 %s3142_s30, 4  ;;  %s3060_s9 = int_to_ptr.vmem [resolvable:$false] %s3059_s9 }
  0x8c   : > { %704 = vmatprep.mubr.bf16.mxu0 %v474_v8  ;;  %2664 = vmatprep.subr.bf16.mxu1 %v2782_v12  ;;  %v2774_v16 = vld [vmem:[#allocation5 + $0x48] sm:$0xff]   ;;  %v2784_v17 = vld [vmem:[#allocation7 + $0x18] sm:$0xff]   ;;  %v2775_v18 = vld [vmem:[#allocation5 + $0x50] sm:$0xff]   ;;  %s3061_s10 = scalar_lea.vmem %s3060_s9, 32768  ;;  %p3062_p12 = scmp.lt.s32.totalorder %s4122_s17, %s3060_s9 }
  0x8d   : > { %675 = vmatpush1.bf16.msra.mxu0 %v2766_v2  ;;  %v2776_v19 = vld [vmem:[#allocation5 + $0x58] sm:$0xff]   ;;  %v2777_v20 = vld [vmem:[#allocation5 + $0x60] sm:$0xff]   ;;  %v2778_v21 = vld [vmem:[#allocation5 + $0x68] sm:$0xff]   ;;  %p3057_p3 = pnand %p3056_p10, %p3330_p5  ;;  %p3063_p2 = scmp.lt.s32.totalorder %s3061_s10, %s3055_s23 }
  0x8e   : > { %676 = vmatprep.subr.bf16.mxu0 %v3141_v0  ;;  %v2779_v22 = vld [vmem:[#allocation5 + $0x70] sm:$0xff]   ;;  %v2780_v23 = vld [vmem:[#allocation5 + $0x78] sm:$0xff]   ;;  %v345_v24 = vld [vmem:[%s3384_s12] sm:$0xff] }
  0x8f   : > { %2672 = vmatpush3.bf16.msra.mxu1 %v2782_v12  ;;  %v347_v25 = vld [vmem:[%s3384_s12 + $0x10] sm:$0xff]  ;;  %v350_v26 = vld [vmem:[%s3384_s12 + $0x28] sm:$0xff]  ;;  %v352_v27 = vld [vmem:[%s3384_s12 + $0x38] sm:$0xff]  ;;  %p3058_p7 = pneg %p3057_p3  ;;  %p3064_p1 = por %p3063_p2, %p3062_p12 }
  0x90   : > { %2665 = vmatprep.subr.bf16.mxu1 %v2783_v15  ;;  %v473_v28 = vpack.c.bf16 %v347_v25, %v345_v24  ;;  %v476_v29 = vpack.c.bf16 %v352_v27, %v350_v26  ;;  %v2785_v30 = vld [vmem:[#allocation7 + $0x20] sm:$0xff]   ;;  %v351_v32 = vld [vmem:[%s3384_s12 + $0x30] sm:$0xff]  ;;  %v354_v33 = vld [vmem:[%s3384_s12 + $0x48] sm:$0xff] }
  0x91   : > { %677 = vmatpush1.bf16.msra.mxu0 %v2767_v3  ;;  %v349_v31 = vld [vmem:[%s3384_s12 + $0x20] sm:$0xff]  ;;  %v356_v34 = vld [vmem:[%s3384_s12 + $0x58] sm:$0xff]  ;;  %v355_v38 = vld [vmem:[%s3384_s12 + $0x50] sm:$0xff]  ;;  %p3065_p4 = pnand %p3064_p1, %p3058_p7 }
  0x92   : > { %678 = vmatprep.subr.bf16.mxu0 %v3141_v0  ;;  %v475_v35 = vpack.c.bf16 %v351_v32, %v349_v31  ;;  %v478_v36 = vpack.c.bf16 %v356_v34, %v354_v33  ;;  %v353_v37 = vld [vmem:[%s3384_s12 + $0x40] sm:$0xff]  ;;  %v358_v39 = vld [vmem:[%s3384_s12 + $0x68] sm:$0xff]  ;;  %v360_v40 = vld [vmem:[%s3384_s12 + $0x78] sm:$0xff] }
  0x93   : > { %2673 = vmatpush3.bf16.msra.mxu1 %v2783_v15  ;;  %v477_v41 = vpack.c.bf16 %v355_v38, %v353_v37  ;;  %v480_v42 = vpack.c.bf16 %v360_v40, %v358_v39  ;;  %v357_v43 = vld [vmem:[%s3384_s12 + $0x60] sm:$0xff]  ;;  %v359_v44 = vld [vmem:[%s3384_s12 + $0x70] sm:$0xff]  ;;  %v362_v45 = vld [vmem:[%s3384_s12 + $0x88] sm:$0xff] }
  0x94   : > { %2666 = vmatprep.subr.bf16.mxu1 %v2784_v17  ;;  %v364_v46 = vld [vmem:[%s3384_s12 + $0x98] sm:$0xff]  ;;  %v479_v47 = vpack.c.bf16 %v359_v44, %v357_v43  ;;  %v361_v49 = vld [vmem:[%s3384_s12 + $0x80] sm:$0xff]  ;;  %v363_v50 = vld [vmem:[%s3384_s12 + $0x90] sm:$0xff] }
  0x95   : > { %679 = vmatpush1.bf16.msra.mxu0 %v2768_v4  ;;  %v482_v48 = vpack.c.bf16 %v364_v46, %v362_v45  ;;  %v366_v51 = vld [vmem:[%s3384_s12 + $0xa8] sm:$0xff]  ;;  %v368_v52 = vld [vmem:[%s3384_s12 + $0xb8] sm:$0xff]  ;;  %v481_v53 = vpack.c.bf16 %v363_v50, %v361_v49  ;;  %v365_v56 = vld [vmem:[%s3384_s12 + $0xa0] sm:$0xff] }
  0x96   : > { %680 = vmatprep.subr.bf16.mxu0 %v3141_v0  ;;  %v484_v54 = vpack.c.bf16 %v368_v52, %v366_v51  ;;  %v2786_v55 = vld [vmem:[#allocation7 + $0x28] sm:$0xff]   ;;  %v367_v57 = vld [vmem:[%s3384_s12 + $0xb0] sm:$0xff]  ;;  %v372_v59 = vld [vmem:[%s3384_s12 + $0xd8] sm:$0xff] }
  0x97   : > { %2674 = vmatpush3.bf16.msra.mxu1 %v2784_v17  ;;  %v370_v58 = vld [vmem:[%s3384_s12 + $0xc8] sm:$0xff]  ;;  %v483_v60 = vpack.c.bf16 %v367_v57, %v365_v56  ;;  %v369_v62 = vld [vmem:[%s3384_s12 + $0xc0] sm:$0xff]  ;;  %v371_v63 = vld [vmem:[%s3384_s12 + $0xd0] sm:$0xff] }
  0x98   : > { %2667 = vmatprep.subr.bf16.mxu1 %v2785_v30  ;;  %v486_v61 = vpack.c.bf16 %v372_v59, %v370_v58  ;;  %v374_v1 = vld [vmem:[%s3384_s12 + $0xe8] sm:$0xff]  ;;  %v376_v2 = vld [vmem:[%s3384_s12 + $0xf8] sm:$0xff]  ;;  %v485_v3 = vpack.c.bf16 %v371_v63, %v369_v62  ;;  %v375_v6 = vld [vmem:[%s3384_s12 + $0xf0] sm:$0xff] }
  0x99   : > { %681 = vmatpush1.bf16.msra.mxu0 %v2769_v5  ;;  %v488_v4 = vpack.c.bf16 %v376_v2, %v374_v1  ;;  %v373_v5 = vld [vmem:[%s3384_s12 + $0xe0] sm:$0xff]  ;;  %v378_v7 = vld [vmem:[%s3384_s12 + $0x108] sm:$0xff]  ;;  %v380_v8 = vld [vmem:[%s3384_s12 + $0x118] sm:$0xff] }
  0x9a   : > { %682 = vmatprep.subr.bf16.mxu0 %v3141_v0  ;;  %v385_v24 = vld [vmem:[%s3384_s12 + $0x140] sm:$0xff]  ;;  %v387_v25 = vld [vmem:[%s3384_s12 + $0x150] sm:$0xff]  ;;  %v390_v26 = vld [vmem:[%s3384_s12 + $0x168] sm:$0xff] }
  0x9b   : > { %2675 = vmatpush3.bf16.msra.mxu1 %v2785_v30  ;;  %v392_v27 = vld [vmem:[%s3384_s12 + $0x178] sm:$0xff]  ;;  %v391_v31 = vld [vmem:[%s3384_s12 + $0x170] sm:$0xff]  ;;  %v394_v32 = vld [vmem:[%s3384_s12 + $0x188] sm:$0xff] }
  0x9c   : > { %2668 = vmatprep.subr.bf16.mxu1 %v2786_v55  ;;  %v396_v33 = vld [vmem:[%s3384_s12 + $0x198] sm:$0xff]  ;;  %v395_v37 = vld [vmem:[%s3384_s12 + $0x190] sm:$0xff]  ;;  %v398_v38 = vld [vmem:[%s3384_s12 + $0x1a8] sm:$0xff] }
  0x9d   : > { %683 = vmatpush1.bf16.msra.mxu0 %v2770_v9  ;;  %v487_v9 = vpack.c.bf16 %v375_v6, %v373_v5  ;;  %v400_v39 = vld [vmem:[%s3384_s12 + $0x1b8] sm:$0xff]  ;;  %v399_v43 = vld [vmem:[%s3384_s12 + $0x1b0] sm:$0xff]  ;;  %v402_v44 = vld [vmem:[%s3384_s12 + $0x1c8] sm:$0xff] }
  0x9e   : > { %684 = vmatprep.subr.bf16.mxu0 %v3141_v0  ;;  %v404_v45 = vld [vmem:[%s3384_s12 + $0x1d8] sm:$0xff]  ;;  %v401_v49 = vld [vmem:[%s3384_s12 + $0x1c0] sm:$0xff]  ;;  %v403_v50 = vld [vmem:[%s3384_s12 + $0x1d0] sm:$0xff] }
  0x9f   : > { %2676 = vmatpush3.bf16.msra.mxu1 %v2786_v55  ;;  %v2788_v46 = vld [vmem:[#allocation7 + $0x38] sm:$0xff]   ;;  %v406_v51 = vld [vmem:[%s3384_s12 + $0x1e8] sm:$0xff]  ;;  %v407_v56 = vld [vmem:[%s3384_s12 + $0x1f0] sm:$0xff] }
  0xa0   : > { %v408_v52 = vld [vmem:[%s3384_s12 + $0x1f8] sm:$0xff]  ;;  %v410_v57 = vld [vmem:[%s3384_s12 + $0x208] sm:$0xff]  ;;  %v411_v62 = vld [vmem:[%s3384_s12 + $0x210] sm:$0xff] }
  0xa1   : > { %685 = vmatpush1.bf16.msra.mxu0 %v2771_v11  ;;  %v377_v11 = vld [vmem:[%s3384_s12 + $0x100] sm:$0xff]  ;;  %v412_v58 = vld [vmem:[%s3384_s12 + $0x218] sm:$0xff]  ;;  %v414_v63 = vld [vmem:[%s3384_s12 + $0x228] sm:$0xff] }
  0xa2   : > { %686 = vmatprep.subr.bf16.mxu0 %v3141_v0  ;;  %v416_v1 = vld [vmem:[%s3384_s12 + $0x238] sm:$0xff]  ;;  %v415_v5 = vld [vmem:[%s3384_s12 + $0x230] sm:$0xff]  ;;  %v418_v6 = vld [vmem:[%s3384_s12 + $0x248] sm:$0xff] }
  0xa5   : > { %687 = vmatpush1.bf16.msra.mxu0 %v2772_v13  ;;  %v382_v13 = vld [vmem:[%s3384_s12 + $0x128] sm:$0xff] }
  0xa6   : > { %688 = vmatprep.subr.bf16.mxu0 %v3141_v0 }
  0xa9   : > { %689 = vmatpush1.bf16.msra.mxu0 %v2773_v14  ;;  %v384_v14 = vld [vmem:[%s3384_s12 + $0x138] sm:$0xff] }
  0xaa   : > { %690 = vmatprep.subr.bf16.mxu0 %v3141_v0 }
  0xad   : > { %691 = vmatpush1.bf16.msra.mxu0 %v2774_v16  ;;  %v492_v16 = vpack.c.bf16 %v384_v14, %v382_v13  ;;  %v424_v13 = vld [vmem:[%s3384_s12 + $0x278] sm:$0xff] }
  0xae   : > { %692 = vmatprep.subr.bf16.mxu0 %v3141_v0 }
  0xb1   : > { %693 = vmatpush1.bf16.msra.mxu0 %v2775_v18  ;;  %v381_v18 = vld [vmem:[%s3384_s12 + $0x120] sm:$0xff] }
  0xb2   : > { %694 = vmatprep.subr.bf16.mxu0 %v3141_v0 }
  0xb5   : > { %695 = vmatpush1.bf16.msra.mxu0 %v2776_v19  ;;  %v383_v19 = vld [vmem:[%s3384_s12 + $0x130] sm:$0xff] }
  0xb6   : > { %696 = vmatprep.subr.bf16.mxu0 %v3141_v0 }
  0xb9   : > { %697 = vmatpush1.bf16.msra.mxu0 %v2777_v20  ;;  %v386_v20 = vld [vmem:[%s3384_s12 + $0x148] sm:$0xff] }
  0xba   : > { %698 = vmatprep.subr.bf16.mxu0 %v3141_v0 }
  0xbd   : > { %699 = vmatpush1.bf16.msra.mxu0 %v2778_v21  ;;  %v388_v21 = vld [vmem:[%s3384_s12 + $0x158] sm:$0xff] }
  0xbe   : > { %700 = vmatprep.subr.bf16.mxu0 %v3141_v0 }
  0xc1   : > { %701 = vmatpush1.bf16.msra.mxu0 %v2779_v22  ;;  %v491_v22 = vpack.c.bf16 %v383_v19, %v381_v18  ;;  %v426_v18 = vld [vmem:[%s3384_s12 + $0x288] sm:$0xff]  ;;  %v428_v19 = vld [vmem:[%s3384_s12 + $0x298] sm:$0xff] }
  0xc2   : > { %702 = vmatprep.subr.bf16.mxu0 %v3141_v0 }
  0xc5   : > { %703 = vmatpush1.bf16.msra.mxu0 %v2780_v23  ;;  %v494_v23 = vpack.c.bf16 %v388_v21, %v386_v20  ;;  %v514_v21 = vpack.c.bf16 %v428_v19, %v426_v18  ;;  %v462_v19 = vld [vmem:[%s3384_s12 + $0x3a8] sm:$0xff] }
  0xc6   : > { %2583 = vmatprep.subr.bf16.mxu0 %v2781_v10 }
  0xc8   : > { %705 = vmatmul.mubr.bf16.vlgmr.msra.gmra.mrb[0].mxu0 %v473_v28  ;;  %v493_v28 = vpack.c.bf16 %v387_v25, %v385_v24  ;;  %v430_v24 = vld [vmem:[%s3384_s12 + $0x2a8] sm:$0xff]  ;;  %v432_v25 = vld [vmem:[%s3384_s12 + $0x2b8] sm:$0xff] }
  0xc9   : > { %2584 = vmatpush3.bf16.msra.mxu0 %v2781_v10  ;;  %712 = vmatprep.mubr.bf16.mxu0 %v476_v29  ;;  %v490_v10 = vpack.c.bf16 %v380_v8, %v378_v7  ;;  %v496_v29 = vpack.c.bf16 %v392_v27, %v390_v26  ;;  %v420_v7 = vld [vmem:[%s3384_s12 + $0x258] sm:$0xff]  ;;  %v516_v27 = vpack.c.bf16 %v432_v25, %v430_v24 }
  0xca   : > { %2585 = vmatprep.subr.bf16.mxu0 %v2782_v12 }
  0xcd   : > { %2586 = vmatpush3.bf16.msra.mxu0 %v2782_v12  ;;  %v379_v12 = vld [vmem:[%s3384_s12 + $0x110] sm:$0xff] }
  0xce   : > { %2587 = vmatprep.subr.bf16.mxu0 %v2783_v15 }
  0xd0   : > { %713 = vmatmul.mubr.bf16.gmra.mrb[4].mxu0 %v475_v35  ;;  %v498_v35 = vpack.c.bf16 %v396_v33, %v394_v32 }
  0xd1   : > { %720 = vmatprep.mubr.bf16.mxu0 %v478_v36  ;;  %2588 = vmatpush3.bf16.msra.mxu0 %v2783_v15  ;;  %v489_v15 = vpack.c.bf16 %v379_v12, %v377_v11  ;;  %v393_v36 = vld [vmem:[%s3384_s12 + $0x180] sm:$0xff]  ;;  %v419_v11 = vld [vmem:[%s3384_s12 + $0x250] sm:$0xff]  ;;  %v422_v12 = vld [vmem:[%s3384_s12 + $0x268] sm:$0xff] }
  0xd2   : > { %2589 = vmatprep.subr.bf16.mxu0 %v2784_v17  ;;  %v497_v40 = vpack.c.bf16 %v395_v37, %v393_v36  ;;  %v438_v36 = vld [vmem:[%s3384_s12 + $0x2e8] sm:$0xff]  ;;  %v440_v37 = vld [vmem:[%s3384_s12 + $0x2f8] sm:$0xff] }
  0xd5   : > { %2590 = vmatpush3.bf16.msra.mxu0 %v2784_v17  ;;  %v2787_v17 = vld [vmem:[#allocation7 + $0x30] sm:$0xff]  }
  0xd6   : > { %2591 = vmatprep.subr.bf16.mxu0 %v2785_v30  ;;  %2669 = vmatprep.subr.bf16.mxu1 %v2787_v17 }
  0xd7   : > { %2677 = vmatpush3.bf16.msra.mxu1 %v2787_v17 }
  0xd8   : > { %721 = vmatmul.mubr.bf16.gmra.mrb[8].mxu0 %v477_v41  ;;  %v500_v41 = vpack.c.bf16 %v400_v39, %v398_v38  ;;  %2670 = vmatprep.subr.bf16.mxu1 %v2788_v46  ;;  %v520_v39 = vpack.c.bf16 %v440_v37, %v438_v36 }
  0xd9   : > { %728 = vmatprep.mubr.bf16.mxu0 %v480_v42  ;;  %2592 = vmatpush3.bf16.msra.mxu0 %v2785_v30  ;;  %v389_v30 = vld [vmem:[%s3384_s12 + $0x160] sm:$0xff] }
  0xda   : > { %2593 = vmatprep.subr.bf16.mxu0 %v2786_v55  ;;  %v495_v34 = vpack.c.bf16 %v391_v31, %v389_v30  ;;  %v397_v42 = vld [vmem:[%s3384_s12 + $0x1a0] sm:$0xff]  ;;  %v434_v30 = vld [vmem:[%s3384_s12 + $0x2c8] sm:$0xff]  ;;  %v436_v31 = vld [vmem:[%s3384_s12 + $0x2d8] sm:$0xff] }
  0xdb   : > { %2678 = vmatpush3.bf16.msra.mxu1 %v2788_v46  ;;  %v518_v33 = vpack.c.bf16 %v436_v31, %v434_v30  ;;  %v461_v31 = vld [vmem:[%s3384_s12 + $0x3a0] sm:$0xff] }
  0xdd   : > { %2594 = vmatpush3.bf16.msra.mxu0 %v2786_v55  ;;  %v405_v55 = vld [vmem:[%s3384_s12 + $0x1e0] sm:$0xff] }
  0xde   : > { %2595 = vmatprep.subr.bf16.mxu0 %v2787_v17  ;;  %v503_v59 = vpack.c.bf16 %v407_v56, %v405_v55  ;;  %v452_v55 = vld [vmem:[%s3384_s12 + $0x358] sm:$0xff] }
  0xe0   : > { %729 = vmatmul.mubr.bf16.gmra.mrb[12].mxu0 %v479_v47  ;;  %v499_v47 = vpack.c.bf16 %v399_v43, %v397_v42  ;;  %v442_v42 = vld [vmem:[%s3384_s12 + $0x308] sm:$0xff]  ;;  %v444_v43 = vld [vmem:[%s3384_s12 + $0x318] sm:$0xff] }
  0xe1   : > { %736 = vmatprep.mubr.bf16.mxu0 %v482_v48  ;;  %2596 = vmatpush3.bf16.msra.mxu0 %v2787_v17  ;;  %v502_v48 = vpack.c.bf16 %v404_v45, %v402_v44  ;;  %v423_v17 = vld [vmem:[%s3384_s12 + $0x270] sm:$0xff]  ;;  %v522_v45 = vpack.c.bf16 %v444_v43, %v442_v42 }
  0xe2   : > { %2597 = vmatprep.subr.bf16.mxu0 %v2788_v46 }
  0xe5   : > { %2598 = vmatpush3.bf16.msra.mxu0 %v2788_v46  ;;  %v441_v46 = vld [vmem:[%s3384_s12 + $0x300] sm:$0xff] }
  0xe8   : > { %737 = vmatmul.mubr.bf16.gmra.mrb[16].mxu0 %v481_v53  ;;  %v501_v53 = vpack.c.bf16 %v403_v50, %v401_v49  ;;  %v448_v49 = vld [vmem:[%s3384_s12 + $0x338] sm:$0xff] }
  0xe9   : > { %744 = vmatprep.mubr.bf16.mxu0 %v484_v54  ;;  %v504_v54 = vpack.c.bf16 %v408_v52, %v406_v51  ;;  %v445_v52 = vld [vmem:[%s3384_s12 + $0x320] sm:$0xff] }
  0xf0   : > { %745 = vmatmul.mubr.bf16.gmra.mrb[20].mxu0 %v483_v60  ;;  %v506_v60 = vpack.c.bf16 %v412_v58, %v410_v57  ;;  %v449_v58 = vld [vmem:[%s3384_s12 + $0x340] sm:$0xff] }
  0xf1   : > { %752 = vmatprep.mubr.bf16.mxu0 %v486_v61  ;;  %v409_v61 = vld [vmem:[%s3384_s12 + $0x200] sm:$0xff] }
  0xf2   : > { %v505_v2 = vpack.c.bf16 %v411_v62, %v409_v61  ;;  %v456_v61 = vld [vmem:[%s3384_s12 + $0x378] sm:$0xff] }
  0xf8   : > { %753 = vmatmul.mubr.bf16.gmra.mrb[24].mxu0 %v485_v3  ;;  %v508_v3 = vpack.c.bf16 %v416_v1, %v414_v63  ;;  %v3527_v1 = vld [vmem:[%s4172_s2] ss:$0 sm:$0xff] }
  0xf9   : > { %760 = vmatprep.mubr.bf16.mxu0 %v488_v4  ;;  %v413_v4 = vld [vmem:[%s3384_s12 + $0x220] sm:$0xff] }
  0xfa   : > { %v507_v8 = vpack.c.bf16 %v415_v5, %v413_v4  ;;  %v458_v4 = vld [vmem:[%s3384_s12 + $0x388] sm:$0xff]  ;;  %v460_v5 = vld [vmem:[%s3384_s12 + $0x398] sm:$0xff] }
 0x100   : > { %761 = vmatmul.mubr.bf16.gmra.mrb[28].mxu0 %v487_v9  ;;  %v510_v9 = vpack.c.bf16 %v420_v7, %v418_v6 }
 0x101   : > { %768 = vmatprep.mubr.bf16.mxu0 %v490_v10  ;;  %v417_v10 = vld [vmem:[%s3384_s12 + $0x240] sm:$0xff] }
 0x102   : > { %v509_v14 = vpack.c.bf16 %v419_v11, %v417_v10  ;;  %v530_v11 = vpack.c.bf16 %v460_v5, %v458_v4 }
 0x108   : > { %769 = vmatmul.mubr.bf16.gmra.mrb[32].mxu0 %v489_v15  ;;  %v512_v15 = vpack.c.bf16 %v424_v13, %v422_v12 }
 0x109   : > { %776 = vmatprep.mubr.bf16.mxu0 %v492_v16  ;;  %v421_v16 = vld [vmem:[%s3384_s12 + $0x260] sm:$0xff] }
 0x10a   : > { %v511_v20 = vpack.c.bf16 %v423_v17, %v421_v16  ;;  %v457_v16 = vld [vmem:[%s3384_s12 + $0x380] sm:$0xff]  ;;  %v459_v17 = vld [vmem:[%s3384_s12 + $0x390] sm:$0xff] }
 0x10b   : > { %v529_v24 = vpack.c.bf16 %v459_v17, %v457_v16 }
 0x110   : > { %777 = vmatmul.mubr.bf16.gmra.mrb[36].mxu0 %v491_v22  ;;  %v425_v22 = vld [vmem:[%s3384_s12 + $0x280] sm:$0xff] }
 0x111   : > { %784 = vmatprep.mubr.bf16.mxu0 %v494_v23  ;;  %v427_v23 = vld [vmem:[%s3384_s12 + $0x290] sm:$0xff] }
 0x112   : > { %v513_v26 = vpack.c.bf16 %v427_v23, %v425_v22 }
 0x118   : > { %785 = vmatmul.mubr.bf16.gmra.mrb[40].mxu0 %v493_v28  ;;  %v429_v28 = vld [vmem:[%s3384_s12 + $0x2a0] sm:$0xff] }
 0x119   : > { %792 = vmatprep.mubr.bf16.mxu0 %v496_v29  ;;  %v431_v29 = vld [vmem:[%s3384_s12 + $0x2b0] sm:$0xff] }
 0x11a   : > { %v515_v32 = vpack.c.bf16 %v431_v29, %v429_v28 }
 0x120   : > { %793 = vmatmul.mubr.bf16.gmra.mrb[44].mxu0 %v495_v34  ;;  %v433_v34 = vld [vmem:[%s3384_s12 + $0x2c0] sm:$0xff] }
 0x121   : > { %800 = vmatprep.mubr.bf16.mxu0 %v498_v35  ;;  %v435_v35 = vld [vmem:[%s3384_s12 + $0x2d0] sm:$0xff] }
 0x122   : > { %v517_v38 = vpack.c.bf16 %v435_v35, %v433_v34  ;;  %v466_v34 = vld [vmem:[%s3384_s12 + $0x3c8] sm:$0xff]  ;;  %v468_v35 = vld [vmem:[%s3384_s12 + $0x3d8] sm:$0xff] }
 0x128   : > { %801 = vmatmul.mubr.bf16.gmra.mrb[48].mxu0 %v497_v40  ;;  %v437_v40 = vld [vmem:[%s3384_s12 + $0x2e0] sm:$0xff] }
 0x129   : > { %808 = vmatprep.mubr.bf16.mxu0 %v500_v41  ;;  %v439_v41 = vld [vmem:[%s3384_s12 + $0x2f0] sm:$0xff] }
 0x12a   : > { %v519_v44 = vpack.c.bf16 %v439_v41, %v437_v40  ;;  %v534_v41 = vpack.c.bf16 %v468_v35, %v466_v34 }
 0x130   : > { %809 = vmatmul.mubr.bf16.gmra.mrb[52].mxu0 %v499_v47  ;;  %v443_v47 = vld [vmem:[%s3384_s12 + $0x310] sm:$0xff] }
 0x131   : > { %816 = vmatprep.mubr.bf16.mxu0 %v502_v48  ;;  %v446_v48 = vld [vmem:[%s3384_s12 + $0x328] sm:$0xff]  ;;  %v521_v50 = vpack.c.bf16 %v443_v47, %v441_v46  ;;  %v465_v46 = vld [vmem:[%s3384_s12 + $0x3c0] sm:$0xff]  ;;  %v467_v47 = vld [vmem:[%s3384_s12 + $0x3d0] sm:$0xff] }
 0x132   : > { %v524_v51 = vpack.c.bf16 %v448_v49, %v446_v48  ;;  %v470_v49 = vld [vmem:[%s3384_s12 + $0x3e8] sm:$0xff] }
 0x138   : > { %817 = vmatmul.mubr.bf16.gmra.mrb[56].mxu0 %v501_v53  ;;  %v447_v53 = vld [vmem:[%s3384_s12 + $0x330] sm:$0xff] }
 0x139   : > { %824 = vmatprep.mubr.bf16.mxu0 %v504_v54  ;;  %v450_v54 = vld [vmem:[%s3384_s12 + $0x348] sm:$0xff]  ;;  %v523_v56 = vpack.c.bf16 %v447_v53, %v445_v52 }
 0x13a   : > { %v526_v57 = vpack.c.bf16 %v452_v55, %v450_v54  ;;  %v533_v54 = vpack.c.bf16 %v467_v47, %v465_v46 }
 0x140   : > { %825 = vmatmul.mubr.bf16.gmra.mrb[60].mxu0 %v503_v59  ;;  %v451_v59 = vld [vmem:[%s3384_s12 + $0x350] sm:$0xff] }
 0x141   : > { %832 = vmatprep.mubr.bf16.mxu0 %v506_v60  ;;  %v454_v60 = vld [vmem:[%s3384_s12 + $0x368] sm:$0xff]  ;;  %v525_v62 = vpack.c.bf16 %v451_v59, %v449_v58 }
 0x142   : > { %v528_v63 = vpack.c.bf16 %v456_v61, %v454_v60  ;;  %v469_v61 = vld [vmem:[%s3384_s12 + $0x3e0] sm:$0xff] }
 0x148   : > { %833 = vmatmul.mubr.bf16.gmra.mrb[64].mxu0 %v505_v2  ;;  %v453_v2 = vld [vmem:[%s3384_s12 + $0x360] sm:$0xff] }
 0x149   : > { %840 = vmatprep.mubr.bf16.mxu0 %v508_v3  ;;  %v455_v3 = vld [vmem:[%s3384_s12 + $0x370] sm:$0xff] }
 0x150   : > { %841 = vmatmul.mubr.bf16.gmra.mrb[68].mxu0 %v507_v8 }
 0x151   : > { %848 = vmatprep.mubr.bf16.mxu0 %v510_v9  ;;  %v527_v9 = vpack.c.bf16 %v455_v3, %v453_v2 }
 0x158   : > { %849 = vmatmul.mubr.bf16.gmra.mrb[72].mxu0 %v509_v14 }
 0x159   : > { %856 = vmatprep.mubr.bf16.mxu0 %v512_v15 }
 0x160   : > { %857 = vmatmul.mubr.bf16.gmra.mrb[76].mxu0 %v511_v20  ;;  %v464_v20 = vld [vmem:[%s3384_s12 + $0x3b8] sm:$0xff] }
 0x161   : > { %864 = vmatprep.mubr.bf16.mxu0 %v514_v21 }
 0x168   : > { %865 = vmatmul.mubr.bf16.gmra.mrb[80].mxu0 %v513_v26  ;;  %v532_v26 = vpack.c.bf16 %v464_v20, %v462_v19 }
 0x169   : > { %872 = vmatprep.mubr.bf16.mxu0 %v516_v27 }
 0x170   : > { %873 = vmatmul.mubr.bf16.gmra.mrb[84].mxu0 %v515_v32  ;;  %v463_v32 = vld [vmem:[%s3384_s12 + $0x3b0] sm:$0xff] }
 0x171   : > { %880 = vmatprep.mubr.bf16.mxu0 %v518_v33 }
 0x178   : > { %881 = vmatmul.mubr.bf16.gmra.mrb[88].mxu0 %v517_v38 }
 0x179   : > { %888 = vmatprep.mubr.bf16.mxu0 %v520_v39  ;;  %v531_v39 = vpack.c.bf16 %v463_v32, %v461_v31 }
 0x180   : > { %889 = vmatmul.mubr.bf16.gmra.mrb[92].mxu0 %v519_v44 }
 0x181   : > { %896 = vmatprep.mubr.bf16.mxu0 %v522_v45 }
 0x188   : > { %897 = vmatmul.mubr.bf16.gmra.mrb[96].mxu0 %v521_v50  ;;  %v472_v50 = vld [vmem:[%s3384_s12 + $0x3f8] sm:$0xff] }
 0x189   : > { %904 = vmatprep.mubr.bf16.mxu0 %v524_v51 }
 0x190   : > { %905 = vmatmul.mubr.bf16.gmra.mrb[100].mxu0 %v523_v56  ;;  %v536_v56 = vpack.c.bf16 %v472_v50, %v470_v49 }
 0x191   : > { %912 = vmatprep.mubr.bf16.mxu0 %v526_v57 }
 0x198   : > { %913 = vmatmul.mubr.bf16.gmra.mrb[104].mxu0 %v525_v62  ;;  %v471_v62 = vld [vmem:[%s3384_s12 + $0x3f0] sm:$0xff] }
 0x199   : > { %920 = vmatprep.mubr.bf16.mxu0 %v528_v63  ;;  %v535_v5 = vpack.c.bf16 %v471_v62, %v469_v61 }
 0x19b   : > { %v706_v6 = vpop.f32.mrb[0].mxu0 }
 0x19c   : > { %v707_v7 = vadd.f32 %v3527_v1, %v706_v6  ;;  %v708_v8 = vpop.f32.mrb[1].mxu0 }
 0x19d   : > { %v709_v10 = vpop.f32.mrb[2].mxu0 }
 0x19e   : > { %v710_v12 = vadd.f32 %v3527_v1, %v709_v10  ;;  %v711_v13 = vpop.f32.mrb[3].mxu0  ;;  %v961_v14 = vmax.f32 %v707_v7, 0.0 }
 0x1a0   : > { %v962_v15 = vmax.f32 %v710_v12, 0.0  ;;  %921 = vmatmul.mubr.bf16.gmra.mrb[108].mxu0 %v527_v9 }
 0x1a1   : > { %928 = vmatprep.mubr.bf16.mxu0 %v530_v11 }
 0x1a2   : > { %v1025_v18 = vpack.c.bf16 %v962_v15, %v961_v14 }
 0x1a3   : > { %v714_v21 = vpop.f32.mrb[4].mxu0 }
 0x1a4   : > { %v715_v22 = vadd.f32 %v3527_v1, %v714_v21  ;;  %v716_v23 = vpop.f32.mrb[5].mxu0 }
 0x1a5   : > { %v717_v25 = vpop.f32.mrb[6].mxu0 }
 0x1a6   : > { %v718_v27 = vadd.f32 %v3527_v1, %v717_v25  ;;  %v719_v28 = vpop.f32.mrb[7].mxu0  ;;  %v963_v29 = vmax.f32 %v715_v22, 0.0 }
 0x1a8   : > { %v964_v30 = vmax.f32 %v718_v27, 0.0  ;;  %929 = vmatmul.mubr.bf16.gmra.mrb[112].mxu0 %v529_v24 }
 0x1a9   : > { %936 = vmatprep.mubr.bf16.mxu0 %v532_v26 }
 0x1aa   : > { %v1026_v33 = vpack.c.bf16 %v964_v30, %v963_v29 }
 0x1ab   : > { %v722_v36 = vpop.f32.mrb[8].mxu0 }
 0x1ac   : > { %v723_v37 = vadd.f32 %v3527_v1, %v722_v36  ;;  %v724_v38 = vpop.f32.mrb[9].mxu0 }
 0x1ad   : > { %v725_v40 = vpop.f32.mrb[10].mxu0 }
 0x1ae   : > { %v726_v42 = vadd.f32 %v3527_v1, %v725_v40  ;;  %v727_v43 = vpop.f32.mrb[11].mxu0  ;;  %v965_v44 = vmax.f32 %v723_v37, 0.0 }
 0x1b0   : > { %v966_v45 = vmax.f32 %v726_v42, 0.0  ;;  %937 = vmatmul.mubr.bf16.gmra.mrb[116].mxu0 %v531_v39  ;;  %v2791_v39 = vld [vmem:[#allocation8 + $0x4] ss:$8 sps:$4 sm:$0xff]  }
 0x1b1   : > { %944 = vmatprep.mubr.bf16.mxu0 %v534_v41  ;;  %1621 = vmatprep.subr.bf16.mxu1 %v2791_v39 }
 0x1b2   : > { %v1027_v48 = vpack.c.bf16 %v966_v45, %v965_v44 }
 0x1b3   : > { %v730_v51 = vpop.f32.mrb[12].mxu0 }
 0x1b4   : > { %v731_v52 = vadd.f32 %v3527_v1, %v730_v51  ;;  %v732_v53 = vpop.f32.mrb[13].mxu0 }
 0x1b5   : > { %v733_v55 = vpop.f32.mrb[14].mxu0 }
 0x1b6   : > { %v734_v57 = vadd.f32 %v3527_v1, %v733_v55  ;;  %v735_v58 = vpop.f32.mrb[15].mxu0  ;;  %v967_v59 = vmax.f32 %v731_v52, 0.0 }
 0x1b8   : > { %v968_v60 = vmax.f32 %v734_v57, 0.0  ;;  %945 = vmatmul.mubr.bf16.gmra.mrb[120].mxu0 %v533_v54 }
 0x1b9   : > { %952 = vmatprep.mubr.bf16.mxu0 %v536_v56 }
 0x1ba   : > { %v1028_v63 = vpack.c.bf16 %v968_v60, %v967_v59 }
 0x1bb   : > { %v738_v2 = vpop.f32.mrb[16].mxu0 }
 0x1bc   : > { %v739_v3 = vadd.f32 %v3527_v1, %v738_v2  ;;  %v740_v4 = vpop.f32.mrb[17].mxu0 }
 0x1bd   : > { %v741_v6 = vpop.f32.mrb[18].mxu0 }
 0x1be   : > { %v742_v7 = vadd.f32 %v3527_v1, %v741_v6  ;;  %v743_v8 = vpop.f32.mrb[19].mxu0  ;;  %v969_v9 = vmax.f32 %v739_v3, 0.0 }
 0x1c0   : > { %v970_v10 = vmax.f32 %v742_v7, 0.0  ;;  %953 = vmatmul.mubr.bf16.gmra.mrb[124].mxu0 %v535_v5 }
 0x1c1   : > { %2599 = vmatprep.mubr.bf16.mxu0 %v1025_v18 }
 0x1c2   : > { %v1029_v11 = vpack.c.bf16 %v970_v10, %v969_v9 }
 0x1c3   : > { %v746_v12 = vpop.f32.mrb[20].mxu0 }
 0x1c4   : > { %v747_v13 = vadd.f32 %v3527_v1, %v746_v12  ;;  %v748_v14 = vpop.f32.mrb[21].mxu0 }
 0x1c5   : > { %v749_v15 = vpop.f32.mrb[22].mxu0 }
 0x1c6   : > { %v750_v16 = vadd.f32 %v3527_v1, %v749_v15  ;;  %v751_v17 = vpop.f32.mrb[23].mxu0  ;;  %v971_v19 = vmax.f32 %v747_v13, 0.0 }
 0x1c8   : > { %v972_v20 = vmax.f32 %v750_v16, 0.0  ;;  %2600 = vmatmul.mubr.bf16.vlgmr.msra.gmra.mrb[128].mxu0 %v1026_v33 }
 0x1c9   : > { %2603 = vmatprep.mubr.bf16.mxu0 %v1027_v48 }
 0x1ca   : > { %v1030_v21 = vpack.c.bf16 %v972_v20, %v971_v19 }
 0x1cb   : > { %v754_v22 = vpop.f32.mrb[24].mxu0 }
 0x1cc   : > { %v755_v23 = vadd.f32 %v3527_v1, %v754_v22  ;;  %v756_v24 = vpop.f32.mrb[25].mxu0 }
 0x1cd   : > { %v757_v25 = vpop.f32.mrb[26].mxu0 }
 0x1ce   : > { %v758_v18 = vadd.f32 %v3527_v1, %v757_v25  ;;  %v759_v26 = vpop.f32.mrb[27].mxu0  ;;  %v973_v27 = vmax.f32 %v755_v23, 0.0 }
 0x1d0   : > { %v974_v28 = vmax.f32 %v758_v18, 0.0  ;;  %2604 = vmatmul.mubr.bf16.gmra.mrb[132].mxu0 %v1028_v63 }
 0x1d1   : > { %2607 = vmatprep.mubr.bf16.mxu0 %v1029_v11 }
 0x1d2   : > { %v1031_v29 = vpack.c.bf16 %v974_v28, %v973_v27 }
 0x1d3   : > { %v762_v30 = vpop.f32.mrb[28].mxu0 }
 0x1d4   : > { %v763_v31 = vadd.f32 %v3527_v1, %v762_v30  ;;  %v764_v32 = vpop.f32.mrb[29].mxu0 }
 0x1d5   : > { %v765_v33 = vpop.f32.mrb[30].mxu0 }
 0x1d6   : > { %v766_v34 = vadd.f32 %v3527_v1, %v765_v33  ;;  %v767_v35 = vpop.f32.mrb[31].mxu0  ;;  %v975_v36 = vmax.f32 %v763_v31, 0.0  ;;  %v2789_v31 = vld [vmem:[#allocation8] ss:$8 sps:$4 sm:$0xff]   ;;  %v2794_v33 = vld [vmem:[#allocation8 + $0x14] ss:$8 sps:$4 sm:$0xff]  }
 0x1d8   : > { %v976_v37 = vmax.f32 %v766_v34, 0.0  ;;  %2608 = vmatmul.mubr.bf16.gmra.mrb[136].mxu0 %v1030_v21 }
 0x1d9   : > { %2611 = vmatprep.mubr.bf16.mxu0 %v1031_v29 }
 0x1da   : > { %v1032_v38 = vpack.c.bf16 %v976_v37, %v975_v36 }
 0x1db   : > { %v770_v40 = vpop.f32.mrb[32].mxu0 }
 0x1dc   : > { %v771_v41 = vadd.f32 %v3527_v1, %v770_v40  ;;  %v772_v42 = vpop.f32.mrb[33].mxu0 }
 0x1dd   : > { %v773_v43 = vpop.f32.mrb[34].mxu0 }
 0x1de   : > { %v774_v44 = vadd.f32 %v3527_v1, %v773_v43  ;;  %v775_v45 = vpop.f32.mrb[35].mxu0  ;;  %v977_v46 = vmax.f32 %v771_v41, 0.0  ;;  %v2797_v41 = vld [vmem:[#allocation8 + $0x24] ss:$8 sps:$4 sm:$0xff]  }
 0x1e0   : > { %v978_v47 = vmax.f32 %v774_v44, 0.0  ;;  %2612 = vmatmul.mubr.bf16.gmra.mrb[140].mxu0 %v1032_v38  ;;  %v2792_v38 = vld [vmem:[#allocation8 + $0x10] ss:$8 sps:$4 sm:$0xff]   ;;  %v2795_v44 = vld [vmem:[#allocation8 + $0x20] ss:$8 sps:$4 sm:$0xff]  }
 0x1e2   : > { %v1033_v48 = vpack.c.bf16 %v978_v47, %v977_v46  ;;  %v2800_v46 = vld [vmem:[#allocation8 + $0x34] ss:$8 sps:$4 sm:$0xff]  }
 0x1e3   : > { %v778_v49 = vpop.f32.mrb[36].mxu0 }
 0x1e4   : > { %v779_v50 = vadd.f32 %v3527_v1, %v778_v49  ;;  %v780_v51 = vpop.f32.mrb[37].mxu0  ;;  %2615 = vmatprep.mubr.bf16.mxu0 %v1033_v48 }
 0x1e5   : > { %v781_v52 = vpop.f32.mrb[38].mxu0  ;;  %v2798_v51 = vld [vmem:[#allocation8 + $0x30] ss:$8 sps:$4 sm:$0xff]  }
 0x1e6   : > { %v782_v53 = vadd.f32 %v3527_v1, %v781_v52  ;;  %v783_v54 = vpop.f32.mrb[39].mxu0  ;;  %v979_v55 = vmax.f32 %v779_v50, 0.0 }
 0x1e7   : > { %v2803_v54 = vld [vmem:[#allocation8 + $0x44] ss:$8 sps:$4 sm:$0xff]  }
 0x1e8   : > { %v980_v56 = vmax.f32 %v782_v53, 0.0 }
 0x1ea   : > { %v1034_v57 = vpack.c.bf16 %v980_v56, %v979_v55 }
 0x1eb   : > { %v786_v58 = vpop.f32.mrb[40].mxu0 }
 0x1ec   : > { %v787_v59 = vadd.f32 %v3527_v1, %v786_v58  ;;  %v788_v60 = vpop.f32.mrb[41].mxu0  ;;  %2616 = vmatmul.mubr.bf16.gmra.mrb[144].mxu0 %v1034_v57  ;;  %v2801_v57 = vld [vmem:[#allocation8 + $0x40] ss:$8 sps:$4 sm:$0xff]  }
 0x1ed   : > { %v789_v61 = vpop.f32.mrb[42].mxu0 }
 0x1ee   : > { %v790_v62 = vadd.f32 %v3527_v1, %v789_v61  ;;  %v791_v63 = vpop.f32.mrb[43].mxu0  ;;  %v981_v2 = vmax.f32 %v787_v59, 0.0  ;;  %v2806_v59 = vld [vmem:[#allocation8 + $0x54] ss:$8 sps:$4 sm:$0xff]  }
 0x1f0   : > { %v982_v3 = vmax.f32 %v790_v62, 0.0 }
 0x1f2   : > { %v1035_v4 = vpack.c.bf16 %v982_v3, %v981_v2  ;;  %v2804_v2 = vld [vmem:[#allocation8 + $0x50] ss:$8 sps:$4 sm:$0xff]  }
 0x1f3   : > { %v794_v5 = vpop.f32.mrb[44].mxu0 }
 0x1f4   : > { %v795_v6 = vadd.f32 %v3527_v1, %v794_v5  ;;  %v796_v7 = vpop.f32.mrb[45].mxu0  ;;  %2619 = vmatprep.mubr.bf16.mxu0 %v1035_v4  ;;  %v2809_v5 = vld [vmem:[#allocation8 + $0x64] ss:$8 sps:$4 sm:$0xff]  }
 0x1f5   : > { %v797_v8 = vpop.f32.mrb[46].mxu0 }
 0x1f6   : > { %v798_v9 = vadd.f32 %v3527_v1, %v797_v8  ;;  %v799_v10 = vpop.f32.mrb[47].mxu0  ;;  %v983_v11 = vmax.f32 %v795_v6, 0.0  ;;  %v2807_v8 = vld [vmem:[#allocation8 + $0x60] ss:$8 sps:$4 sm:$0xff]  }
 0x1f7   : > { %v2812_v10 = vld [vmem:[#allocation8 + $0x74] ss:$8 sps:$4 sm:$0xff]  }
 0x1f8   : > { %v984_v12 = vmax.f32 %v798_v9, 0.0 }
 0x1fa   : > { %v1036_v13 = vpack.c.bf16 %v984_v12, %v983_v11 }
 0x1fb   : > { %v802_v14 = vpop.f32.mrb[48].mxu0 }
 0x1fc   : > { %v803_v15 = vadd.f32 %v3527_v1, %v802_v14  ;;  %v804_v16 = vpop.f32.mrb[49].mxu0  ;;  %2620 = vmatmul.mubr.bf16.gmra.mrb[148].mxu0 %v1036_v13 }
 0x1fd   : > { %v805_v17 = vpop.f32.mrb[50].mxu0 }
 0x1fe   : > { %v806_v19 = vadd.f32 %v3527_v1, %v805_v17  ;;  %v807_v20 = vpop.f32.mrb[51].mxu0  ;;  %v985_v21 = vmax.f32 %v803_v15, 0.0  ;;  %v2810_v15 = vld [vmem:[#allocation8 + $0x70] ss:$8 sps:$4 sm:$0xff]  }
 0x200   : > { %v986_v22 = vmax.f32 %v806_v19, 0.0 }
 0x202   : > { %v1037_v23 = vpack.c.bf16 %v986_v22, %v985_v21 }
 0x203   : > { %v810_v24 = vpop.f32.mrb[52].mxu0 }
 0x204   : > { %v811_v25 = vadd.f32 %v3527_v1, %v810_v24  ;;  %v812_v18 = vpop.f32.mrb[53].mxu0  ;;  %2623 = vmatprep.mubr.bf16.mxu1 %v1037_v23 }
 0x205   : > { %v813_v26 = vpop.f32.mrb[54].mxu0 }
 0x206   : > { %v814_v27 = vadd.f32 %v3527_v1, %v813_v26  ;;  %v815_v28 = vpop.f32.mrb[55].mxu0  ;;  %v987_v29 = vmax.f32 %v811_v25, 0.0 }
 0x208   : > { %v988_v30 = vmax.f32 %v814_v27, 0.0 }
 0x20a   : > { %v1038_v32 = vpack.c.bf16 %v988_v30, %v987_v29 }
 0x20b   : > { %v818_v34 = vpop.f32.mrb[56].mxu0 }
 0x20c   : > { %v819_v35 = vadd.f32 %v3527_v1, %v818_v34  ;;  %v820_v36 = vpop.f32.mrb[57].mxu0  ;;  %2624 = vmatmul.mubr.bf16.vlgmr.msra.gmra.mrb[0].mxu1 %v1038_v32 }
 0x20d   : > { %v821_v37 = vpop.f32.mrb[58].mxu0  ;;  %1622 = vmatpush1.bf16.msra.mxu1 %v2789_v31 }
 0x20e   : > { %v822_v39 = vadd.f32 %v3527_v1, %v821_v37  ;;  %v823_v40 = vpop.f32.mrb[59].mxu0  ;;  %1623 = vmatprep.subr.bf16.mxu1 %v2794_v33  ;;  %v989_v42 = vmax.f32 %v819_v35, 0.0 }
 0x210   : > { %v990_v43 = vmax.f32 %v822_v39, 0.0 }
 0x211   : > { %1624 = vmatpush1.bf16.msra.mxu1 %v2792_v38 }
 0x212   : > { %v1039_v45 = vpack.c.bf16 %v990_v43, %v989_v42  ;;  %1625 = vmatprep.subr.bf16.mxu1 %v2797_v41 }
 0x213   : > { %v826_v47 = vpop.f32.mrb[60].mxu0 }
 0x214   : > { %v827_v48 = vadd.f32 %v3527_v1, %v826_v47  ;;  %v828_v49 = vpop.f32.mrb[61].mxu0  ;;  %2627 = vmatprep.mubr.bf16.mxu1 %v1039_v45 }
 0x215   : > { %v829_v50 = vpop.f32.mrb[62].mxu0  ;;  %1626 = vmatpush1.bf16.msra.mxu1 %v2795_v44 }
 0x216   : > { %v830_v52 = vadd.f32 %v3527_v1, %v829_v50  ;;  %v831_v53 = vpop.f32.mrb[63].mxu0  ;;  %1627 = vmatprep.subr.bf16.mxu1 %v2800_v46  ;;  %v991_v55 = vmax.f32 %v827_v48, 0.0 }
 0x218   : > { %v992_v56 = vmax.f32 %v830_v52, 0.0 }
 0x219   : > { %1628 = vmatpush1.bf16.msra.mxu1 %v2798_v51 }
 0x21a   : > { %v1040_v58 = vpack.c.bf16 %v992_v56, %v991_v55  ;;  %1629 = vmatprep.subr.bf16.mxu1 %v2803_v54 }
 0x21b   : > { %v834_v60 = vpop.f32.mrb[64].mxu0 }
 0x21c   : > { %v835_v61 = vadd.f32 %v3527_v1, %v834_v60  ;;  %v836_v62 = vpop.f32.mrb[65].mxu0  ;;  %2628 = vmatmul.mubr.bf16.gmra.mrb[4].mxu1 %v1040_v58 }
 0x21d   : > { %v837_v63 = vpop.f32.mrb[66].mxu0  ;;  %1630 = vmatpush1.bf16.msra.mxu1 %v2801_v57 }
 0x21e   : > { %v838_v3 = vadd.f32 %v3527_v1, %v837_v63  ;;  %v839_v4 = vpop.f32.mrb[67].mxu0  ;;  %1631 = vmatprep.subr.bf16.mxu1 %v2806_v59  ;;  %v993_v6 = vmax.f32 %v835_v61, 0.0 }
 0x220   : > { %v994_v7 = vmax.f32 %v838_v3, 0.0 }
 0x221   : > { %1632 = vmatpush1.bf16.msra.mxu1 %v2804_v2 }
 0x222   : > { %v1041_v9 = vpack.c.bf16 %v994_v7, %v993_v6  ;;  %1633 = vmatprep.subr.bf16.mxu1 %v2809_v5 }
 0x223   : > { %v842_v11 = vpop.f32.mrb[68].mxu0 }
 0x224   : > { %v843_v12 = vadd.f32 %v3527_v1, %v842_v11  ;;  %v844_v13 = vpop.f32.mrb[69].mxu0  ;;  %2631 = vmatprep.mubr.bf16.mxu1 %v1041_v9 }
 0x225   : > { %v845_v14 = vpop.f32.mrb[70].mxu0  ;;  %1634 = vmatpush1.bf16.msra.mxu1 %v2807_v8 }
 0x226   : > { %v846_v16 = vadd.f32 %v3527_v1, %v845_v14  ;;  %v847_v17 = vpop.f32.mrb[71].mxu0  ;;  %1635 = vmatprep.subr.bf16.mxu1 %v2812_v10  ;;  %v995_v19 = vmax.f32 %v843_v12, 0.0 }
 0x228   : > { %v996_v20 = vmax.f32 %v846_v16, 0.0 }
 0x229   : > { %1636 = vmatpush1.bf16.msra.mxu1 %v2810_v15 }
 0x22a   : > { %v1042_v21 = vpack.c.bf16 %v996_v20, %v995_v19 }
 0x22b   : > { %v850_v22 = vpop.f32.mrb[72].mxu0 }
 0x22c   : > { %v851_v23 = vadd.f32 %v3527_v1, %v850_v22  ;;  %v852_v24 = vpop.f32.mrb[73].mxu0  ;;  %2632 = vmatmul.mubr.bf16.gmra.mrb[8].mxu1 %v1042_v21 }
 0x22d   : > { %v853_v25 = vpop.f32.mrb[74].mxu0 }
 0x22e   : > { %v854_v18 = vadd.f32 %v3527_v1, %v853_v25  ;;  %v855_v26 = vpop.f32.mrb[75].mxu0  ;;  %v997_v27 = vmax.f32 %v851_v23, 0.0 }
 0x230   : > { %v998_v28 = vmax.f32 %v854_v18, 0.0 }
 0x232   : > { %v1043_v29 = vpack.c.bf16 %v998_v28, %v997_v27 }
 0x233   : > { %v858_v30 = vpop.f32.mrb[76].mxu0 }
 0x234   : > { %v859_v31 = vadd.f32 %v3527_v1, %v858_v30  ;;  %v860_v32 = vpop.f32.mrb[77].mxu0  ;;  %2635 = vmatprep.mubr.bf16.mxu1 %v1043_v29 }
 0x235   : > { %v861_v33 = vpop.f32.mrb[78].mxu0 }
 0x236   : > { %v862_v34 = vadd.f32 %v3527_v1, %v861_v33  ;;  %v863_v35 = vpop.f32.mrb[79].mxu0  ;;  %v999_v36 = vmax.f32 %v859_v31, 0.0 }
 0x238   : > { %v1000_v37 = vmax.f32 %v862_v34, 0.0 }
 0x23a   : > { %v1044_v38 = vpack.c.bf16 %v1000_v37, %v999_v36 }
 0x23b   : > { %v866_v39 = vpop.f32.mrb[80].mxu0 }
 0x23c   : > { %v867_v40 = vadd.f32 %v3527_v1, %v866_v39  ;;  %v868_v41 = vpop.f32.mrb[81].mxu0  ;;  %2636 = vmatmul.mubr.bf16.gmra.mrb[12].mxu1 %v1044_v38 }
 0x23d   : > { %v869_v42 = vpop.f32.mrb[82].mxu0 }
 0x23e   : > { %v870_v43 = vadd.f32 %v3527_v1, %v869_v42  ;;  %v871_v44 = vpop.f32.mrb[83].mxu0  ;;  %v1001_v45 = vmax.f32 %v867_v40, 0.0 }
 0x240   : > { %v1002_v46 = vmax.f32 %v870_v43, 0.0 }
 0x242   : > { %v1045_v47 = vpack.c.bf16 %v1002_v46, %v1001_v45 }
 0x243   : > { %v874_v48 = vpop.f32.mrb[84].mxu0 }
 0x244   : > { %v875_v49 = vadd.f32 %v3527_v1, %v874_v48  ;;  %v876_v50 = vpop.f32.mrb[85].mxu0  ;;  %2639 = vmatprep.mubr.bf16.mxu1 %v1045_v47 }
 0x245   : > { %v877_v51 = vpop.f32.mrb[86].mxu0 }
 0x246   : > { %v878_v52 = vadd.f32 %v3527_v1, %v877_v51  ;;  %v879_v53 = vpop.f32.mrb[87].mxu0  ;;  %v1003_v54 = vmax.f32 %v875_v49, 0.0 }
 0x248   : > { %v1004_v55 = vmax.f32 %v878_v52, 0.0 }
 0x24a   : > { %v1046_v56 = vpack.c.bf16 %v1004_v55, %v1003_v54 }
 0x24b   : > { %v882_v57 = vpop.f32.mrb[88].mxu0 }
 0x24c   : > { %v883_v58 = vadd.f32 %v3527_v1, %v882_v57  ;;  %v884_v59 = vpop.f32.mrb[89].mxu0  ;;  %2640 = vmatmul.mubr.bf16.gmra.mrb[16].mxu1 %v1046_v56 }
 0x24d   : > { %v885_v60 = vpop.f32.mrb[90].mxu0 }
 0x24e   : > { %v886_v61 = vadd.f32 %v3527_v1, %v885_v60  ;;  %v887_v62 = vpop.f32.mrb[91].mxu0  ;;  %v1005_v63 = vmax.f32 %v883_v58, 0.0 }
 0x250   : > { %v1006_v2 = vmax.f32 %v886_v61, 0.0 }
 0x252   : > { %v1047_v3 = vpack.c.bf16 %v1006_v2, %v1005_v63 }
 0x253   : > { %v890_v4 = vpop.f32.mrb[92].mxu0 }
 0x254   : > { %v891_v5 = vadd.f32 %v3527_v1, %v890_v4  ;;  %v892_v6 = vpop.f32.mrb[93].mxu0  ;;  %2643 = vmatprep.mubr.bf16.mxu1 %v1047_v3 }
 0x255   : > { %v893_v7 = vpop.f32.mrb[94].mxu0 }
 0x256   : > { %v894_v8 = vadd.f32 %v3527_v1, %v893_v7  ;;  %v895_v9 = vpop.f32.mrb[95].mxu0  ;;  %v1007_v10 = vmax.f32 %v891_v5, 0.0 }
 0x258   : > { %v1008_v11 = vmax.f32 %v894_v8, 0.0 }
 0x25a   : > { %v1048_v12 = vpack.c.bf16 %v1008_v11, %v1007_v10 }
 0x25b   : > { %v898_v13 = vpop.f32.mrb[96].mxu0 }
 0x25c   : > { %v899_v14 = vadd.f32 %v3527_v1, %v898_v13  ;;  %v900_v15 = vpop.f32.mrb[97].mxu0  ;;  %2644 = vmatmul.mubr.bf16.gmra.mrb[20].mxu1 %v1048_v12 }
 0x25d   : > { %v901_v16 = vpop.f32.mrb[98].mxu0 }
 0x25e   : > { %v902_v17 = vadd.f32 %v3527_v1, %v901_v16  ;;  %v903_v19 = vpop.f32.mrb[99].mxu0  ;;  %v1009_v20 = vmax.f32 %v899_v14, 0.0 }
 0x260   : > { %v1010_v21 = vmax.f32 %v902_v17, 0.0 }
 0x262   : > { %v1049_v22 = vpack.c.bf16 %v1010_v21, %v1009_v20 }
 0x263   : > { %v906_v23 = vpop.f32.mrb[100].mxu0 }
 0x264   : > { %v907_v24 = vadd.f32 %v3527_v1, %v906_v23  ;;  %v908_v25 = vpop.f32.mrb[101].mxu0  ;;  %2647 = vmatprep.mubr.bf16.mxu1 %v1049_v22  ;;  %v3614_v23 = vld [vmem:[%s4174_s4] ss:$0 sm:$0xff] }
 0x265   : > { %v909_v18 = vpop.f32.mrb[102].mxu0 }
 0x266   : > { %v910_v26 = vadd.f32 %v3527_v1, %v909_v18  ;;  %v911_v27 = vpop.f32.mrb[103].mxu0  ;;  %v1011_v28 = vmax.f32 %v907_v24, 0.0 }
 0x268   : > { %v1012_v29 = vmax.f32 %v910_v26, 0.0 }
 0x26a   : > { %v1050_v30 = vpack.c.bf16 %v1012_v29, %v1011_v28 }
 0x26b   : > { %v914_v31 = vpop.f32.mrb[104].mxu0 }
 0x26c   : > { %v915_v32 = vadd.f32 %v3527_v1, %v914_v31  ;;  %v916_v33 = vpop.f32.mrb[105].mxu0  ;;  %2648 = vmatmul.mubr.bf16.gmra.mrb[24].mxu1 %v1050_v30 }
 0x26d   : > { %v917_v34 = vpop.f32.mrb[106].mxu0 }
 0x26e   : > { %v918_v35 = vadd.f32 %v3527_v1, %v917_v34  ;;  %v919_v36 = vpop.f32.mrb[107].mxu0  ;;  %v1013_v37 = vmax.f32 %v915_v32, 0.0 }
 0x270   : > { %v1014_v38 = vmax.f32 %v918_v35, 0.0 }
 0x272   : > { %v1051_v39 = vpack.c.bf16 %v1014_v38, %v1013_v37 }
 0x273   : > { %v922_v40 = vpop.f32.mrb[108].mxu0 }
 0x274   : > { %v923_v41 = vadd.f32 %v3527_v1, %v922_v40  ;;  %v924_v42 = vpop.f32.mrb[109].mxu0  ;;  %2651 = vmatprep.mubr.bf16.mxu1 %v1051_v39 }
 0x275   : > { %v925_v43 = vpop.f32.mrb[110].mxu0 }
 0x276   : > { %v926_v44 = vadd.f32 %v3527_v1, %v925_v43  ;;  %v927_v45 = vpop.f32.mrb[111].mxu0  ;;  %v1015_v46 = vmax.f32 %v923_v41, 0.0 }
 0x278   : > { %v1016_v47 = vmax.f32 %v926_v44, 0.0 }
 0x27a   : > { %v1052_v48 = vpack.c.bf16 %v1016_v47, %v1015_v46 }
 0x27b   : > { %v930_v49 = vpop.f32.mrb[112].mxu0 }
 0x27c   : > { %v931_v50 = vadd.f32 %v3527_v1, %v930_v49  ;;  %v932_v51 = vpop.f32.mrb[113].mxu0  ;;  %2652 = vmatmul.mubr.bf16.gmra.mrb[28].mxu1 %v1052_v48 }
 0x27d   : > { %v933_v52 = vpop.f32.mrb[114].mxu0 }
 0x27e   : > { %v934_v53 = vadd.f32 %v3527_v1, %v933_v52  ;;  %v935_v54 = vpop.f32.mrb[115].mxu0  ;;  %v1017_v55 = vmax.f32 %v931_v50, 0.0 }
 0x280   : > { %v1018_v56 = vmax.f32 %v934_v53, 0.0 }
 0x282   : > { %v1053_v57 = vpack.c.bf16 %v1018_v56, %v1017_v55 }
 0x283   : > { %v938_v58 = vpop.f32.mrb[116].mxu0 }
 0x284   : > { %v939_v59 = vadd.f32 %v3527_v1, %v938_v58  ;;  %v940_v60 = vpop.f32.mrb[117].mxu0  ;;  %2655 = vmatprep.mubr.bf16.mxu1 %v1053_v57 }
 0x285   : > { %v941_v61 = vpop.f32.mrb[118].mxu0 }
 0x286   : > { %v942_v62 = vadd.f32 %v3527_v1, %v941_v61  ;;  %v943_v63 = vpop.f32.mrb[119].mxu0  ;;  %v1019_v2 = vmax.f32 %v939_v59, 0.0 }
 0x288   : > { %v1020_v3 = vmax.f32 %v942_v62, 0.0 }
 0x28a   : > { %v1054_v4 = vpack.c.bf16 %v1020_v3, %v1019_v2 }
 0x28b   : > { %v946_v5 = vpop.f32.mrb[120].mxu0 }
 0x28c   : > { %v947_v6 = vadd.f32 %v3527_v1, %v946_v5  ;;  %v948_v7 = vpop.f32.mrb[121].mxu0  ;;  %2656 = vmatmul.mubr.bf16.gmra.mrb[32].mxu1 %v1054_v4 }
 0x28d   : > { %v949_v8 = vpop.f32.mrb[122].mxu0 }
 0x28e   : > { %v950_v9 = vadd.f32 %v3527_v1, %v949_v8  ;;  %v951_v10 = vpop.f32.mrb[123].mxu0  ;;  %v1021_v11 = vmax.f32 %v947_v6, 0.0 }
 0x290   : > { %v1022_v12 = vmax.f32 %v950_v9, 0.0 }
 0x292   : > { %v1055_v13 = vpack.c.bf16 %v1022_v12, %v1021_v11 }
 0x293   : > { %v954_v14 = vpop.f32.mrb[124].mxu0 }
 0x294   : > { %v955_v15 = vadd.f32 %v3527_v1, %v954_v14  ;;  %v956_v16 = vpop.f32.mrb[125].mxu0  ;;  %2659 = vmatprep.mubr.bf16.mxu1 %v1055_v13 }
 0x295   : > { %v957_v17 = vpop.f32.mrb[126].mxu0 }
 0x296   : > { %v958_v19 = vadd.f32 %v3527_v1, %v957_v17  ;;  %v959_v20 = vpop.f32.mrb[127].mxu0  ;;  %v1023_v21 = vmax.f32 %v955_v15, 0.0 }
 0x298   : > { %v1024_v22 = vmax.f32 %v958_v19, 0.0 }
 0x29a   : > { %v1056_v24 = vpack.c.bf16 %v1024_v22, %v1023_v21 }
 0x29b   : > { %v2601_v25 = vpop.f32.mrb[128].mxu0 }
 0x29c   : > { %v1171_v18 = vadd.f32 %v2601_v25, %v3614_v23  ;;  %v1162_v26 = vpop.f32.mrb[129].mxu0  ;;  %2660 = vmatmul.mubr.bf16.gmra.mrb[36].mxu1 %v1056_v24 }
 0x29d   : > { %v1163_v27 = vadd.f32 %v3614_v23, %v1162_v26  ;;  %v2602_v28 = vpop.f32.mrb[130].mxu0  ;;  %1653 = vmatprep.mubr.bf16.mxu1 %v3141_v0 }
 0x29e   : > { %v1174_v1 = vadd.f32 %v2602_v28, %v3614_v23  ;;  %v1165_v29 = vpop.f32.mrb[131].mxu0  ;;  %v1419_v31 = vmax.f32 %v1171_v18, 0.0 }
 0x29f   : > { %v1166_v30 = vadd.f32 %v3614_v23, %v1165_v29  ;;  %v1417_v33 = vmax.f32 %v1163_v27, 0.0 }
 0x2a0   : > { %v1420_v32 = vmax.f32 %v1174_v1, 0.0 }
 0x2a1   : > { %v1418_v34 = vmax.f32 %v1166_v30, 0.0 }
 0x2a2   : > { %v1482_v35 = vpack.c.bf16 %v1420_v32, %v1419_v31 }
 0x2a3   : > { %v1481_v36 = vpack.c.bf16 %v1418_v34, %v1417_v33  ;;  %v2605_v37 = vpop.f32.mrb[132].mxu0 }
 0x2a4   : > { %v1187_v38 = vadd.f32 %v2605_v37, %v3614_v23  ;;  %v1178_v39 = vpop.f32.mrb[133].mxu0 }
 0x2a5   : > { %v1179_v40 = vadd.f32 %v3614_v23, %v1178_v39  ;;  %v2606_v41 = vpop.f32.mrb[134].mxu0  ;;  %1654 = vmatmul.mubr.bf16.vlgmr.msra.gmra.mrb[40].mxu1 %v1481_v36 }
 0x2a6   : > { %v1190_v42 = vadd.f32 %v2606_v41, %v3614_v23  ;;  %v1181_v43 = vpop.f32.mrb[135].mxu0  ;;  %1663 = vmatprep.mubr.bf16.mxu1 %v3141_v0  ;;  %v1423_v45 = vmax.f32 %v1187_v38, 0.0 }
 0x2a7   : > { %v1182_v44 = vadd.f32 %v3614_v23, %v1181_v43  ;;  %v1421_v47 = vmax.f32 %v1179_v40, 0.0 }
 0x2a8   : > { %v1424_v46 = vmax.f32 %v1190_v42, 0.0 }
 0x2a9   : > { %v1422_v48 = vmax.f32 %v1182_v44, 0.0 }
 0x2aa   : > { %v1484_v49 = vpack.c.bf16 %v1424_v46, %v1423_v45 }
 0x2ab   : > { %v1483_v50 = vpack.c.bf16 %v1422_v48, %v1421_v47  ;;  %v2609_v51 = vpop.f32.mrb[136].mxu0 }
 0x2ac   : > { %v1203_v52 = vadd.f32 %v2609_v51, %v3614_v23  ;;  %v1194_v53 = vpop.f32.mrb[137].mxu0 }
 0x2ad   : > { %v1195_v54 = vadd.f32 %v3614_v23, %v1194_v53  ;;  %v2610_v55 = vpop.f32.mrb[138].mxu0  ;;  %1664 = vmatmul.mubr.bf16.gmra.mrb[44].mxu1 %v1482_v35 }
 0x2ae   : > { %v1206_v56 = vadd.f32 %v2610_v55, %v3614_v23  ;;  %v1197_v57 = vpop.f32.mrb[139].mxu0  ;;  %1673 = vmatprep.mubr.bf16.mxu1 %v3141_v0  ;;  %v1427_v59 = vmax.f32 %v1203_v52, 0.0 }
 0x2af   : > { %v1198_v58 = vadd.f32 %v3614_v23, %v1197_v57  ;;  %v1425_v61 = vmax.f32 %v1195_v54, 0.0 }
 0x2b0   : > { %v1428_v60 = vmax.f32 %v1206_v56, 0.0 }
 0x2b1   : > { %v1426_v62 = vmax.f32 %v1198_v58, 0.0 }
 0x2b2   : > { %v1486_v63 = vpack.c.bf16 %v1428_v60, %v1427_v59 }
 0x2b3   : > { %v1485_v2 = vpack.c.bf16 %v1426_v62, %v1425_v61  ;;  %v2613_v3 = vpop.f32.mrb[140].mxu0 }
 0x2b4   : > { %v1219_v4 = vadd.f32 %v2613_v3, %v3614_v23  ;;  %v1210_v5 = vpop.f32.mrb[141].mxu0 }
 0x2b5   : > { %v1211_v6 = vadd.f32 %v3614_v23, %v1210_v5  ;;  %v2614_v7 = vpop.f32.mrb[142].mxu0  ;;  %1674 = vmatmul.mubr.bf16.gmra.mrb[48].mxu1 %v1483_v50 }
 0x2b6   : > { %v1222_v8 = vadd.f32 %v2614_v7, %v3614_v23  ;;  %v1213_v9 = vpop.f32.mrb[143].mxu0  ;;  %1683 = vmatprep.mubr.bf16.mxu1 %v3141_v0  ;;  %v1431_v11 = vmax.f32 %v1219_v4, 0.0 }
 0x2b7   : > { %v1214_v10 = vadd.f32 %v3614_v23, %v1213_v9  ;;  %v1429_v13 = vmax.f32 %v1211_v6, 0.0 }
 0x2b8   : > { %v1432_v12 = vmax.f32 %v1222_v8, 0.0 }
 0x2b9   : > { %v1430_v14 = vmax.f32 %v1214_v10, 0.0 }
 0x2ba   : > { %v1488_v15 = vpack.c.bf16 %v1432_v12, %v1431_v11 }
 0x2bb   : > { %v1487_v16 = vpack.c.bf16 %v1430_v14, %v1429_v13 }
 0x2bd   : > { %1684 = vmatmul.mubr.bf16.gmra.mrb[52].mxu1 %v1484_v49 }
 0x2be   : > { %1693 = vmatprep.mubr.bf16.mxu1 %v3141_v0 }
 0x2bf   : > { %v2617_v17 = vpop.f32.mrb[144].mxu0 }
 0x2c0   : > { %v1235_v19 = vadd.f32 %v2617_v17, %v3614_v23  ;;  %v1226_v20 = vpop.f32.mrb[145].mxu0 }
 0x2c1   : > { %v1227_v21 = vadd.f32 %v3614_v23, %v1226_v20  ;;  %v2618_v22 = vpop.f32.mrb[146].mxu0 }
 0x2c2   : > { %v1238_v24 = vadd.f32 %v2618_v22, %v3614_v23  ;;  %v1229_v25 = vpop.f32.mrb[147].mxu0  ;;  %v1435_v26 = vmax.f32 %v1235_v19, 0.0 }
 0x2c3   : > { %v1230_v18 = vadd.f32 %v3614_v23, %v1229_v25  ;;  %v1433_v28 = vmax.f32 %v1227_v21, 0.0 }
 0x2c4   : > { %v1436_v27 = vmax.f32 %v1238_v24, 0.0 }
 0x2c5   : > { %v1434_v1 = vmax.f32 %v1230_v18, 0.0  ;;  %1694 = vmatmul.mubr.bf16.gmra.mrb[56].mxu1 %v1485_v2 }
 0x2c6   : > { %v1490_v29 = vpack.c.bf16 %v1436_v27, %v1435_v26  ;;  %1703 = vmatprep.mubr.bf16.mxu1 %v3141_v0 }
 0x2c7   : > { %v1489_v30 = vpack.c.bf16 %v1434_v1, %v1433_v28 }
 0x2cd   : > { %1704 = vmatmul.mubr.bf16.gmra.mrb[60].mxu1 %v1486_v63 }
 0x2ce   : > { %1713 = vmatprep.mubr.bf16.mxu1 %v3141_v0 }
 0x2cf   : > { %v2621_v31 = vpop.f32.mrb[148].mxu0 }
 0x2d0   : > { %v1251_v32 = vadd.f32 %v2621_v31, %v3614_v23  ;;  %v1242_v33 = vpop.f32.mrb[149].mxu0 }
 0x2d1   : > { %v1243_v34 = vadd.f32 %v3614_v23, %v1242_v33  ;;  %v2622_v35 = vpop.f32.mrb[150].mxu0 }
 0x2d2   : > { %v1254_v36 = vadd.f32 %v2622_v35, %v3614_v23  ;;  %v1245_v37 = vpop.f32.mrb[151].mxu0  ;;  %v1439_v39 = vmax.f32 %v1251_v32, 0.0 }
 0x2d3   : > { %v1246_v38 = vadd.f32 %v3614_v23, %v1245_v37  ;;  %v1437_v41 = vmax.f32 %v1243_v34, 0.0 }
 0x2d4   : > { %v1440_v40 = vmax.f32 %v1254_v36, 0.0 }
 0x2d5   : > { %v1438_v42 = vmax.f32 %v1246_v38, 0.0  ;;  %1714 = vmatmul.mubr.bf16.gmra.mrb[64].mxu1 %v1487_v16 }
 0x2d6   : > { %v1492_v43 = vpack.c.bf16 %v1440_v40, %v1439_v39  ;;  %1723 = vmatprep.mubr.bf16.mxu1 %v3141_v0 }
 0x2d7   : > { %v1491_v44 = vpack.c.bf16 %v1438_v42, %v1437_v41 }
 0x2dd   : > { %1724 = vmatmul.mubr.bf16.gmra.mrb[68].mxu1 %v1488_v15 }
 0x2de   : > { %1733 = vmatprep.mubr.bf16.mxu1 %v3141_v0 }
 0x2df   : > { %v2625_v45 = vpop.f32.mrb[0].mxu1 }
 0x2e0   : > { %v1267_v46 = vadd.f32 %v2625_v45, %v3614_v23  ;;  %v1258_v47 = vpop.f32.mrb[1].mxu1 }
 0x2e1   : > { %v1259_v48 = vadd.f32 %v3614_v23, %v1258_v47  ;;  %v2626_v49 = vpop.f32.mrb[2].mxu1 }
 0x2e2   : > { %v1270_v50 = vadd.f32 %v2626_v49, %v3614_v23  ;;  %v1261_v51 = vpop.f32.mrb[3].mxu1  ;;  %v1443_v53 = vmax.f32 %v1267_v46, 0.0 }
 0x2e3   : > { %v1262_v52 = vadd.f32 %v3614_v23, %v1261_v51  ;;  %v1441_v55 = vmax.f32 %v1259_v48, 0.0 }
 0x2e4   : > { %v1444_v54 = vmax.f32 %v1270_v50, 0.0 }
 0x2e5   : > { %v1442_v56 = vmax.f32 %v1262_v52, 0.0  ;;  %1734 = vmatmul.mubr.bf16.gmra.mrb[72].mxu1 %v1489_v30 }
 0x2e6   : > { %v1494_v57 = vpack.c.bf16 %v1444_v54, %v1443_v53  ;;  %1743 = vmatprep.mubr.bf16.mxu1 %v3141_v0 }
 0x2e7   : > { %v1493_v58 = vpack.c.bf16 %v1442_v56, %v1441_v55 }
 0x2ed   : > { %1744 = vmatmul.mubr.bf16.gmra.mrb[76].mxu1 %v1490_v29 }
 0x2ee   : > { %1753 = vmatprep.mubr.bf16.mxu1 %v3141_v0 }
 0x2ef   : > { %v2629_v59 = vpop.f32.mrb[4].mxu1 }
 0x2f0   : > { %v1283_v60 = vadd.f32 %v2629_v59, %v3614_v23  ;;  %v1274_v61 = vpop.f32.mrb[5].mxu1 }
 0x2f1   : > { %v1275_v62 = vadd.f32 %v3614_v23, %v1274_v61  ;;  %v2630_v63 = vpop.f32.mrb[6].mxu1 }
 0x2f2   : > { %v1286_v2 = vadd.f32 %v2630_v63, %v3614_v23  ;;  %v1277_v3 = vpop.f32.mrb[7].mxu1  ;;  %v1447_v5 = vmax.f32 %v1283_v60, 0.0 }
 0x2f3   : > { %v1278_v4 = vadd.f32 %v3614_v23, %v1277_v3  ;;  %v1445_v7 = vmax.f32 %v1275_v62, 0.0 }
 0x2f4   : > { %v1448_v6 = vmax.f32 %v1286_v2, 0.0 }
 0x2f5   : > { %v1446_v8 = vmax.f32 %v1278_v4, 0.0  ;;  %1754 = vmatmul.mubr.bf16.gmra.mrb[80].mxu1 %v1491_v44 }
 0x2f6   : > { %v1496_v9 = vpack.c.bf16 %v1448_v6, %v1447_v5  ;;  %1763 = vmatprep.mubr.bf16.mxu1 %v3141_v0 }
 0x2f7   : > { %v1495_v10 = vpack.c.bf16 %v1446_v8, %v1445_v7 }
 0x2fd   : > { %1764 = vmatmul.mubr.bf16.gmra.mrb[84].mxu1 %v1492_v43 }
 0x2fe   : > { %1773 = vmatprep.mubr.bf16.mxu1 %v3141_v0 }
 0x2ff   : > { %v2633_v11 = vpop.f32.mrb[8].mxu1 }
 0x300   : > { %v1299_v12 = vadd.f32 %v2633_v11, %v3614_v23  ;;  %v1290_v13 = vpop.f32.mrb[9].mxu1 }
 0x301   : > { %v1291_v14 = vadd.f32 %v3614_v23, %v1290_v13  ;;  %v2634_v15 = vpop.f32.mrb[10].mxu1 }
 0x302   : > { %v1302_v16 = vadd.f32 %v2634_v15, %v3614_v23  ;;  %v1293_v17 = vpop.f32.mrb[11].mxu1  ;;  %v1451_v20 = vmax.f32 %v1299_v12, 0.0 }
 0x303   : > { %v1294_v19 = vadd.f32 %v3614_v23, %v1293_v17  ;;  %v1449_v22 = vmax.f32 %v1291_v14, 0.0 }
 0x304   : > { %v1452_v21 = vmax.f32 %v1302_v16, 0.0 }
 0x305   : > { %v1450_v24 = vmax.f32 %v1294_v19, 0.0  ;;  %1774 = vmatmul.mubr.bf16.gmra.mrb[88].mxu1 %v1493_v58 }
 0x306   : > { %v1498_v25 = vpack.c.bf16 %v1452_v21, %v1451_v20  ;;  %1783 = vmatprep.mubr.bf16.mxu1 %v3141_v0 }
 0x307   : > { %v1497_v18 = vpack.c.bf16 %v1450_v24, %v1449_v22 }
 0x30d   : > { %1784 = vmatmul.mubr.bf16.gmra.mrb[92].mxu1 %v1494_v57 }
 0x30e   : > { %1793 = vmatprep.mubr.bf16.mxu1 %v3141_v0 }
 0x30f   : > { %v2637_v26 = vpop.f32.mrb[12].mxu1 }
 0x310   : > { %v1315_v27 = vadd.f32 %v2637_v26, %v3614_v23  ;;  %v1306_v28 = vpop.f32.mrb[13].mxu1 }
 0x311   : > { %v1307_v1 = vadd.f32 %v3614_v23, %v1306_v28  ;;  %v2638_v29 = vpop.f32.mrb[14].mxu1 }
 0x312   : > { %v1318_v30 = vadd.f32 %v2638_v29, %v3614_v23  ;;  %v1309_v31 = vpop.f32.mrb[15].mxu1  ;;  %v1455_v33 = vmax.f32 %v1315_v27, 0.0 }
 0x313   : > { %v1310_v32 = vadd.f32 %v3614_v23, %v1309_v31  ;;  %v1453_v35 = vmax.f32 %v1307_v1, 0.0 }
 0x314   : > { %v1456_v34 = vmax.f32 %v1318_v30, 0.0 }
 0x315   : > { %v1454_v36 = vmax.f32 %v1310_v32, 0.0  ;;  %1794 = vmatmul.mubr.bf16.gmra.mrb[96].mxu1 %v1495_v10 }
 0x316   : > { %v1500_v37 = vpack.c.bf16 %v1456_v34, %v1455_v33  ;;  %1803 = vmatprep.mubr.bf16.mxu1 %v3141_v0 }
 0x317   : > { %v1499_v38 = vpack.c.bf16 %v1454_v36, %v1453_v35 }
 0x31d   : > { %1804 = vmatmul.mubr.bf16.gmra.mrb[100].mxu1 %v1496_v9 }
 0x31e   : > { %1813 = vmatprep.mubr.bf16.mxu1 %v3141_v0 }
 0x31f   : > { %v2641_v39 = vpop.f32.mrb[16].mxu1 }
 0x320   : > { %v1331_v40 = vadd.f32 %v2641_v39, %v3614_v23  ;;  %v1322_v41 = vpop.f32.mrb[17].mxu1 }
 0x321   : > { %v1323_v42 = vadd.f32 %v3614_v23, %v1322_v41  ;;  %v2642_v43 = vpop.f32.mrb[18].mxu1 }
 0x322   : > { %v1334_v44 = vadd.f32 %v2642_v43, %v3614_v23  ;;  %v1325_v45 = vpop.f32.mrb[19].mxu1  ;;  %v1459_v47 = vmax.f32 %v1331_v40, 0.0 }
 0x323   : > { %v1326_v46 = vadd.f32 %v3614_v23, %v1325_v45  ;;  %v1457_v49 = vmax.f32 %v1323_v42, 0.0 }
 0x324   : > { %v1460_v48 = vmax.f32 %v1334_v44, 0.0 }
 0x325   : > { %v1458_v50 = vmax.f32 %v1326_v46, 0.0  ;;  %1814 = vmatmul.mubr.bf16.gmra.mrb[104].mxu1 %v1497_v18 }
 0x326   : > { %v1502_v51 = vpack.c.bf16 %v1460_v48, %v1459_v47  ;;  %1823 = vmatprep.mubr.bf16.mxu1 %v3141_v0  ;;  %v1531_v47 = vlaneseq }
 0x327   : > { %v1501_v52 = vpack.c.bf16 %v1458_v50, %v1457_v49 }
 0x328   : > { %v1532_v48 = vshrl.u32 %v1531_v47, 7 }
 0x32d   : > { %1824 = vmatmul.mubr.bf16.gmra.mrb[108].mxu1 %v1498_v25 }
 0x32e   : > { %1833 = vmatprep.mubr.bf16.mxu1 %v3141_v0 }
 0x32f   : > { %v2645_v53 = vpop.f32.mrb[20].mxu1 }
 0x330   : > { %v1347_v54 = vadd.f32 %v2645_v53, %v3614_v23  ;;  %v1338_v55 = vpop.f32.mrb[21].mxu1 }
 0x331   : > { %v1339_v56 = vadd.f32 %v3614_v23, %v1338_v55  ;;  %v2646_v57 = vpop.f32.mrb[22].mxu1 }
 0x332   : > { %v1350_v58 = vadd.f32 %v2646_v57, %v3614_v23  ;;  %v1341_v59 = vpop.f32.mrb[23].mxu1  ;;  %v1463_v61 = vmax.f32 %v1347_v54, 0.0  ;;  %v1533_v54 = vsub.s32 0, %v1532_v48  ;;  %v1529_v57 = vld [vmem:[%s4176_s6] sm:$0x3] }
 0x333   : > { %v1342_v60 = vadd.f32 %v3614_v23, %v1341_v59  ;;  %v1461_v63 = vmax.f32 %v1339_v56, 0.0 }
 0x334   : > { %v1464_v62 = vmax.f32 %v1350_v58, 0.0  ;;  %v1537_v58 = vsub.s32 1, %v1532_v48 }
 0x335   : > { %v1462_v2 = vmax.f32 %v1342_v60, 0.0  ;;  %1834 = vmatmul.mubr.bf16.gmra.mrb[112].mxu1 %v1499_v38 }
 0x336   : > { %v1504_v3 = vpack.c.bf16 %v1464_v62, %v1463_v61  ;;  %1843 = vmatprep.mubr.bf16.mxu1 %v3141_v0 }
 0x337   : > { %v1503_v4 = vpack.c.bf16 %v1462_v2, %v1461_v63  ;;  %v3714_v2 = vrot.slane %v1529_v57, %v1533_v54 }
 0x33d   : > { %1844 = vmatmul.mubr.bf16.gmra.mrb[116].mxu1 %v1500_v37 }
 0x33e   : > { %1853 = vmatprep.mubr.bf16.mxu1 %v3141_v0 }
 0x33f   : > { %v2649_v5 = vpop.f32.mrb[24].mxu1 }
 0x340   : > { %v1363_v6 = vadd.f32 %v2649_v5, %v3614_v23  ;;  %v1354_v7 = vpop.f32.mrb[25].mxu1 }
 0x341   : > { %v1355_v8 = vadd.f32 %v3614_v23, %v1354_v7  ;;  %v2650_v9 = vpop.f32.mrb[26].mxu1 }
 0x342   : > { %v1366_v10 = vadd.f32 %v2650_v9, %v3614_v23  ;;  %v1357_v11 = vpop.f32.mrb[27].mxu1  ;;  %v1467_v13 = vmax.f32 %v1363_v6, 0.0 }
 0x343   : > { %v1358_v12 = vadd.f32 %v3614_v23, %v1357_v11  ;;  %v1465_v15 = vmax.f32 %v1355_v8, 0.0 }
 0x344   : > { %v1468_v14 = vmax.f32 %v1366_v10, 0.0 }
 0x345   : > { %v1466_v16 = vmax.f32 %v1358_v12, 0.0  ;;  %1854 = vmatmul.mubr.bf16.gmra.mrb[120].mxu1 %v1501_v52 }
 0x346   : > { %v1506_v17 = vpack.c.bf16 %v1468_v14, %v1467_v13  ;;  %1863 = vmatprep.mubr.bf16.mxu1 %v3141_v0 }
 0x347   : > { %v1505_v19 = vpack.c.bf16 %v1466_v16, %v1465_v15  ;;  %v2813_v15 = vld [vmem:[%s3384_s12] sm:$0xff] }
 0x34d   : > { %1864 = vmatmul.mubr.bf16.gmra.mrb[124].mxu1 %v1502_v51 }
 0x34e   : > { %1873 = vmatprep.mubr.bf16.mxu1 %v3141_v0 }
 0x34f   : > { %v2653_v20 = vpop.f32.mrb[28].mxu1 }
 0x350   : > { %v1379_v21 = vadd.f32 %v2653_v20, %v3614_v23  ;;  %v1370_v22 = vpop.f32.mrb[29].mxu1 }
 0x351   : > { %v1371_v24 = vadd.f32 %v3614_v23, %v1370_v22  ;;  %v2654_v25 = vpop.f32.mrb[30].mxu1  ;;  %v2815_v22 = vld [vmem:[%s3384_s12 + $0x10] sm:$0xff] }
 0x352   : > { %v1382_v18 = vadd.f32 %v2654_v25, %v3614_v23  ;;  %v1373_v26 = vpop.f32.mrb[31].mxu1  ;;  %v1471_v28 = vmax.f32 %v1379_v21, 0.0  ;;  %v2816_v25 = vld [vmem:[%s3384_s12 + $0x18] sm:$0xff] }
 0x353   : > { %v1374_v27 = vadd.f32 %v3614_v23, %v1373_v26  ;;  %v1469_v29 = vmax.f32 %v1371_v24, 0.0 }
 0x354   : > { %v1472_v1 = vmax.f32 %v1382_v18, 0.0 }
 0x355   : > { %v1470_v30 = vmax.f32 %v1374_v27, 0.0  ;;  %1874 = vmatmul.mubr.bf16.gmra.mrb[128].mxu1 %v1503_v4  ;;  %v3718_v4 = vrot.slane %v1529_v57, %v1537_v58 }
 0x356   : > { %v1508_v31 = vpack.c.bf16 %v1472_v1, %v1471_v28  ;;  %1883 = vmatprep.mubr.bf16.mxu1 %v3141_v0 }
 0x357   : > { %v1507_v32 = vpack.c.bf16 %v1470_v30, %v1469_v29 }
 0x35d   : > { %1884 = vmatmul.mubr.bf16.gmra.mrb[132].mxu1 %v1504_v3 }
 0x35e   : > { %1893 = vmatprep.mubr.bf16.mxu1 %v3141_v0 }
 0x35f   : > { %v2657_v33 = vpop.f32.mrb[32].mxu1 }
 0x360   : > { %v1395_v34 = vadd.f32 %v2657_v33, %v3614_v23  ;;  %v1386_v35 = vpop.f32.mrb[33].mxu1 }
 0x361   : > { %v1387_v36 = vadd.f32 %v3614_v23, %v1386_v35  ;;  %v2658_v37 = vpop.f32.mrb[34].mxu1  ;;  %v2817_v35 = vld [vmem:[%s3384_s12 + $0x20] sm:$0xff] }
 0x362   : > { %v1398_v38 = vadd.f32 %v2658_v37, %v3614_v23  ;;  %v1389_v39 = vpop.f32.mrb[35].mxu1  ;;  %v1475_v41 = vmax.f32 %v1395_v34, 0.0 }
 0x363   : > { %v1390_v40 = vadd.f32 %v3614_v23, %v1389_v39  ;;  %v1473_v43 = vmax.f32 %v1387_v36, 0.0 }
 0x364   : > { %v1476_v42 = vmax.f32 %v1398_v38, 0.0  ;;  %v2818_v38 = vld [vmem:[%s3384_s12 + $0x28] sm:$0xff] }
 0x365   : > { %v1474_v44 = vmax.f32 %v1390_v40, 0.0  ;;  %1894 = vmatmul.mubr.bf16.gmra.mrb[136].mxu1 %v1505_v19  ;;  %v2814_v19 = vld [vmem:[%s3384_s12 + $0x8] sm:$0xff] }
 0x366   : > { %v3701_v45 = vpack.c.bf16 %v1476_v42, %v1475_v41  ;;  %1903 = vmatprep.mubr.bf16.mxu1 %v3141_v0  ;;  %v2819_v41 = vld [vmem:[%s3384_s12 + $0x30] sm:$0xff] }
 0x367   : > { %v3704_v46 = vpack.c.bf16 %v1474_v44, %v1473_v43  ;;  %v2820_v43 = vld [vmem:[%s3384_s12 + $0x38] sm:$0xff] }
 0x36d   : > { %1904 = vmatmul.mubr.bf16.gmra.mrb[140].mxu1 %v1506_v17 }
 0x36e   : > { %1913 = vmatprep.mubr.bf16.mxu1 %v3141_v0 }
 0x36f   : > { %v2661_v49 = vpop.f32.mrb[36].mxu1 }
 0x370   : > { %v1411_v50 = vadd.f32 %v2661_v49, %v3614_v23  ;;  %v1402_v51 = vpop.f32.mrb[37].mxu1 }
 0x371   : > { %v1403_v52 = vadd.f32 %v3614_v23, %v1402_v51  ;;  %v2662_v53 = vpop.f32.mrb[38].mxu1 }
 0x372   : > { %v1414_v55 = vadd.f32 %v2662_v53, %v3614_v23  ;;  %v1405_v56 = vpop.f32.mrb[39].mxu1  ;;  %v1479_v60 = vmax.f32 %v1411_v50, 0.0 }
 0x373   : > { %v1406_v59 = vadd.f32 %v3614_v23, %v1405_v56  ;;  %v1477_v62 = vmax.f32 %v1403_v52, 0.0  ;;  %v2821_v56 = vld [vmem:[%s3384_s12 + $0x40] sm:$0xff] }
 0x374   : > { %v1480_v61 = vmax.f32 %v1414_v55, 0.0 }
 0x375   : > { %v1478_v63 = vmax.f32 %v1406_v59, 0.0  ;;  %1914 = vmatmul.mubr.bf16.gmra.mrb[144].mxu1 %v1507_v32  ;;  %v2822_v59 = vld [vmem:[%s3384_s12 + $0x48] sm:$0xff] }
 0x376   : > { %v3716_v3 = vpack.c.bf16 %v1480_v61, %v1479_v60  ;;  %1923 = vmatprep.mubr.bf16.mxu1 %v3141_v0 }
 0x377   : > { %v3721_v5 = vpack.c.bf16 %v1478_v63, %v1477_v62  ;;  %v2823_v62 = vld [vmem:[%s3384_s12 + $0x50] sm:$0xff] }
 0x378   : > { %v1655_v6 = vpop.f32.mrb[40].mxu1 }
 0x379   : > { %v1656_v23 = vadd.f32 %v1655_v6, %v3714_v2  ;;  %v1657_v7 = vpop.f32.mrb[41].mxu1  ;;  %v2824_v6 = vld [vmem:[%s3384_s12 + $0x58] sm:$0xff] }
 0x37a   : > { %v1658_v8 = vadd.f32 %v1657_v7, %v3718_v4  ;;  %v1659_v9 = vpop.f32.mrb[42].mxu1 }
 0x37b   : > { %v1974_v10 = vmax.f32 %v1656_v23, 0.0  ;;  %v1660_v11 = vadd.f32 %v1659_v9, %v3714_v2  ;;  %v1661_v12 = vpop.f32.mrb[43].mxu1 }
 0x37c   : > { %v1975_v13 = vmax.f32 %v1658_v8, 0.0  ;;  %v1662_v14 = vadd.f32 %v1661_v12, %v3718_v4 }
 0x37d   : > { %v2102_v16 = vadd.f32 %v2813_v15, %v1974_v10  ;;  %v1976_v17 = vmax.f32 %v1660_v11, 0.0  ;;  %1924 = vmatmul.mubr.bf16.gmra.mrb[148].mxu1 %v1508_v31 }
 0x37e   : > { %v2103_v20 = vadd.f32 %v2814_v19, %v1975_v13  ;;  %v1977_v21 = vmax.f32 %v1662_v14, 0.0  ;;  %1933 = vmatprep.mubr.bf16.mxu1 %v3141_v0 }
 0x37f   : > { %2230 = vst [vmem:[%s3732_s29] sm:$0xff] %v2102_v16  ;;  %v2104_v24 = vadd.f32 %v2815_v22, %v1976_v17  ;;  %v2825_v16 = vld [vmem:[%s3384_s12 + $0x60] sm:$0xff] }
 0x380   : > { %2231 = vst [vmem:[%s3732_s29 + $0x8] sm:$0xff] %v2103_v20  ;;  %v2105_v18 = vadd.f32 %v2816_v25, %v1977_v21  ;;  %v1665_v26 = vpop.f32.mrb[44].mxu1  ;;  %v2826_v20 = vld [vmem:[%s3384_s12 + $0x68] sm:$0xff] }
 0x381   : > { %2232 = vst [vmem:[%s3732_s29 + $0x10] sm:$0xff] %v2104_v24  ;;  %v1666_v27 = vadd.f32 %v1665_v26, %v3714_v2  ;;  %v1667_v28 = vpop.f32.mrb[45].mxu1  ;;  %v2827_v24 = vld [vmem:[%s3384_s12 + $0x70] sm:$0xff] }
 0x382   : > { %2233 = vst [vmem:[%s3732_s29 + $0x18] sm:$0xff] %v2105_v18  ;;  %v1668_v1 = vadd.f32 %v1667_v28, %v3718_v4  ;;  %v1669_v29 = vpop.f32.mrb[46].mxu1  ;;  %v2828_v18 = vld [vmem:[%s3384_s12 + $0x78] sm:$0xff] }
 0x383   : > { %v1978_v30 = vmax.f32 %v1666_v27, 0.0  ;;  %v1670_v31 = vadd.f32 %v1669_v29, %v3714_v2  ;;  %v1671_v32 = vpop.f32.mrb[47].mxu1 }
 0x384   : > { %v1979_v33 = vmax.f32 %v1668_v1, 0.0  ;;  %v1672_v34 = vadd.f32 %v1671_v32, %v3718_v4 }
 0x385   : > { %v2106_v36 = vadd.f32 %v2817_v35, %v1978_v30  ;;  %v1980_v37 = vmax.f32 %v1670_v31, 0.0  ;;  %1934 = vmatmul.mubr.bf16.gmra.mrb[152].mxu1 %v3704_v46 }
 0x386   : > { %v2107_v39 = vadd.f32 %v2818_v38, %v1979_v33  ;;  %v1981_v40 = vmax.f32 %v1672_v34, 0.0  ;;  %1943 = vmatprep.mubr.bf16.mxu1 %v3141_v0  ;;  %v2829_v34 = vld [vmem:[%s3384_s12 + $0x80] sm:$0xff] }
 0x387   : > { %2234 = vst [vmem:[%s3732_s29 + $0x20] sm:$0xff] %v2106_v36  ;;  %v2108_v42 = vadd.f32 %v2819_v41, %v1980_v37  ;;  %v2830_v37 = vld [vmem:[%s3384_s12 + $0x88] sm:$0xff] }
 0x388   : > { %2235 = vst [vmem:[%s3732_s29 + $0x28] sm:$0xff] %v2107_v39  ;;  %v2109_v44 = vadd.f32 %v2820_v43, %v1981_v40  ;;  %v1675_v47 = vpop.f32.mrb[48].mxu1  ;;  %v2831_v40 = vld [vmem:[%s3384_s12 + $0x90] sm:$0xff] }
 0x389   : > { %2236 = vst [vmem:[%s3732_s29 + $0x30] sm:$0xff] %v2108_v42  ;;  %v1676_v48 = vadd.f32 %v1675_v47, %v3714_v2  ;;  %v1677_v49 = vpop.f32.mrb[49].mxu1  ;;  %v2832_v42 = vld [vmem:[%s3384_s12 + $0x98] sm:$0xff] }
 0x38a   : > { %2237 = vst [vmem:[%s3732_s29 + $0x38] sm:$0xff] %v2109_v44  ;;  %v1678_v46 = vadd.f32 %v1677_v49, %v3718_v4  ;;  %v1679_v50 = vpop.f32.mrb[50].mxu1 }
 0x38b   : > { %v1982_v51 = vmax.f32 %v1676_v48, 0.0  ;;  %v1680_v52 = vadd.f32 %v1679_v50, %v3714_v2  ;;  %v1681_v53 = vpop.f32.mrb[51].mxu1 }
 0x38c   : > { %v1983_v54 = vmax.f32 %v1678_v46, 0.0  ;;  %v1682_v55 = vadd.f32 %v1681_v53, %v3718_v4 }
 0x38d   : > { %v2110_v57 = vadd.f32 %v2821_v56, %v1982_v51  ;;  %v1984_v58 = vmax.f32 %v1680_v52, 0.0  ;;  %1944 = vmatmul.mubr.bf16.gmra.mrb[156].mxu1 %v3701_v45 }
 0x38e   : > { %v2111_v60 = vadd.f32 %v2822_v59, %v1983_v54  ;;  %v1985_v61 = vmax.f32 %v1682_v55, 0.0  ;;  %1953 = vmatprep.mubr.bf16.mxu1 %v3141_v0  ;;  %v2833_v54 = vld [vmem:[%s3384_s12 + $0xa0] sm:$0xff] }
 0x38f   : > { %2238 = vst [vmem:[%s3732_s29 + $0x40] sm:$0xff] %v2110_v57  ;;  %v2112_v63 = vadd.f32 %v2823_v62, %v1984_v58  ;;  %v2834_v57 = vld [vmem:[%s3384_s12 + $0xa8] sm:$0xff]  ;;  %v2836_v62 = vld [vmem:[%s3384_s12 + $0xb8] sm:$0xff] }
 0x390   : > { %2239 = vst [vmem:[%s3732_s29 + $0x48] sm:$0xff] %v2111_v60  ;;  %v2113_v23 = vadd.f32 %v2824_v6, %v1985_v61  ;;  %v1685_v7 = vpop.f32.mrb[52].mxu1  ;;  %v2835_v60 = vld [vmem:[%s3384_s12 + $0xb0] sm:$0xff] }
 0x391   : > { %2240 = vst [vmem:[%s3732_s29 + $0x50] sm:$0xff] %v2112_v63  ;;  %v1686_v8 = vadd.f32 %v1685_v7, %v3714_v2  ;;  %v1687_v9 = vpop.f32.mrb[53].mxu1 }
 0x392   : > { %2241 = vst [vmem:[%s3732_s29 + $0x58] sm:$0xff] %v2113_v23  ;;  %v1688_v45 = vadd.f32 %v1687_v9, %v3718_v4  ;;  %v1689_v10 = vpop.f32.mrb[54].mxu1 }
 0x393   : > { %v1986_v11 = vmax.f32 %v1686_v8, 0.0  ;;  %v1690_v12 = vadd.f32 %v1689_v10, %v3714_v2  ;;  %v1691_v13 = vpop.f32.mrb[55].mxu1 }
 0x394   : > { %v1987_v14 = vmax.f32 %v1688_v45, 0.0  ;;  %v1692_v15 = vadd.f32 %v1691_v13, %v3718_v4 }
 0x395   : > { %v2114_v17 = vadd.f32 %v2825_v16, %v1986_v11  ;;  %v1988_v19 = vmax.f32 %v1690_v12, 0.0  ;;  %1954 = vmatmul.mubr.bf16.gmra.mrb[160].mxu1 %v3721_v5 }
 0x396   : > { %v2115_v21 = vadd.f32 %v2826_v20, %v1987_v14  ;;  %v1989_v22 = vmax.f32 %v1692_v15, 0.0  ;;  %1963 = vmatprep.mubr.bf16.mxu1 %v3141_v0  ;;  %v2837_v14 = vld [vmem:[%s3384_s12 + $0xc0] sm:$0xff] }
 0x397   : > { %2242 = vst [vmem:[%s3732_s29 + $0x60] sm:$0xff] %v2114_v17  ;;  %v2116_v25 = vadd.f32 %v2827_v24, %v1988_v19  ;;  %v2838_v17 = vld [vmem:[%s3384_s12 + $0xc8] sm:$0xff]  ;;  %v2840_v24 = vld [vmem:[%s3384_s12 + $0xd8] sm:$0xff] }
 0x398   : > { %2243 = vst [vmem:[%s3732_s29 + $0x68] sm:$0xff] %v2115_v21  ;;  %v2117_v26 = vadd.f32 %v2828_v18, %v1989_v22  ;;  %v1695_v27 = vpop.f32.mrb[56].mxu1  ;;  %v2839_v21 = vld [vmem:[%s3384_s12 + $0xd0] sm:$0xff] }
 0x399   : > { %2244 = vst [vmem:[%s3732_s29 + $0x70] sm:$0xff] %v2116_v25  ;;  %v1696_v28 = vadd.f32 %v1695_v27, %v3714_v2  ;;  %v1697_v1 = vpop.f32.mrb[57].mxu1 }
 0x39a   : > { %2245 = vst [vmem:[%s3732_s29 + $0x78] sm:$0xff] %v2117_v26  ;;  %v1698_v5 = vadd.f32 %v1697_v1, %v3718_v4  ;;  %v1699_v29 = vpop.f32.mrb[58].mxu1 }
 0x39b   : > { %v1990_v0 = vmax.f32 %v1696_v28, 0.0  ;;  %v1700_v30 = vadd.f32 %v1699_v29, %v3714_v2  ;;  %v1701_v31 = vpop.f32.mrb[59].mxu1 }
 0x39c   : > { %v1991_v32 = vmax.f32 %v1698_v5, 0.0  ;;  %v1702_v33 = vadd.f32 %v1701_v31, %v3718_v4 }
 0x39d   : > { %v2118_v35 = vadd.f32 %v2829_v34, %v1990_v0  ;;  %v1992_v36 = vmax.f32 %v1700_v30, 0.0  ;;  %1964 = vmatmul.mubr.bf16.gmra.mrb[164].mxu1 %v3716_v3 }
 0x39e   : > { %v2119_v38 = vadd.f32 %v2830_v37, %v1991_v32  ;;  %v1993_v39 = vmax.f32 %v1702_v33, 0.0  ;;  %v2841_v32 = vld [vmem:[%s3384_s12 + $0xe0] sm:$0xff] }
 0x39f   : > { %2246 = vst [vmem:[%s3732_s29 + $0x80] sm:$0xff] %v2118_v35  ;;  %v2120_v41 = vadd.f32 %v2831_v40, %v1992_v36  ;;  %v2842_v35 = vld [vmem:[%s3384_s12 + $0xe8] sm:$0xff]  ;;  %v2844_v40 = vld [vmem:[%s3384_s12 + $0xf8] sm:$0xff] }
 0x3a0   : > { %2247 = vst [vmem:[%s3732_s29 + $0x88] sm:$0xff] %v2119_v38  ;;  %v2121_v43 = vadd.f32 %v2832_v42, %v1993_v39  ;;  %v1705_v44 = vpop.f32.mrb[60].mxu1  ;;  %v2843_v38 = vld [vmem:[%s3384_s12 + $0xf0] sm:$0xff] }
 0x3a1   : > { %2248 = vst [vmem:[%s3732_s29 + $0x90] sm:$0xff] %v2120_v41  ;;  %v1706_v47 = vadd.f32 %v1705_v44, %v3714_v2  ;;  %v1707_v48 = vpop.f32.mrb[61].mxu1 }
 0x3a2   : > { %2249 = vst [vmem:[%s3732_s29 + $0x98] sm:$0xff] %v2121_v43  ;;  %v1708_v3 = vadd.f32 %v1707_v48, %v3718_v4  ;;  %v1709_v49 = vpop.f32.mrb[62].mxu1 }
 0x3a3   : > { %v1994_v46 = vmax.f32 %v1706_v47, 0.0  ;;  %v1710_v50 = vadd.f32 %v1709_v49, %v3714_v2  ;;  %v1711_v51 = vpop.f32.mrb[63].mxu1 }
 0x3a4   : > { %v1995_v52 = vmax.f32 %v1708_v3, 0.0  ;;  %v1712_v53 = vadd.f32 %v1711_v51, %v3718_v4 }
 0x3a5   : > { %v2122_v55 = vadd.f32 %v2833_v54, %v1994_v46  ;;  %v1996_v56 = vmax.f32 %v1710_v50, 0.0 }
 0x3a6   : > { %v2123_v58 = vadd.f32 %v2834_v57, %v1995_v52  ;;  %v1997_v59 = vmax.f32 %v1712_v53, 0.0  ;;  %v2845_v52 = vld [vmem:[%s3384_s12 + $0x100] sm:$0xff] }
 0x3a7   : > { %2250 = vst [vmem:[%s3732_s29 + $0xa0] sm:$0xff] %v2122_v55  ;;  %v2124_v61 = vadd.f32 %v2835_v60, %v1996_v56  ;;  %v2846_v55 = vld [vmem:[%s3384_s12 + $0x108] sm:$0xff]  ;;  %v2848_v60 = vld [vmem:[%s3384_s12 + $0x118] sm:$0xff] }
 0x3a8   : > { %2251 = vst [vmem:[%s3732_s29 + $0xa8] sm:$0xff] %v2123_v58  ;;  %v2125_v63 = vadd.f32 %v2836_v62, %v1997_v59  ;;  %v1715_v6 = vpop.f32.mrb[64].mxu1  ;;  %v2847_v58 = vld [vmem:[%s3384_s12 + $0x110] sm:$0xff] }
 0x3a9   : > { %2252 = vst [vmem:[%s3732_s29 + $0xb0] sm:$0xff] %v2124_v61  ;;  %v1716_v23 = vadd.f32 %v1715_v6, %v3714_v2  ;;  %v1717_v7 = vpop.f32.mrb[65].mxu1 }
 0x3aa   : > { %2253 = vst [vmem:[%s3732_s29 + $0xb8] sm:$0xff] %v2125_v63  ;;  %v1718_v8 = vadd.f32 %v1717_v7, %v3718_v4  ;;  %v1719_v9 = vpop.f32.mrb[66].mxu1 }
 0x3ab   : > { %v1998_v45 = vmax.f32 %v1716_v23, 0.0  ;;  %v1720_v10 = vadd.f32 %v1719_v9, %v3714_v2  ;;  %v1721_v11 = vpop.f32.mrb[67].mxu1 }
 0x3ac   : > { %v1999_v12 = vmax.f32 %v1718_v8, 0.0  ;;  %v1722_v13 = vadd.f32 %v1721_v11, %v3718_v4 }
 0x3ad   : > { %v2126_v15 = vadd.f32 %v2837_v14, %v1998_v45  ;;  %v2000_v16 = vmax.f32 %v1720_v10, 0.0 }
 0x3ae   : > { %v2127_v19 = vadd.f32 %v2838_v17, %v1999_v12  ;;  %v2001_v20 = vmax.f32 %v1722_v13, 0.0  ;;  %v2849_v12 = vld [vmem:[%s3384_s12 + $0x120] sm:$0xff] }
 0x3af   : > { %2254 = vst [vmem:[%s3732_s29 + $0xc0] sm:$0xff] %v2126_v15  ;;  %v2128_v22 = vadd.f32 %v2839_v21, %v2000_v16  ;;  %v2850_v15 = vld [vmem:[%s3384_s12 + $0x128] sm:$0xff]  ;;  %v2852_v21 = vld [vmem:[%s3384_s12 + $0x138] sm:$0xff] }
 0x3b0   : > { %2255 = vst [vmem:[%s3732_s29 + $0xc8] sm:$0xff] %v2127_v19  ;;  %v2129_v25 = vadd.f32 %v2840_v24, %v2001_v20  ;;  %v1725_v18 = vpop.f32.mrb[68].mxu1  ;;  %v2851_v19 = vld [vmem:[%s3384_s12 + $0x130] sm:$0xff] }
 0x3b1   : > { %2256 = vst [vmem:[%s3732_s29 + $0xd0] sm:$0xff] %v2128_v22  ;;  %v1726_v26 = vadd.f32 %v1725_v18, %v3714_v2  ;;  %v1727_v27 = vpop.f32.mrb[69].mxu1 }
 0x3b2   : > { %2257 = vst [vmem:[%s3732_s29 + $0xd8] sm:$0xff] %v2129_v25  ;;  %v1728_v28 = vadd.f32 %v1727_v27, %v3718_v4  ;;  %v1729_v1 = vpop.f32.mrb[70].mxu1 }
 0x3b3   : > { %v2002_v5 = vmax.f32 %v1726_v26, 0.0  ;;  %v1730_v29 = vadd.f32 %v1729_v1, %v3714_v2  ;;  %v1731_v0 = vpop.f32.mrb[71].mxu1 }
 0x3b4   : > { %v2003_v30 = vmax.f32 %v1728_v28, 0.0  ;;  %v1732_v31 = vadd.f32 %v1731_v0, %v3718_v4 }
 0x3b5   : > { %v2130_v33 = vadd.f32 %v2841_v32, %v2002_v5  ;;  %v2004_v34 = vmax.f32 %v1730_v29, 0.0 }
 0x3b6   : > { %v2131_v36 = vadd.f32 %v2842_v35, %v2003_v30  ;;  %v2005_v37 = vmax.f32 %v1732_v31, 0.0  ;;  %v2853_v30 = vld [vmem:[%s3384_s12 + $0x140] sm:$0xff] }
 0x3b7   : > { %2258 = vst [vmem:[%s3732_s29 + $0xe0] sm:$0xff] %v2130_v33  ;;  %v2132_v39 = vadd.f32 %v2843_v38, %v2004_v34  ;;  %v2854_v33 = vld [vmem:[%s3384_s12 + $0x148] sm:$0xff]  ;;  %v2856_v38 = vld [vmem:[%s3384_s12 + $0x158] sm:$0xff] }
 0x3b8   : > { %2259 = vst [vmem:[%s3732_s29 + $0xe8] sm:$0xff] %v2131_v36  ;;  %v2133_v41 = vadd.f32 %v2844_v40, %v2005_v37  ;;  %v1735_v42 = vpop.f32.mrb[72].mxu1  ;;  %v2855_v36 = vld [vmem:[%s3384_s12 + $0x150] sm:$0xff] }
 0x3b9   : > { %2260 = vst [vmem:[%s3732_s29 + $0xf0] sm:$0xff] %v2132_v39  ;;  %v1736_v43 = vadd.f32 %v1735_v42, %v3714_v2  ;;  %v1737_v44 = vpop.f32.mrb[73].mxu1 }
 0x3ba   : > { %2261 = vst [vmem:[%s3732_s29 + $0xf8] sm:$0xff] %v2133_v41  ;;  %v1738_v47 = vadd.f32 %v1737_v44, %v3718_v4  ;;  %v1739_v48 = vpop.f32.mrb[74].mxu1 }
 0x3bb   : > { %v2006_v3 = vmax.f32 %v1736_v43, 0.0  ;;  %v1740_v49 = vadd.f32 %v1739_v48, %v3714_v2  ;;  %v1741_v46 = vpop.f32.mrb[75].mxu1 }
 0x3bc   : > { %v2007_v50 = vmax.f32 %v1738_v47, 0.0  ;;  %v1742_v51 = vadd.f32 %v1741_v46, %v3718_v4 }
 0x3bd   : > { %v2134_v53 = vadd.f32 %v2845_v52, %v2006_v3  ;;  %v2008_v54 = vmax.f32 %v1740_v49, 0.0 }
 0x3be   : > { %v2135_v56 = vadd.f32 %v2846_v55, %v2007_v50  ;;  %v2009_v57 = vmax.f32 %v1742_v51, 0.0  ;;  %v2857_v50 = vld [vmem:[%s3384_s12 + $0x160] sm:$0xff] }
 0x3bf   : > { %2262 = vst [vmem:[%s3732_s29 + $0x100] sm:$0xff] %v2134_v53  ;;  %v2136_v59 = vadd.f32 %v2847_v58, %v2008_v54  ;;  %v2858_v53 = vld [vmem:[%s3384_s12 + $0x168] sm:$0xff]  ;;  %v2860_v58 = vld [vmem:[%s3384_s12 + $0x178] sm:$0xff] }
 0x3c0   : > { %2263 = vst [vmem:[%s3732_s29 + $0x108] sm:$0xff] %v2135_v56  ;;  %v2137_v61 = vadd.f32 %v2848_v60, %v2009_v57  ;;  %v1745_v62 = vpop.f32.mrb[76].mxu1  ;;  %v2859_v56 = vld [vmem:[%s3384_s12 + $0x170] sm:$0xff] }
 0x3c1   : > { %2264 = vst [vmem:[%s3732_s29 + $0x110] sm:$0xff] %v2136_v59  ;;  %v1746_v63 = vadd.f32 %v1745_v62, %v3714_v2  ;;  %v1747_v6 = vpop.f32.mrb[77].mxu1 }
 0x3c2   : > { %2265 = vst [vmem:[%s3732_s29 + $0x118] sm:$0xff] %v2137_v61  ;;  %v1748_v23 = vadd.f32 %v1747_v6, %v3718_v4  ;;  %v1749_v7 = vpop.f32.mrb[78].mxu1 }
 0x3c3   : > { %v2010_v8 = vmax.f32 %v1746_v63, 0.0  ;;  %v1750_v9 = vadd.f32 %v1749_v7, %v3714_v2  ;;  %v1751_v45 = vpop.f32.mrb[79].mxu1 }
 0x3c4   : > { %v2011_v10 = vmax.f32 %v1748_v23, 0.0  ;;  %v1752_v11 = vadd.f32 %v1751_v45, %v3718_v4 }
 0x3c5   : > { %v2138_v13 = vadd.f32 %v2849_v12, %v2010_v8  ;;  %v2012_v14 = vmax.f32 %v1750_v9, 0.0 }
 0x3c6   : > { %v2139_v16 = vadd.f32 %v2850_v15, %v2011_v10  ;;  %v2013_v17 = vmax.f32 %v1752_v11, 0.0  ;;  %v2861_v10 = vld [vmem:[%s3384_s12 + $0x180] sm:$0xff] }
 0x3c7   : > { %2266 = vst [vmem:[%s3732_s29 + $0x120] sm:$0xff] %v2138_v13  ;;  %v2140_v20 = vadd.f32 %v2851_v19, %v2012_v14  ;;  %v2862_v13 = vld [vmem:[%s3384_s12 + $0x188] sm:$0xff]  ;;  %v2864_v19 = vld [vmem:[%s3384_s12 + $0x198] sm:$0xff] }
 0x3c8   : > { %2267 = vst [vmem:[%s3732_s29 + $0x128] sm:$0xff] %v2139_v16  ;;  %v2141_v22 = vadd.f32 %v2852_v21, %v2013_v17  ;;  %v1755_v24 = vpop.f32.mrb[80].mxu1  ;;  %v2863_v16 = vld [vmem:[%s3384_s12 + $0x190] sm:$0xff] }
 0x3c9   : > { %2268 = vst [vmem:[%s3732_s29 + $0x130] sm:$0xff] %v2140_v20  ;;  %v1756_v25 = vadd.f32 %v1755_v24, %v3714_v2  ;;  %v1757_v18 = vpop.f32.mrb[81].mxu1 }
 0x3ca   : > { %2269 = vst [vmem:[%s3732_s29 + $0x138] sm:$0xff] %v2141_v22  ;;  %v1758_v26 = vadd.f32 %v1757_v18, %v3718_v4  ;;  %v1759_v27 = vpop.f32.mrb[82].mxu1 }
 0x3cb   : > { %v2014_v28 = vmax.f32 %v1756_v25, 0.0  ;;  %v1760_v1 = vadd.f32 %v1759_v27, %v3714_v2  ;;  %v1761_v5 = vpop.f32.mrb[83].mxu1 }
 0x3cc   : > { %v2015_v29 = vmax.f32 %v1758_v26, 0.0  ;;  %v1762_v0 = vadd.f32 %v1761_v5, %v3718_v4 }
 0x3cd   : > { %v2142_v31 = vadd.f32 %v2853_v30, %v2014_v28  ;;  %v2016_v32 = vmax.f32 %v1760_v1, 0.0 }
 0x3ce   : > { %v2143_v34 = vadd.f32 %v2854_v33, %v2015_v29  ;;  %v2017_v35 = vmax.f32 %v1762_v0, 0.0  ;;  %v2865_v29 = vld [vmem:[%s3384_s12 + $0x1a0] sm:$0xff] }
 0x3cf   : > { %2270 = vst [vmem:[%s3732_s29 + $0x140] sm:$0xff] %v2142_v31  ;;  %v2144_v37 = vadd.f32 %v2855_v36, %v2016_v32  ;;  %v2866_v31 = vld [vmem:[%s3384_s12 + $0x1a8] sm:$0xff]  ;;  %v2868_v36 = vld [vmem:[%s3384_s12 + $0x1b8] sm:$0xff] }
 0x3d0   : > { %2271 = vst [vmem:[%s3732_s29 + $0x148] sm:$0xff] %v2143_v34  ;;  %v2145_v39 = vadd.f32 %v2856_v38, %v2017_v35  ;;  %v1765_v40 = vpop.f32.mrb[84].mxu1  ;;  %v2867_v34 = vld [vmem:[%s3384_s12 + $0x1b0] sm:$0xff] }
 0x3d1   : > { %2272 = vst [vmem:[%s3732_s29 + $0x150] sm:$0xff] %v2144_v37  ;;  %v1766_v41 = vadd.f32 %v1765_v40, %v3714_v2  ;;  %v1767_v42 = vpop.f32.mrb[85].mxu1 }
 0x3d2   : > { %2273 = vst [vmem:[%s3732_s29 + $0x158] sm:$0xff] %v2145_v39  ;;  %v1768_v43 = vadd.f32 %v1767_v42, %v3718_v4  ;;  %v1769_v44 = vpop.f32.mrb[86].mxu1 }
 0x3d3   : > { %v2018_v47 = vmax.f32 %v1766_v41, 0.0  ;;  %v1770_v48 = vadd.f32 %v1769_v44, %v3714_v2  ;;  %v1771_v3 = vpop.f32.mrb[87].mxu1 }
 0x3d4   : > { %v2019_v49 = vmax.f32 %v1768_v43, 0.0  ;;  %v1772_v46 = vadd.f32 %v1771_v3, %v3718_v4 }
 0x3d5   : > { %v2146_v51 = vadd.f32 %v2857_v50, %v2018_v47  ;;  %v2020_v52 = vmax.f32 %v1770_v48, 0.0 }
 0x3d6   : > { %v2147_v54 = vadd.f32 %v2858_v53, %v2019_v49  ;;  %v2021_v55 = vmax.f32 %v1772_v46, 0.0  ;;  %v2869_v49 = vld [vmem:[%s3384_s12 + $0x1c0] sm:$0xff] }
 0x3d7   : > { %2274 = vst [vmem:[%s3732_s29 + $0x160] sm:$0xff] %v2146_v51  ;;  %v2148_v57 = vadd.f32 %v2859_v56, %v2020_v52  ;;  %v2870_v51 = vld [vmem:[%s3384_s12 + $0x1c8] sm:$0xff]  ;;  %v2872_v56 = vld [vmem:[%s3384_s12 + $0x1d8] sm:$0xff] }
 0x3d8   : > { %2275 = vst [vmem:[%s3732_s29 + $0x168] sm:$0xff] %v2147_v54  ;;  %v2149_v59 = vadd.f32 %v2860_v58, %v2021_v55  ;;  %v1775_v60 = vpop.f32.mrb[88].mxu1  ;;  %v2871_v54 = vld [vmem:[%s3384_s12 + $0x1d0] sm:$0xff] }
 0x3d9   : > { %2276 = vst [vmem:[%s3732_s29 + $0x170] sm:$0xff] %v2148_v57  ;;  %v1776_v61 = vadd.f32 %v1775_v60, %v3714_v2  ;;  %v1777_v62 = vpop.f32.mrb[89].mxu1 }
 0x3da   : > { %2277 = vst [vmem:[%s3732_s29 + $0x178] sm:$0xff] %v2149_v59  ;;  %v1778_v63 = vadd.f32 %v1777_v62, %v3718_v4  ;;  %v1779_v6 = vpop.f32.mrb[90].mxu1 }
 0x3db   : > { %v2022_v23 = vmax.f32 %v1776_v61, 0.0  ;;  %v1780_v7 = vadd.f32 %v1779_v6, %v3714_v2  ;;  %v1781_v8 = vpop.f32.mrb[91].mxu1 }
 0x3dc   : > { %v2023_v9 = vmax.f32 %v1778_v63, 0.0  ;;  %v1782_v45 = vadd.f32 %v1781_v8, %v3718_v4 }
 0x3dd   : > { %v2150_v11 = vadd.f32 %v2861_v10, %v2022_v23  ;;  %v2024_v12 = vmax.f32 %v1780_v7, 0.0 }
 0x3de   : > { %v2151_v14 = vadd.f32 %v2862_v13, %v2023_v9  ;;  %v2025_v15 = vmax.f32 %v1782_v45, 0.0  ;;  %v2873_v9 = vld [vmem:[%s3384_s12 + $0x1e0] sm:$0xff] }
 0x3df   : > { %2278 = vst [vmem:[%s3732_s29 + $0x180] sm:$0xff] %v2150_v11  ;;  %v2152_v17 = vadd.f32 %v2863_v16, %v2024_v12  ;;  %v2874_v11 = vld [vmem:[%s3384_s12 + $0x1e8] sm:$0xff]  ;;  %v2876_v16 = vld [vmem:[%s3384_s12 + $0x1f8] sm:$0xff] }
 0x3e0   : > { %2279 = vst [vmem:[%s3732_s29 + $0x188] sm:$0xff] %v2151_v14  ;;  %v2153_v20 = vadd.f32 %v2864_v19, %v2025_v15  ;;  %v1785_v21 = vpop.f32.mrb[92].mxu1  ;;  %v2875_v14 = vld [vmem:[%s3384_s12 + $0x1f0] sm:$0xff] }
 0x3e1   : > { %2280 = vst [vmem:[%s3732_s29 + $0x190] sm:$0xff] %v2152_v17  ;;  %v1786_v22 = vadd.f32 %v1785_v21, %v3714_v2  ;;  %v1787_v24 = vpop.f32.mrb[93].mxu1 }
 0x3e2   : > { %2281 = vst [vmem:[%s3732_s29 + $0x198] sm:$0xff] %v2153_v20  ;;  %v1788_v25 = vadd.f32 %v1787_v24, %v3718_v4  ;;  %v1789_v18 = vpop.f32.mrb[94].mxu1 }
 0x3e3   : > { %v2026_v26 = vmax.f32 %v1786_v22, 0.0  ;;  %v1790_v27 = vadd.f32 %v1789_v18, %v3714_v2  ;;  %v1791_v28 = vpop.f32.mrb[95].mxu1 }
 0x3e4   : > { %v2027_v1 = vmax.f32 %v1788_v25, 0.0  ;;  %v1792_v5 = vadd.f32 %v1791_v28, %v3718_v4 }
 0x3e5   : > { %v2154_v0 = vadd.f32 %v2865_v29, %v2026_v26  ;;  %v2028_v30 = vmax.f32 %v1790_v27, 0.0 }
 0x3e6   : > { %v2155_v32 = vadd.f32 %v2866_v31, %v2027_v1  ;;  %v2029_v33 = vmax.f32 %v1792_v5, 0.0  ;;  %v2877_v1 = vld [vmem:[%s3384_s12 + $0x200] sm:$0xff] }
 0x3e7   : > { %2282 = vst [vmem:[%s3732_s29 + $0x1a0] sm:$0xff] %v2154_v0  ;;  %v2156_v35 = vadd.f32 %v2867_v34, %v2028_v30  ;;  %v2878_v0 = vld [vmem:[%s3384_s12 + $0x208] sm:$0xff]  ;;  %v2880_v34 = vld [vmem:[%s3384_s12 + $0x218] sm:$0xff] }
 0x3e8   : > { %2283 = vst [vmem:[%s3732_s29 + $0x1a8] sm:$0xff] %v2155_v32  ;;  %v2157_v37 = vadd.f32 %v2868_v36, %v2029_v33  ;;  %v1795_v38 = vpop.f32.mrb[96].mxu1  ;;  %v2879_v32 = vld [vmem:[%s3384_s12 + $0x210] sm:$0xff] }
 0x3e9   : > { %2284 = vst [vmem:[%s3732_s29 + $0x1b0] sm:$0xff] %v2156_v35  ;;  %v1796_v39 = vadd.f32 %v1795_v38, %v3714_v2  ;;  %v1797_v40 = vpop.f32.mrb[97].mxu1 }
 0x3ea   : > { %2285 = vst [vmem:[%s3732_s29 + $0x1b8] sm:$0xff] %v2157_v37  ;;  %v1798_v41 = vadd.f32 %v1797_v40, %v3718_v4  ;;  %v1799_v42 = vpop.f32.mrb[98].mxu1 }
 0x3eb   : > { %v2030_v43 = vmax.f32 %v1796_v39, 0.0  ;;  %v1800_v44 = vadd.f32 %v1799_v42, %v3714_v2  ;;  %v1801_v47 = vpop.f32.mrb[99].mxu1 }
 0x3ec   : > { %v2031_v48 = vmax.f32 %v1798_v41, 0.0  ;;  %v1802_v3 = vadd.f32 %v1801_v47, %v3718_v4 }
 0x3ed   : > { %v2158_v46 = vadd.f32 %v2869_v49, %v2030_v43  ;;  %v2032_v50 = vmax.f32 %v1800_v44, 0.0 }
 0x3ee   : > { %v2159_v52 = vadd.f32 %v2870_v51, %v2031_v48  ;;  %v2033_v53 = vmax.f32 %v1802_v3, 0.0  ;;  %v2881_v48 = vld [vmem:[%s3384_s12 + $0x220] sm:$0xff] }
 0x3ef   : > { %2286 = vst [vmem:[%s3732_s29 + $0x1c0] sm:$0xff] %v2158_v46  ;;  %v2160_v55 = vadd.f32 %v2871_v54, %v2032_v50  ;;  %v2882_v46 = vld [vmem:[%s3384_s12 + $0x228] sm:$0xff]  ;;  %v2884_v54 = vld [vmem:[%s3384_s12 + $0x238] sm:$0xff] }
 0x3f0   : > { %2287 = vst [vmem:[%s3732_s29 + $0x1c8] sm:$0xff] %v2159_v52  ;;  %v2161_v57 = vadd.f32 %v2872_v56, %v2033_v53  ;;  %v1805_v58 = vpop.f32.mrb[100].mxu1  ;;  %v2883_v52 = vld [vmem:[%s3384_s12 + $0x230] sm:$0xff] }
 0x3f1   : > { %2288 = vst [vmem:[%s3732_s29 + $0x1d0] sm:$0xff] %v2160_v55  ;;  %v1806_v59 = vadd.f32 %v1805_v58, %v3714_v2  ;;  %v1807_v60 = vpop.f32.mrb[101].mxu1 }
 0x3f2   : > { %2289 = vst [vmem:[%s3732_s29 + $0x1d8] sm:$0xff] %v2161_v57  ;;  %v1808_v61 = vadd.f32 %v1807_v60, %v3718_v4  ;;  %v1809_v62 = vpop.f32.mrb[102].mxu1 }
 0x3f3   : > { %v2034_v63 = vmax.f32 %v1806_v59, 0.0  ;;  %v1810_v6 = vadd.f32 %v1809_v62, %v3714_v2  ;;  %v1811_v23 = vpop.f32.mrb[103].mxu1 }
 0x3f4   : > { %v2035_v7 = vmax.f32 %v1808_v61, 0.0  ;;  %v1812_v8 = vadd.f32 %v1811_v23, %v3718_v4 }
 0x3f5   : > { %v2162_v45 = vadd.f32 %v2873_v9, %v2034_v63  ;;  %v2036_v10 = vmax.f32 %v1810_v6, 0.0 }
 0x3f6   : > { %v2163_v12 = vadd.f32 %v2874_v11, %v2035_v7  ;;  %v2037_v13 = vmax.f32 %v1812_v8, 0.0  ;;  %v2885_v7 = vld [vmem:[%s3384_s12 + $0x240] sm:$0xff] }
 0x3f7   : > { %2290 = vst [vmem:[%s3732_s29 + $0x1e0] sm:$0xff] %v2162_v45  ;;  %v2164_v15 = vadd.f32 %v2875_v14, %v2036_v10  ;;  %v2886_v45 = vld [vmem:[%s3384_s12 + $0x248] sm:$0xff]  ;;  %v2888_v14 = vld [vmem:[%s3384_s12 + $0x258] sm:$0xff] }
 0x3f8   : > { %2291 = vst [vmem:[%s3732_s29 + $0x1e8] sm:$0xff] %v2163_v12  ;;  %v2165_v17 = vadd.f32 %v2876_v16, %v2037_v13  ;;  %v1815_v19 = vpop.f32.mrb[104].mxu1  ;;  %v2887_v12 = vld [vmem:[%s3384_s12 + $0x250] sm:$0xff] }
 0x3f9   : > { %2292 = vst [vmem:[%s3732_s29 + $0x1f0] sm:$0xff] %v2164_v15  ;;  %v1816_v20 = vadd.f32 %v1815_v19, %v3714_v2  ;;  %v1817_v21 = vpop.f32.mrb[105].mxu1 }
 0x3fa   : > { %2293 = vst [vmem:[%s3732_s29 + $0x1f8] sm:$0xff] %v2165_v17  ;;  %v1818_v22 = vadd.f32 %v1817_v21, %v3718_v4  ;;  %v1819_v24 = vpop.f32.mrb[106].mxu1 }
 0x3fb   : > { %v2038_v25 = vmax.f32 %v1816_v20, 0.0  ;;  %v1820_v18 = vadd.f32 %v1819_v24, %v3714_v2  ;;  %v1821_v26 = vpop.f32.mrb[107].mxu1 }
 0x3fc   : > { %v2039_v27 = vmax.f32 %v1818_v22, 0.0  ;;  %v1822_v28 = vadd.f32 %v1821_v26, %v3718_v4 }
 0x3fd   : > { %v2166_v5 = vadd.f32 %v2877_v1, %v2038_v25  ;;  %v2040_v29 = vmax.f32 %v1820_v18, 0.0 }
 0x3fe   : > { %v2167_v30 = vadd.f32 %v2878_v0, %v2039_v27  ;;  %v2041_v31 = vmax.f32 %v1822_v28, 0.0  ;;  %v2889_v27 = vld [vmem:[%s3384_s12 + $0x260] sm:$0xff] }
 0x3ff   : > { %2294 = vst [vmem:[%s3732_s29 + $0x200] sm:$0xff] %v2166_v5  ;;  %v2168_v33 = vadd.f32 %v2879_v32, %v2040_v29  ;;  %v2890_v5 = vld [vmem:[%s3384_s12 + $0x268] sm:$0xff]  ;;  %v2892_v32 = vld [vmem:[%s3384_s12 + $0x278] sm:$0xff] }
 0x400   : > { %2295 = vst [vmem:[%s3732_s29 + $0x208] sm:$0xff] %v2167_v30  ;;  %v2169_v35 = vadd.f32 %v2880_v34, %v2041_v31  ;;  %v1825_v36 = vpop.f32.mrb[108].mxu1  ;;  %v2891_v30 = vld [vmem:[%s3384_s12 + $0x270] sm:$0xff] }
 0x401   : > { %2296 = vst [vmem:[%s3732_s29 + $0x210] sm:$0xff] %v2168_v33  ;;  %v1826_v37 = vadd.f32 %v1825_v36, %v3714_v2  ;;  %v1827_v38 = vpop.f32.mrb[109].mxu1 }
 0x402   : > { %2297 = vst [vmem:[%s3732_s29 + $0x218] sm:$0xff] %v2169_v35  ;;  %v1828_v39 = vadd.f32 %v1827_v38, %v3718_v4  ;;  %v1829_v40 = vpop.f32.mrb[110].mxu1 }
 0x403   : > { %v2042_v41 = vmax.f32 %v1826_v37, 0.0  ;;  %v1830_v42 = vadd.f32 %v1829_v40, %v3714_v2  ;;  %v1831_v43 = vpop.f32.mrb[111].mxu1 }
 0x404   : > { %v2043_v44 = vmax.f32 %v1828_v39, 0.0  ;;  %v1832_v47 = vadd.f32 %v1831_v43, %v3718_v4 }
 0x405   : > { %v2170_v3 = vadd.f32 %v2881_v48, %v2042_v41  ;;  %v2044_v49 = vmax.f32 %v1830_v42, 0.0 }
 0x406   : > { %v2171_v50 = vadd.f32 %v2882_v46, %v2043_v44  ;;  %v2045_v51 = vmax.f32 %v1832_v47, 0.0  ;;  %v2893_v44 = vld [vmem:[%s3384_s12 + $0x280] sm:$0xff] }
 0x407   : > { %2298 = vst [vmem:[%s3732_s29 + $0x220] sm:$0xff] %v2170_v3  ;;  %v2172_v53 = vadd.f32 %v2883_v52, %v2044_v49  ;;  %v2894_v3 = vld [vmem:[%s3384_s12 + $0x288] sm:$0xff]  ;;  %v2896_v52 = vld [vmem:[%s3384_s12 + $0x298] sm:$0xff] }
 0x408   : > { %2299 = vst [vmem:[%s3732_s29 + $0x228] sm:$0xff] %v2171_v50  ;;  %v2173_v55 = vadd.f32 %v2884_v54, %v2045_v51  ;;  %v1835_v56 = vpop.f32.mrb[112].mxu1  ;;  %v2895_v50 = vld [vmem:[%s3384_s12 + $0x290] sm:$0xff] }
 0x409   : > { %2300 = vst [vmem:[%s3732_s29 + $0x230] sm:$0xff] %v2172_v53  ;;  %v1836_v57 = vadd.f32 %v1835_v56, %v3714_v2  ;;  %v1837_v58 = vpop.f32.mrb[113].mxu1 }
 0x40a   : > { %2301 = vst [vmem:[%s3732_s29 + $0x238] sm:$0xff] %v2173_v55  ;;  %v1838_v59 = vadd.f32 %v1837_v58, %v3718_v4  ;;  %v1839_v60 = vpop.f32.mrb[114].mxu1 }
 0x40b   : > { %v2046_v61 = vmax.f32 %v1836_v57, 0.0  ;;  %v1840_v62 = vadd.f32 %v1839_v60, %v3714_v2  ;;  %v1841_v63 = vpop.f32.mrb[115].mxu1 }
 0x40c   : > { %v2047_v6 = vmax.f32 %v1838_v59, 0.0  ;;  %v1842_v23 = vadd.f32 %v1841_v63, %v3718_v4 }
 0x40d   : > { %v2174_v8 = vadd.f32 %v2885_v7, %v2046_v61  ;;  %v2048_v9 = vmax.f32 %v1840_v62, 0.0 }
 0x40e   : > { %v2175_v10 = vadd.f32 %v2886_v45, %v2047_v6  ;;  %v2049_v11 = vmax.f32 %v1842_v23, 0.0  ;;  %v2897_v6 = vld [vmem:[%s3384_s12 + $0x2a0] sm:$0xff] }
 0x40f   : > { %2302 = vst [vmem:[%s3732_s29 + $0x240] sm:$0xff] %v2174_v8  ;;  %v2176_v13 = vadd.f32 %v2887_v12, %v2048_v9  ;;  %v2898_v8 = vld [vmem:[%s3384_s12 + $0x2a8] sm:$0xff]  ;;  %v2900_v12 = vld [vmem:[%s3384_s12 + $0x2b8] sm:$0xff] }
 0x410   : > { %2303 = vst [vmem:[%s3732_s29 + $0x248] sm:$0xff] %v2175_v10  ;;  %v2177_v15 = vadd.f32 %v2888_v14, %v2049_v11  ;;  %v1845_v16 = vpop.f32.mrb[116].mxu1  ;;  %v2899_v10 = vld [vmem:[%s3384_s12 + $0x2b0] sm:$0xff] }
 0x411   : > { %2304 = vst [vmem:[%s3732_s29 + $0x250] sm:$0xff] %v2176_v13  ;;  %v1846_v17 = vadd.f32 %v1845_v16, %v3714_v2  ;;  %v1847_v19 = vpop.f32.mrb[117].mxu1 }
 0x412   : > { %2305 = vst [vmem:[%s3732_s29 + $0x258] sm:$0xff] %v2177_v15  ;;  %v1848_v20 = vadd.f32 %v1847_v19, %v3718_v4  ;;  %v1849_v21 = vpop.f32.mrb[118].mxu1 }
 0x413   : > { %v2050_v22 = vmax.f32 %v1846_v17, 0.0  ;;  %v1850_v24 = vadd.f32 %v1849_v21, %v3714_v2  ;;  %v1851_v25 = vpop.f32.mrb[119].mxu1 }
 0x414   : > { %v2051_v18 = vmax.f32 %v1848_v20, 0.0  ;;  %v1852_v26 = vadd.f32 %v1851_v25, %v3718_v4 }
 0x415   : > { %v2178_v28 = vadd.f32 %v2889_v27, %v2050_v22  ;;  %v2052_v1 = vmax.f32 %v1850_v24, 0.0 }
 0x416   : > { %v2179_v29 = vadd.f32 %v2890_v5, %v2051_v18  ;;  %v2053_v0 = vmax.f32 %v1852_v26, 0.0  ;;  %v2901_v18 = vld [vmem:[%s3384_s12 + $0x2c0] sm:$0xff] }
 0x417   : > { %2306 = vst [vmem:[%s3732_s29 + $0x260] sm:$0xff] %v2178_v28  ;;  %v2180_v31 = vadd.f32 %v2891_v30, %v2052_v1  ;;  %v2902_v28 = vld [vmem:[%s3384_s12 + $0x2c8] sm:$0xff]  ;;  %v2904_v30 = vld [vmem:[%s3384_s12 + $0x2d8] sm:$0xff] }
 0x418   : > { %2307 = vst [vmem:[%s3732_s29 + $0x268] sm:$0xff] %v2179_v29  ;;  %v2181_v33 = vadd.f32 %v2892_v32, %v2053_v0  ;;  %v1855_v34 = vpop.f32.mrb[120].mxu1  ;;  %v2903_v29 = vld [vmem:[%s3384_s12 + $0x2d0] sm:$0xff] }
 0x419   : > { %2308 = vst [vmem:[%s3732_s29 + $0x270] sm:$0xff] %v2180_v31  ;;  %v1856_v35 = vadd.f32 %v1855_v34, %v3714_v2  ;;  %v1857_v36 = vpop.f32.mrb[121].mxu1 }
 0x41a   : > { %2309 = vst [vmem:[%s3732_s29 + $0x278] sm:$0xff] %v2181_v33  ;;  %v1858_v37 = vadd.f32 %v1857_v36, %v3718_v4  ;;  %v1859_v38 = vpop.f32.mrb[122].mxu1 }
 0x41b   : > { %v2054_v39 = vmax.f32 %v1856_v35, 0.0  ;;  %v1860_v40 = vadd.f32 %v1859_v38, %v3714_v2  ;;  %v1861_v41 = vpop.f32.mrb[123].mxu1 }
 0x41c   : > { %v2055_v42 = vmax.f32 %v1858_v37, 0.0  ;;  %v1862_v43 = vadd.f32 %v1861_v41, %v3718_v4 }
 0x41d   : > { %v2182_v47 = vadd.f32 %v2893_v44, %v2054_v39  ;;  %v2056_v48 = vmax.f32 %v1860_v40, 0.0 }
 0x41e   : > { %v2183_v49 = vadd.f32 %v2894_v3, %v2055_v42  ;;  %v2057_v46 = vmax.f32 %v1862_v43, 0.0  ;;  %v2905_v42 = vld [vmem:[%s3384_s12 + $0x2e0] sm:$0xff] }
 0x41f   : > { %2310 = vst [vmem:[%s3732_s29 + $0x280] sm:$0xff] %v2182_v47  ;;  %v2184_v51 = vadd.f32 %v2895_v50, %v2056_v48  ;;  %v2906_v47 = vld [vmem:[%s3384_s12 + $0x2e8] sm:$0xff]  ;;  %v2908_v50 = vld [vmem:[%s3384_s12 + $0x2f8] sm:$0xff] }
 0x420   : > { %2311 = vst [vmem:[%s3732_s29 + $0x288] sm:$0xff] %v2183_v49  ;;  %v2185_v53 = vadd.f32 %v2896_v52, %v2057_v46  ;;  %v1865_v54 = vpop.f32.mrb[124].mxu1  ;;  %v2907_v49 = vld [vmem:[%s3384_s12 + $0x2f0] sm:$0xff] }
 0x421   : > { %2312 = vst [vmem:[%s3732_s29 + $0x290] sm:$0xff] %v2184_v51  ;;  %v1866_v55 = vadd.f32 %v1865_v54, %v3714_v2  ;;  %v1867_v56 = vpop.f32.mrb[125].mxu1 }
 0x422   : > { %2313 = vst [vmem:[%s3732_s29 + $0x298] sm:$0xff] %v2185_v53  ;;  %v1868_v57 = vadd.f32 %v1867_v56, %v3718_v4  ;;  %v1869_v58 = vpop.f32.mrb[126].mxu1 }
 0x423   : > { %v2058_v59 = vmax.f32 %v1866_v55, 0.0  ;;  %v1870_v60 = vadd.f32 %v1869_v58, %v3714_v2  ;;  %v1871_v61 = vpop.f32.mrb[127].mxu1 }
 0x424   : > { %v2059_v62 = vmax.f32 %v1868_v57, 0.0  ;;  %v1872_v63 = vadd.f32 %v1871_v61, %v3718_v4 }
 0x425   : > { %v2186_v23 = vadd.f32 %v2897_v6, %v2058_v59  ;;  %v2060_v7 = vmax.f32 %v1870_v60, 0.0 }
 0x426   : > { %v2187_v9 = vadd.f32 %v2898_v8, %v2059_v62  ;;  %v2061_v45 = vmax.f32 %v1872_v63, 0.0  ;;  %v2909_v62 = vld [vmem:[%s3384_s12 + $0x300] sm:$0xff] }
 0x427   : > { %2314 = vst [vmem:[%s3732_s29 + $0x2a0] sm:$0xff] %v2186_v23  ;;  %v2188_v11 = vadd.f32 %v2899_v10, %v2060_v7  ;;  %v2910_v23 = vld [vmem:[%s3384_s12 + $0x308] sm:$0xff]  ;;  %v2912_v10 = vld [vmem:[%s3384_s12 + $0x318] sm:$0xff] }
 0x428   : > { %2315 = vst [vmem:[%s3732_s29 + $0x2a8] sm:$0xff] %v2187_v9  ;;  %v2189_v13 = vadd.f32 %v2900_v12, %v2061_v45  ;;  %v1875_v14 = vpop.f32.mrb[128].mxu1  ;;  %v2911_v9 = vld [vmem:[%s3384_s12 + $0x310] sm:$0xff] }
 0x429   : > { %2316 = vst [vmem:[%s3732_s29 + $0x2b0] sm:$0xff] %v2188_v11  ;;  %v1876_v15 = vadd.f32 %v1875_v14, %v3714_v2  ;;  %v1877_v16 = vpop.f32.mrb[129].mxu1 }
 0x42a   : > { %2317 = vst [vmem:[%s3732_s29 + $0x2b8] sm:$0xff] %v2189_v13  ;;  %v1878_v17 = vadd.f32 %v1877_v16, %v3718_v4  ;;  %v1879_v19 = vpop.f32.mrb[130].mxu1 }
 0x42b   : > { %v2062_v20 = vmax.f32 %v1876_v15, 0.0  ;;  %v1880_v21 = vadd.f32 %v1879_v19, %v3714_v2  ;;  %v1881_v22 = vpop.f32.mrb[131].mxu1 }
 0x42c   : > { %v2063_v24 = vmax.f32 %v1878_v17, 0.0  ;;  %v1882_v25 = vadd.f32 %v1881_v22, %v3718_v4 }
 0x42d   : > { %v2190_v26 = vadd.f32 %v2901_v18, %v2062_v20  ;;  %v2064_v27 = vmax.f32 %v1880_v21, 0.0 }
 0x42e   : > { %v2191_v1 = vadd.f32 %v2902_v28, %v2063_v24  ;;  %v2065_v5 = vmax.f32 %v1882_v25, 0.0  ;;  %v2913_v24 = vld [vmem:[%s3384_s12 + $0x320] sm:$0xff] }
 0x42f   : > { %2318 = vst [vmem:[%s3732_s29 + $0x2c0] sm:$0xff] %v2190_v26  ;;  %v2192_v0 = vadd.f32 %v2903_v29, %v2064_v27  ;;  %v2914_v26 = vld [vmem:[%s3384_s12 + $0x328] sm:$0xff]  ;;  %v2916_v29 = vld [vmem:[%s3384_s12 + $0x338] sm:$0xff] }
 0x430   : > { %2319 = vst [vmem:[%s3732_s29 + $0x2c8] sm:$0xff] %v2191_v1  ;;  %v2193_v31 = vadd.f32 %v2904_v30, %v2065_v5  ;;  %v1885_v32 = vpop.f32.mrb[132].mxu1  ;;  %v2915_v1 = vld [vmem:[%s3384_s12 + $0x330] sm:$0xff] }
 0x431   : > { %2320 = vst [vmem:[%s3732_s29 + $0x2d0] sm:$0xff] %v2192_v0  ;;  %v1886_v33 = vadd.f32 %v1885_v32, %v3714_v2  ;;  %v1887_v34 = vpop.f32.mrb[133].mxu1 }
 0x432   : > { %2321 = vst [vmem:[%s3732_s29 + $0x2d8] sm:$0xff] %v2193_v31  ;;  %v1888_v35 = vadd.f32 %v1887_v34, %v3718_v4  ;;  %v1889_v36 = vpop.f32.mrb[134].mxu1 }
 0x433   : > { %v2066_v37 = vmax.f32 %v1886_v33, 0.0  ;;  %v1890_v38 = vadd.f32 %v1889_v36, %v3714_v2  ;;  %v1891_v39 = vpop.f32.mrb[135].mxu1 }
 0x434   : > { %v2067_v40 = vmax.f32 %v1888_v35, 0.0  ;;  %v1892_v41 = vadd.f32 %v1891_v39, %v3718_v4 }
 0x435   : > { %v2194_v43 = vadd.f32 %v2905_v42, %v2066_v37  ;;  %v2068_v44 = vmax.f32 %v1890_v38, 0.0 }
 0x436   : > { %v2195_v48 = vadd.f32 %v2906_v47, %v2067_v40  ;;  %v2069_v3 = vmax.f32 %v1892_v41, 0.0  ;;  %v2917_v40 = vld [vmem:[%s3384_s12 + $0x340] sm:$0xff] }
 0x437   : > { %2322 = vst [vmem:[%s3732_s29 + $0x2e0] sm:$0xff] %v2194_v43  ;;  %v2196_v46 = vadd.f32 %v2907_v49, %v2068_v44  ;;  %v2918_v43 = vld [vmem:[%s3384_s12 + $0x348] sm:$0xff]  ;;  %v2920_v49 = vld [vmem:[%s3384_s12 + $0x358] sm:$0xff] }
 0x438   : > { %2323 = vst [vmem:[%s3732_s29 + $0x2e8] sm:$0xff] %v2195_v48  ;;  %v2197_v51 = vadd.f32 %v2908_v50, %v2069_v3  ;;  %v1895_v52 = vpop.f32.mrb[136].mxu1  ;;  %v2919_v48 = vld [vmem:[%s3384_s12 + $0x350] sm:$0xff] }
 0x439   : > { %2324 = vst [vmem:[%s3732_s29 + $0x2f0] sm:$0xff] %v2196_v46  ;;  %v1896_v53 = vadd.f32 %v1895_v52, %v3714_v2  ;;  %v1897_v54 = vpop.f32.mrb[137].mxu1 }
 0x43a   : > { %2325 = vst [vmem:[%s3732_s29 + $0x2f8] sm:$0xff] %v2197_v51  ;;  %v1898_v55 = vadd.f32 %v1897_v54, %v3718_v4  ;;  %v1899_v56 = vpop.f32.mrb[138].mxu1 }
 0x43b   : > { %v2070_v57 = vmax.f32 %v1896_v53, 0.0  ;;  %v1900_v58 = vadd.f32 %v1899_v56, %v3714_v2  ;;  %v1901_v59 = vpop.f32.mrb[139].mxu1 }
 0x43c   : > { %v2071_v60 = vmax.f32 %v1898_v55, 0.0  ;;  %v1902_v61 = vadd.f32 %v1901_v59, %v3718_v4 }
 0x43d   : > { %v2198_v63 = vadd.f32 %v2909_v62, %v2070_v57  ;;  %v2072_v6 = vmax.f32 %v1900_v58, 0.0 }
 0x43e   : > { %v2199_v7 = vadd.f32 %v2910_v23, %v2071_v60  ;;  %v2073_v8 = vmax.f32 %v1902_v61, 0.0  ;;  %v2921_v60 = vld [vmem:[%s3384_s12 + $0x360] sm:$0xff] }
 0x43f   : > { %2326 = vst [vmem:[%s3732_s29 + $0x300] sm:$0xff] %v2198_v63  ;;  %v2200_v45 = vadd.f32 %v2911_v9, %v2072_v6  ;;  %v2922_v63 = vld [vmem:[%s3384_s12 + $0x368] sm:$0xff]  ;;  %v2924_v9 = vld [vmem:[%s3384_s12 + $0x378] sm:$0xff] }
 0x440   : > { %2327 = vst [vmem:[%s3732_s29 + $0x308] sm:$0xff] %v2199_v7  ;;  %v2201_v11 = vadd.f32 %v2912_v10, %v2073_v8  ;;  %v1905_v12 = vpop.f32.mrb[140].mxu1  ;;  %v2923_v7 = vld [vmem:[%s3384_s12 + $0x370] sm:$0xff] }
 0x441   : > { %2328 = vst [vmem:[%s3732_s29 + $0x310] sm:$0xff] %v2200_v45  ;;  %v1906_v13 = vadd.f32 %v1905_v12, %v3714_v2  ;;  %v1907_v14 = vpop.f32.mrb[141].mxu1 }
 0x442   : > { %2329 = vst [vmem:[%s3732_s29 + $0x318] sm:$0xff] %v2201_v11  ;;  %v1908_v15 = vadd.f32 %v1907_v14, %v3718_v4  ;;  %v1909_v16 = vpop.f32.mrb[142].mxu1 }
 0x443   : > { %v2074_v17 = vmax.f32 %v1906_v13, 0.0  ;;  %v1910_v19 = vadd.f32 %v1909_v16, %v3714_v2  ;;  %v1911_v20 = vpop.f32.mrb[143].mxu1 }
 0x444   : > { %v2075_v21 = vmax.f32 %v1908_v15, 0.0  ;;  %v1912_v22 = vadd.f32 %v1911_v20, %v3718_v4 }
 0x445   : > { %v2202_v25 = vadd.f32 %v2913_v24, %v2074_v17  ;;  %v2076_v18 = vmax.f32 %v1910_v19, 0.0 }
 0x446   : > { %v2203_v27 = vadd.f32 %v2914_v26, %v2075_v21  ;;  %v2077_v28 = vmax.f32 %v1912_v22, 0.0  ;;  %v2925_v21 = vld [vmem:[%s3384_s12 + $0x380] sm:$0xff] }
 0x447   : > { %2330 = vst [vmem:[%s3732_s29 + $0x320] sm:$0xff] %v2202_v25  ;;  %v2204_v5 = vadd.f32 %v2915_v1, %v2076_v18  ;;  %v2926_v25 = vld [vmem:[%s3384_s12 + $0x388] sm:$0xff]  ;;  %v2928_v1 = vld [vmem:[%s3384_s12 + $0x398] sm:$0xff] }
 0x448   : > { %2331 = vst [vmem:[%s3732_s29 + $0x328] sm:$0xff] %v2203_v27  ;;  %v2205_v0 = vadd.f32 %v2916_v29, %v2077_v28  ;;  %v1915_v30 = vpop.f32.mrb[144].mxu1  ;;  %v2927_v27 = vld [vmem:[%s3384_s12 + $0x390] sm:$0xff] }
 0x449   : > { %2332 = vst [vmem:[%s3732_s29 + $0x330] sm:$0xff] %v2204_v5  ;;  %v1916_v31 = vadd.f32 %v1915_v30, %v3714_v2  ;;  %v1917_v32 = vpop.f32.mrb[145].mxu1 }
 0x44a   : > { %2333 = vst [vmem:[%s3732_s29 + $0x338] sm:$0xff] %v2205_v0  ;;  %v1918_v33 = vadd.f32 %v1917_v32, %v3718_v4  ;;  %v1919_v34 = vpop.f32.mrb[146].mxu1 }
 0x44b   : > { %v2078_v35 = vmax.f32 %v1916_v31, 0.0  ;;  %v1920_v36 = vadd.f32 %v1919_v34, %v3714_v2  ;;  %v1921_v37 = vpop.f32.mrb[147].mxu1 }
 0x44c   : > { %v2079_v38 = vmax.f32 %v1918_v33, 0.0  ;;  %v1922_v39 = vadd.f32 %v1921_v37, %v3718_v4 }
 0x44d   : > { %v2206_v41 = vadd.f32 %v2917_v40, %v2078_v35  ;;  %v2080_v42 = vmax.f32 %v1920_v36, 0.0 }
 0x44e   : > { %v2207_v44 = vadd.f32 %v2918_v43, %v2079_v38  ;;  %v2081_v47 = vmax.f32 %v1922_v39, 0.0  ;;  %v2929_v38 = vld [vmem:[%s3384_s12 + $0x3a0] sm:$0xff] }
 0x44f   : > { %2334 = vst [vmem:[%s3732_s29 + $0x340] sm:$0xff] %v2206_v41  ;;  %v2208_v3 = vadd.f32 %v2919_v48, %v2080_v42  ;;  %v2930_v41 = vld [vmem:[%s3384_s12 + $0x3a8] sm:$0xff]  ;;  %v2932_v48 = vld [vmem:[%s3384_s12 + $0x3b8] sm:$0xff] }
 0x450   : > { %2335 = vst [vmem:[%s3732_s29 + $0x348] sm:$0xff] %v2207_v44  ;;  %v2209_v46 = vadd.f32 %v2920_v49, %v2081_v47  ;;  %v1925_v50 = vpop.f32.mrb[148].mxu1  ;;  %v2931_v44 = vld [vmem:[%s3384_s12 + $0x3b0] sm:$0xff] }
 0x451   : > { %2336 = vst [vmem:[%s3732_s29 + $0x350] sm:$0xff] %v2208_v3  ;;  %v1926_v51 = vadd.f32 %v1925_v50, %v3714_v2  ;;  %v1927_v52 = vpop.f32.mrb[149].mxu1 }
 0x452   : > { %2337 = vst [vmem:[%s3732_s29 + $0x358] sm:$0xff] %v2209_v46  ;;  %v1928_v53 = vadd.f32 %v1927_v52, %v3718_v4  ;;  %v1929_v54 = vpop.f32.mrb[150].mxu1 }
 0x453   : > { %v2082_v55 = vmax.f32 %v1926_v51, 0.0  ;;  %v1930_v56 = vadd.f32 %v1929_v54, %v3714_v2  ;;  %v1931_v57 = vpop.f32.mrb[151].mxu1 }
 0x454   : > { %v2083_v58 = vmax.f32 %v1928_v53, 0.0  ;;  %v1932_v59 = vadd.f32 %v1931_v57, %v3718_v4 }
 0x455   : > { %v2210_v61 = vadd.f32 %v2921_v60, %v2082_v55  ;;  %v2084_v62 = vmax.f32 %v1930_v56, 0.0 }
 0x456   : > { %v2211_v6 = vadd.f32 %v2922_v63, %v2083_v58  ;;  %v2085_v23 = vmax.f32 %v1932_v59, 0.0  ;;  %v2933_v58 = vld [vmem:[%s3384_s12 + $0x3c0] sm:$0xff] }
 0x457   : > { %2338 = vst [vmem:[%s3732_s29 + $0x360] sm:$0xff] %v2210_v61  ;;  %v2212_v8 = vadd.f32 %v2923_v7, %v2084_v62  ;;  %v2934_v61 = vld [vmem:[%s3384_s12 + $0x3c8] sm:$0xff]  ;;  %v2936_v7 = vld [vmem:[%s3384_s12 + $0x3d8] sm:$0xff] }
 0x458   : > { %2339 = vst [vmem:[%s3732_s29 + $0x368] sm:$0xff] %v2211_v6  ;;  %v2213_v45 = vadd.f32 %v2924_v9, %v2085_v23  ;;  %v1935_v10 = vpop.f32.mrb[152].mxu1  ;;  %v2935_v6 = vld [vmem:[%s3384_s12 + $0x3d0] sm:$0xff] }
 0x459   : > { %2340 = vst [vmem:[%s3732_s29 + $0x370] sm:$0xff] %v2212_v8  ;;  %v1936_v11 = vadd.f32 %v1935_v10, %v3714_v2  ;;  %v1937_v12 = vpop.f32.mrb[153].mxu1 }
 0x45a   : > { %2341 = vst [vmem:[%s3732_s29 + $0x378] sm:$0xff] %v2213_v45  ;;  %v1938_v13 = vadd.f32 %v1937_v12, %v3718_v4  ;;  %v1939_v14 = vpop.f32.mrb[154].mxu1 }
 0x45b   : > { %v2086_v15 = vmax.f32 %v1936_v11, 0.0  ;;  %v1940_v16 = vadd.f32 %v1939_v14, %v3714_v2  ;;  %v1941_v17 = vpop.f32.mrb[155].mxu1 }
 0x45c   : > { %v2087_v19 = vmax.f32 %v1938_v13, 0.0  ;;  %v1942_v20 = vadd.f32 %v1941_v17, %v3718_v4 }
 0x45d   : > { %v2214_v22 = vadd.f32 %v2925_v21, %v2086_v15  ;;  %v2088_v24 = vmax.f32 %v1940_v16, 0.0 }
 0x45e   : > { %v2215_v18 = vadd.f32 %v2926_v25, %v2087_v19  ;;  %v2089_v26 = vmax.f32 %v1942_v20, 0.0  ;;  %v2937_v19 = vld [vmem:[%s3384_s12 + $0x3e0] sm:$0xff] }
 0x45f   : > { %2342 = vst [vmem:[%s3732_s29 + $0x380] sm:$0xff] %v2214_v22  ;;  %v2216_v28 = vadd.f32 %v2927_v27, %v2088_v24  ;;  %v2938_v22 = vld [vmem:[%s3384_s12 + $0x3e8] sm:$0xff] }
 0x460   : > { %2343 = vst [vmem:[%s3732_s29 + $0x388] sm:$0xff] %v2215_v18  ;;  %v2217_v5 = vadd.f32 %v2928_v1, %v2089_v26  ;;  %v1945_v29 = vpop.f32.mrb[156].mxu1 }
 0x461   : > { %2344 = vst [vmem:[%s3732_s29 + $0x390] sm:$0xff] %v2216_v28  ;;  %v1946_v0 = vadd.f32 %v1945_v29, %v3714_v2  ;;  %v1947_v30 = vpop.f32.mrb[157].mxu1 }
 0x462   : > { %2345 = vst [vmem:[%s3732_s29 + $0x398] sm:$0xff] %v2217_v5  ;;  %v1948_v31 = vadd.f32 %v1947_v30, %v3718_v4  ;;  %v1949_v32 = vpop.f32.mrb[158].mxu1 }
 0x463   : > { %v2090_v33 = vmax.f32 %v1946_v0, 0.0  ;;  %v1950_v34 = vadd.f32 %v1949_v32, %v3714_v2  ;;  %v1951_v35 = vpop.f32.mrb[159].mxu1 }
 0x464   : > { %v2091_v36 = vmax.f32 %v1948_v31, 0.0  ;;  %v1952_v37 = vadd.f32 %v1951_v35, %v3718_v4 }
 0x465   : > { %v2218_v39 = vadd.f32 %v2929_v38, %v2090_v33  ;;  %v2092_v40 = vmax.f32 %v1950_v34, 0.0 }
 0x466   : > { %v2219_v42 = vadd.f32 %v2930_v41, %v2091_v36  ;;  %v2093_v43 = vmax.f32 %v1952_v37, 0.0 }
 0x467   : > { %2346 = vst [vmem:[%s3732_s29 + $0x3a0] sm:$0xff] %v2218_v39  ;;  %v2220_v47 = vadd.f32 %v2931_v44, %v2092_v40 }
 0x468   : > { %2347 = vst [vmem:[%s3732_s29 + $0x3a8] sm:$0xff] %v2219_v42  ;;  %v2221_v3 = vadd.f32 %v2932_v48, %v2093_v43  ;;  %v1955_v49 = vpop.f32.mrb[160].mxu1 }
 0x469   : > { %2348 = vst [vmem:[%s3732_s29 + $0x3b0] sm:$0xff] %v2220_v47  ;;  %v1956_v46 = vadd.f32 %v1955_v49, %v3714_v2  ;;  %v1957_v50 = vpop.f32.mrb[161].mxu1 }
 0x46a   : > { %2349 = vst [vmem:[%s3732_s29 + $0x3b8] sm:$0xff] %v2221_v3  ;;  %v1958_v51 = vadd.f32 %v1957_v50, %v3718_v4  ;;  %v1959_v52 = vpop.f32.mrb[162].mxu1 }
 0x46b   : > { %v2094_v53 = vmax.f32 %v1956_v46, 0.0  ;;  %v1960_v54 = vadd.f32 %v1959_v52, %v3714_v2  ;;  %v1961_v55 = vpop.f32.mrb[163].mxu1 }
 0x46c   : > { %v2095_v56 = vmax.f32 %v1958_v51, 0.0  ;;  %v1962_v57 = vadd.f32 %v1961_v55, %v3718_v4 }
 0x46d   : > { %v2222_v59 = vadd.f32 %v2933_v58, %v2094_v53  ;;  %v2096_v60 = vmax.f32 %v1960_v54, 0.0 }
 0x46e   : > { %v2223_v62 = vadd.f32 %v2934_v61, %v2095_v56  ;;  %v2097_v63 = vmax.f32 %v1962_v57, 0.0 }
 0x46f   : > { %2350 = vst [vmem:[%s3732_s29 + $0x3c0] sm:$0xff] %v2222_v59  ;;  %v2224_v23 = vadd.f32 %v2935_v6, %v2096_v60 }
 0x470   : > { %2351 = vst [vmem:[%s3732_s29 + $0x3c8] sm:$0xff] %v2223_v62  ;;  %v2225_v8 = vadd.f32 %v2936_v7, %v2097_v63  ;;  %v1965_v9 = vpop.f32.mrb[164].mxu1 }
 0x471   : > { %2352 = vst [vmem:[%s3732_s29 + $0x3d0] sm:$0xff] %v2224_v23  ;;  %v1966_v45 = vadd.f32 %v1965_v9, %v3714_v2  ;;  %v1967_v10 = vpop.f32.mrb[165].mxu1 }
 0x472   : > { %2353 = vst [vmem:[%s3732_s29 + $0x3d8] sm:$0xff] %v2225_v8  ;;  %v1968_v11 = vadd.f32 %v1967_v10, %v3718_v4  ;;  %v1969_v12 = vpop.f32.mrb[166].mxu1 }
 0x473   : > { %v2098_v13 = vmax.f32 %v1966_v45, 0.0  ;;  %v1970_v14 = vadd.f32 %v1969_v12, %v3714_v2  ;;  %v1971_v15 = vpop.f32.mrb[167].mxu1  ;;  %v2939_v2 = vld [vmem:[%s3384_s12 + $0x3f0] sm:$0xff] }
 0x474   : > { %v2099_v16 = vmax.f32 %v1968_v11, 0.0  ;;  %v1972_v17 = vadd.f32 %v1971_v15, %v3718_v4  ;;  %v2940_v4 = vld [vmem:[%s3384_s12 + $0x3f8] sm:$0xff] }
 0x475   : > { %v2226_v20 = vadd.f32 %v2937_v19, %v2098_v13  ;;  %v2100_v21 = vmax.f32 %v1970_v14, 0.0 }
 0x476   : > { %v2227_v24 = vadd.f32 %v2938_v22, %v2099_v16  ;;  %v2101_v25 = vmax.f32 %v1972_v17, 0.0 }
 0x477   : > { %2354 = vst [vmem:[%s3732_s29 + $0x3e0] sm:$0xff] %v2226_v20  ;;  %v2228_v18 = vadd.f32 %v2939_v2, %v2100_v21 }
 0x478   : > { %2355 = vst [vmem:[%s3732_s29 + $0x3e8] sm:$0xff] %v2227_v24  ;;  %v2229_v26 = vadd.f32 %v2940_v4, %v2101_v25 }
 0x479   : > { %2356 = vst [vmem:[%s3732_s29 + $0x3f0] sm:$0xff] %v2228_v18 }
 0x47a   : > { %2357 = vst [vmem:[%s3732_s29 + $0x3f8] sm:$0xff] %v2229_v26 }
 0x47b   : > { %3068 = shalt.err (!%p3065_p4)
}
 0x47c   : > { %s3069_s12 = scalar_lea.hbm %s4120_s16, 16384  ;;  %s3073_s13 = scalar_lea.hbm %s4177_s7, 32768 }
 0x47d   : > { %p3070_p9 = scmp.ne.s32.totalorder %s4120_s16, %s3069_s12  ;;  %p3074_p8 = scmp.lt.u32.totalorder %s4120_s16, %s4177_s7 }
 0x47e   : > { %p3075_p13 = scmp.lt.u32.totalorder %s3073_s13, %s3069_s12  ;;  %p3077_p10 = scmp.lt.u32.totalorder %s3069_s12, %s4120_s16 }
 0x47f   : > { %p3071_p0 = pnand %p3070_p9, %p3330_p5 }
 0x480   : > { %p3076_p6 = por %p3075_p13, %p3074_p8 }
 0x481   : > { %p3072_p11 = pneg %p3071_p0 }
 0x482   : > { %p3078_p3 = por %p3077_p10, %p3076_p6 }
 0x484   : > { %p3079_p7 = pnand %p3078_p3, %p3072_p11 }
 0x486   : > { %3082 = shalt.err (!%p3079_p7)
}
 0x487   : > { %s3143_s15 = smov 256   ;;  %s3144_s18 = smov 16  }
 0x488   : > { %2693 = dma.vmem_to_hbm [thread:$0]  (%p3330_p5), %s4122_s17, 16384, %s4120_s16, %s2359_s28, %s3143_s15, %s3143_s15, %s3144_s18  }
 0x489 PF: > { %s4197_s23 = sld [smem:[#allocation15_spill]]  ;;  %s2388_s30 = sand.u32 1, %s3117_s24  }
 0x48a   : > { %p4199_p2 = scmp.ge.s32.totalorder %s3129_s27, 2  ;;  %s2389_s9 = scalar_lea.sflag [#allocation4], %s2388_s30 }
 0x48f   : > { %p4198_p12 = scmp.ne.s32.totalorder %s4197_s23, 0 }
 0x491   : > { %p2710_p1 = pnand %p4199_p2, %p4198_p12 }
 0x493   : > { %3112 = dma.done.wait (!%p2710_p1), %s2389_s9, 16384  }
 0x494   : > { %3114 = vsyncadd (!%p2710_p1), %s2389_s9, 4294950912  ;;  %p22_p4 = scmp.ge.s32.totalorder %s3316_s8, 4   ;;  %s4200_s24 = smov %s3121_s25 }
 0x495   : > { %s4201_s25 = smov %s3125_s26  ;;  %s4202_s26 = smov %s3326_s19 }
 0x496   : > { %s4203_s27 = smov %s3316_s8  ;;  %24 = sbr.rel (!%p22_p4) target bundleno = 7 (0x7), region = 105 }
 0x49d   :  { %2394 = vsyncpa [#allocation3], 1 }
 0x49e   :  { %2396 = vsyncpa [#allocation3 + $0x1], 1 }
 0x49f   :  { %2397 = vsyncpa [#allocation6], 1 }
 0x4a0   :  { %2398 = vsyncpa [#allocation9], 1 }
 0x4a1   :  { %2399 = vsyncpa [#allocation4], 1 }
 0x4a2   :  { %2401 = vsyncpa [#allocation4 + $0x1], 1 }

</bundles_post_ra>
